<compile_context>
chip_gen: v7x
topology: tpu7x:2x2x1
jax: 0.10.0
libtpu: 0.0.40
codegen_flags: <defaults>
</compile_context>

<pallas_src>
import functools

import numpy as np
import jax
import jax.numpy as jnp
from jax import lax
from jax.experimental import pallas as pl
from jax.experimental.pallas import tpu as pltpu


# ---------------------------------------------------------------------------
# Fused kernel: per batch element, channel attention + conv3d + sigmoid + mul.
# ---------------------------------------------------------------------------
def _attention_kernel(x_ref, w1_ref, w2t_ref, wmat_ref, bias_ref, mask_ref,
                      out_ref, *, H, W, pad):
    C = x_ref.shape[1]
    N = x_ref.shape[2]

    x = x_ref[0]                                       # (C, N) f32

    # ---- channel attention: global avg/max pool + shared MLP + sigmoid ----
    avg = jnp.mean(x, axis=1, keepdims=True)           # (C, 1)
    mx = jnp.max(x, axis=1, keepdims=True)             # (C, 1)
    w1 = w1_ref[...]                                   # (C, Cr)
    w2t = w2t_ref[...]                                 # (C, Cr)  (= w2.T)

    def mlp(col):                                      # col: (C, 1)
        # Linear(C->Cr, no bias) + ReLU, then Linear(Cr->C, no bias) + ReLU,
        # done as broadcast-multiply + cross-sublane / cross-lane reductions
        # (tiny, keeps everything in column form -> no transposes needed).
        h = jnp.maximum(jnp.sum(col * w1, axis=0, keepdims=True), 0.0)   # (1, Cr)
        o = jnp.maximum(jnp.sum(h * w2t, axis=1, keepdims=True), 0.0)    # (C, 1)
        return o

    gate = jax.nn.sigmoid(mlp(avg) + mlp(mx))          # (C, 1)
    cha = x * gate                                     # channel-gated input (C, N)

    # ---- 3x3x3 conv as 27 lane-shifted, border-masked MXU matmuls ----
    zpad = jnp.zeros((C, pad), jnp.float32)
    ext = jnp.concatenate([zpad, cha, zpad], axis=1)   # (C, N + 2*pad)

    acc = jnp.zeros((C, N), jnp.float32)
    t = 0
    for kd in range(3):
        for kh in range(3):
            for kw in range(3):
                off = (kd - 1) * H * W + (kh - 1) * W + (kw - 1)
                shifted = ext[:, pad + off: pad + off + N]       # (C, N)
                shifted = shifted * mask_ref[t]                  # zero at D/H/W borders
                acc = acc + jnp.dot(wmat_ref[t], shifted,
                                    preferred_element_type=jnp.float32)
                t += 1

    spa = jax.nn.sigmoid(acc + bias_ref[...])          # spatial attention (C, N)
    out_ref[0] = (cha * spa).astype(out_ref.dtype)     # lane-dense store


# ---------------------------------------------------------------------------
# Border masks for the 27 taps (compile-time constants; avoids in-kernel
# integer div/mod).
# ---------------------------------------------------------------------------
def _tap_masks(D, H, W):
    n = np.arange(D * H * W)
    d = n // (H * W)
    h = (n // W) % H
    w = n % W
    masks = np.zeros((27, 1, D * H * W), np.float32)
    t = 0
    for kd in range(3):
        for kh in range(3):
            for kw in range(3):
                valid = ((d + kd - 1 >= 0) & (d + kd - 1 < D) &
                         (h + kh - 1 >= 0) & (h + kh - 1 < H) &
                         (w + kw - 1 >= 0) & (w + kw - 1 < W))
                masks[t, 0] = valid
                t += 1
    return masks


# ---------------------------------------------------------------------------
# Wrapper: one fused pallas_call, no HBM transposes / padding.
# ---------------------------------------------------------------------------
@jax.jit
def attention_forward(x_ncdhw, w1, w2, w_conv, b_conv):
    """x: (B, C, D, H, W) float32 -> (B, C, D, H, W) float32."""
    B, C, D, H, W = x_ncdhw.shape
    N = D * H * W
    Cr = w1.shape[1]
    pad = ((H * W + W + 1 + 127) // 128) * 128         # lane pad >= max |tap shift|

    x3 = x_ncdhw.reshape(B, C, N)                      # free reshape (no transpose)
    w_mat = jnp.transpose(w_conv, (0, 1, 2, 4, 3)).reshape(27, C, C)  # (tap, c_out, c_in)
    w2t = w2.T                                         # (C, Cr)
    b_col = b_conv.reshape(C, 1)
    masks = jnp.asarray(_tap_masks(D, H, W))           # (27, 1, N)

    kernel = functools.partial(_attention_kernel, H=H, W=W, pad=pad)
    out3 = pl.pallas_call(
        kernel,
        out_shape=jax.ShapeDtypeStruct((B, C, N), jnp.float32),
        grid=(B,),
        in_specs=[
            pl.BlockSpec((1, C, N), lambda b: (b, 0, 0)),    # activations (per batch)
            pl.BlockSpec((C, Cr), lambda b: (0, 0)),         # w1  (C, C//r)
            pl.BlockSpec((C, Cr), lambda b: (0, 0)),         # w2.T (C, C//r)
            pl.BlockSpec((27, C, C), lambda b: (0, 0, 0)),   # conv weights (c_out, c_in)
            pl.BlockSpec((C, 1), lambda b: (0, 0)),          # conv bias column
            pl.BlockSpec((27, 1, N), lambda b: (0, 0, 0)),   # border masks
        ],
        out_specs=pl.BlockSpec((1, C, N), lambda b: (b, 0, 0)),
        compiler_params=pltpu.CompilerParams(
            dimension_semantics=("parallel",)),
    )(x3, w1, w2t, w_mat, b_col, masks)

    return out3.reshape(B, C, D, H, W)


# ---------------------------------------------------------------------------
# Pure-JAX reference (mirrors the PyTorch forward exactly) for a sanity check.
# ---------------------------------------------------------------------------
def reference_forward(x_ncdhw, w1, w2, w_conv, b_conv):
    B, C = x_ncdhw.shape[:2]
    xs = x_ncdhw.reshape(B, C, -1)
    avg = xs.mean(-1)
    mx = xs.max(-1)

    def mlp(v):
        return jnp.maximum(jnp.maximum(v @ w1, 0.0) @ w2, 0.0)

    gate = jax.nn.sigmoid(mlp(avg) + mlp(mx))                         # (B, C)
    cha = x_ncdhw * gate[:, :, None, None, None]

    cha_l = jnp.transpose(cha, (0, 2, 3, 4, 1))                       # NDHWC
    conv = lax.conv_general_dilated(
        cha_l, w_conv, window_strides=(1, 1, 1), padding="SAME",
        dimension_numbers=("NDHWC", "DHWIO", "NDHWC")) + b_conv
    spa = jax.nn.sigmoid(conv)
    out_l = cha_l * spa
    return jnp.transpose(out_l, (0, 4, 1, 2, 3))


if __name__ == "__main__":
    # Small shapes consistent with the module: channel=32, reduction=8, volume 4x8x8.
    B, C, D, H, W = 2, 32, 4, 8, 8
    reduction = 8

    key = jax.random.PRNGKey(0)
    kx, k1, k2, k3, k4 = jax.random.split(key, 5)

    x = jax.random.normal(kx, (B, C, D, H, W), jnp.float32)

    # PyTorch shapes: Linear(C, C//r, bias=False), Linear(C//r, C, bias=False),
    # Conv3d(C, C, 3, padding=1) with bias (stored here as DHWIO).
    w1 = jax.random.normal(k1, (C, C // reduction), jnp.float32) * 0.2
    w2 = jax.random.normal(k2, (C // reduction, C), jnp.float32) * 0.2
    w_conv = jax.random.normal(k3, (3, 3, 3, C, C), jnp.float32) * 0.05
    b_conv = jax.random.normal(k4, (C,), jnp.float32) * 0.1

    out = attention_forward(x, w1, w2, w_conv, b_conv)
    out = jax.block_until_ready(out)

    ref = reference_forward(x, w1, w2, w_conv, b_conv)
    assert out.shape == (B, C, D, H, W)
    assert jnp.allclose(out, ref, rtol=2e-4, atol=2e-4), "mismatch vs reference"

    print("KERNEL_OK")
</pallas_src>

<mosaic_0001>
module attributes {stable_mosaic.version = 11 : i64} {
  func.func @_attention_kernel(%arg0: i32, %arg1: memref<1x32x256xf32, #tpu.memory_space<vmem>>, %arg2: memref<32x4xf32, #tpu.memory_space<vmem>>, %arg3: memref<32x4xf32, #tpu.memory_space<vmem>>, %arg4: memref<27x32x32xf32, #tpu.memory_space<vmem>>, %arg5: memref<32x1xf32, #tpu.memory_space<vmem>>, %arg6: memref<27x1x256xf32, #tpu.memory_space<vmem>>, %arg7: memref<1x32x256xf32, #tpu.memory_space<vmem>>) attributes {dimension_semantics = [#tpu.dimension_semantics<parallel>], iteration_bounds = array<i64: 2>, scalar_prefetch = 0 : i64, scratch_operands = 0 : i64, tpu.core_type = #tpu.core_type<tc>, window_params = [{transform_indices = @transform_0, window_bounds = array<i64: 1, 32, 256>}, {pipeline_mode = #tpu.pipeline_mode<synchronous>, transform_indices = @transform_1, window_bounds = array<i64: 32, 4>}, {pipeline_mode = #tpu.pipeline_mode<synchronous>, transform_indices = @transform_2, window_bounds = array<i64: 32, 4>}, {pipeline_mode = #tpu.pipeline_mode<synchronous>, transform_indices = @transform_3, window_bounds = array<i64: 27, 32, 32>}, {pipeline_mode = #tpu.pipeline_mode<synchronous>, transform_indices = @transform_4, window_bounds = array<i64: 32, 1>}, {pipeline_mode = #tpu.pipeline_mode<synchronous>, transform_indices = @transform_5, window_bounds = array<i64: 27, 1, 256>}, {transform_indices = @transform_6, window_bounds = array<i64: 1, 32, 256>}]} {
    %c0 = arith.constant 0 : index
    %c0_0 = arith.constant 0 : index
    %c0_1 = arith.constant 0 : index
    %0 = vector.load %arg1[%c0, %c0_0, %c0_1] : memref<1x32x256xf32, #tpu.memory_space<vmem>>, vector<1x32x256xf32>
    %1 = vector.shape_cast %0 : vector<1x32x256xf32> to vector<32x256xf32>
    %cst = arith.constant dense<0.000000e+00> : vector<32xf32>
    %2 = vector.multi_reduction <add>, %1, %cst [1] : vector<32x256xf32> to vector<32xf32>
    %3 = vector.shape_cast %2 : vector<32xf32> to vector<32x1xf32>
    %cst_2 = arith.constant 2.560000e+02 : f32
    %4 = vector.broadcast %cst_2 : f32 to vector<32x1xf32>
    %5 = arith.divf %3, %4 : vector<32x1xf32>
    %cst_3 = arith.constant dense<0xFF800000> : vector<32xf32>
    %6 = vector.multi_reduction <maximumf>, %1, %cst_3 [1] : vector<32x256xf32> to vector<32xf32>
    %7 = vector.shape_cast %6 : vector<32xf32> to vector<32x1xf32>
    %c0_4 = arith.constant 0 : index
    %c0_5 = arith.constant 0 : index
    %8 = vector.load %arg2[%c0_4, %c0_5] : memref<32x4xf32, #tpu.memory_space<vmem>>, vector<32x4xf32>
    %c0_6 = arith.constant 0 : index
    %c0_7 = arith.constant 0 : index
    %9 = vector.load %arg3[%c0_6, %c0_7] : memref<32x4xf32, #tpu.memory_space<vmem>>, vector<32x4xf32>
    %10 = vector.broadcast %5 : vector<32x1xf32> to vector<32x4xf32>
    %11 = arith.mulf %10, %8 : vector<32x4xf32>
    %cst_8 = arith.constant dense<0.000000e+00> : vector<4xf32>
    %12 = vector.multi_reduction <add>, %11, %cst_8 [0] : vector<32x4xf32> to vector<4xf32>
    %13 = vector.shape_cast %12 : vector<4xf32> to vector<1x4xf32>
    %cst_9 = arith.constant 0.000000e+00 : f32
    %14 = vector.broadcast %cst_9 : f32 to vector<1x4xf32>
    %15 = arith.maximumf %13, %14 : vector<1x4xf32>
    %16 = vector.broadcast %15 : vector<1x4xf32> to vector<32x4xf32>
    %17 = arith.mulf %16, %9 : vector<32x4xf32>
    %cst_10 = arith.constant dense<0.000000e+00> : vector<32xf32>
    %18 = vector.multi_reduction <add>, %17, %cst_10 [1] : vector<32x4xf32> to vector<32xf32>
    %19 = vector.shape_cast %18 : vector<32xf32> to vector<32x1xf32>
    %cst_11 = arith.constant 0.000000e+00 : f32
    %20 = vector.broadcast %cst_11 : f32 to vector<32x1xf32>
    %21 = arith.maximumf %19, %20 : vector<32x1xf32>
    %22 = vector.broadcast %7 : vector<32x1xf32> to vector<32x4xf32>
    %23 = arith.mulf %22, %8 : vector<32x4xf32>
    %cst_12 = arith.constant dense<0.000000e+00> : vector<4xf32>
    %24 = vector.multi_reduction <add>, %23, %cst_12 [0] : vector<32x4xf32> to vector<4xf32>
    %25 = vector.shape_cast %24 : vector<4xf32> to vector<1x4xf32>
    %cst_13 = arith.constant 0.000000e+00 : f32
    %26 = vector.broadcast %cst_13 : f32 to vector<1x4xf32>
    %27 = arith.maximumf %25, %26 : vector<1x4xf32>
    %28 = vector.broadcast %27 : vector<1x4xf32> to vector<32x4xf32>
    %29 = arith.mulf %28, %9 : vector<32x4xf32>
    %cst_14 = arith.constant dense<0.000000e+00> : vector<32xf32>
    %30 = vector.multi_reduction <add>, %29, %cst_14 [1] : vector<32x4xf32> to vector<32xf32>
    %31 = vector.shape_cast %30 : vector<32xf32> to vector<32x1xf32>
    %cst_15 = arith.constant 0.000000e+00 : f32
    %32 = vector.broadcast %cst_15 : f32 to vector<32x1xf32>
    %33 = arith.maximumf %31, %32 : vector<32x1xf32>
    %34 = arith.addf %21, %33 : vector<32x1xf32>
    %35 = arith.negf %34 : vector<32x1xf32>
    %36 = math.exp %35 : vector<32x1xf32>
    %cst_16 = arith.constant 1.000000e+00 : f32
    %37 = vector.broadcast %cst_16 : f32 to vector<32x1xf32>
    %38 = arith.addf %37, %36 : vector<32x1xf32>
    %39 = arith.divf %37, %38 : vector<32x1xf32>
    %40 = vector.broadcast %39 : vector<32x1xf32> to vector<32x256xf32>
    %41 = arith.mulf %1, %40 : vector<32x256xf32>
    %cst_17 = arith.constant 0.000000e+00 : f32
    %42 = vector.broadcast %cst_17 : f32 to vector<32x128xf32>
    %43 = tpu.concatenate %42, %41, %42 in 1 : vector<32x128xf32>, vector<32x256xf32>, vector<32x128xf32> -> vector<32x512xf32>
    %cst_18 = arith.constant 0.000000e+00 : f32
    %44 = vector.broadcast %cst_18 : f32 to vector<32x256xf32>
    %45 = vector.extract_strided_slice %43 {offsets = [0, 55], sizes = [32, 256], strides = [1, 1]} : vector<32x512xf32> to vector<32x256xf32>
    %c0_19 = arith.constant 0 : index
    %c0_20 = arith.constant 0 : index
    %c0_21 = arith.constant 0 : index
    %46 = vector.load %arg6[%c0_19, %c0_20, %c0_21] : memref<27x1x256xf32, #tpu.memory_space<vmem>>, vector<1x1x256xf32>
    %47 = vector.shape_cast %46 : vector<1x1x256xf32> to vector<1x256xf32>
    %48 = vector.broadcast %47 : vector<1x256xf32> to vector<32x256xf32>
    %49 = arith.mulf %45, %48 : vector<32x256xf32>
    %c0_22 = arith.constant 0 : index
    %c0_23 = arith.constant 0 : index
    %c0_24 = arith.constant 0 : index
    %50 = vector.load %arg4[%c0_22, %c0_23, %c0_24] : memref<27x32x32xf32, #tpu.memory_space<vmem>>, vector<1x32x32xf32>
    %51 = vector.shape_cast %50 : vector<1x32x32xf32> to vector<32x32xf32>
    %cst_25 = arith.constant dense<0.000000e+00> : vector<32x256xf32>
    %52 = tpu.matmul %51, %49, %cst_25 {dimension_numbers = #tpu.dot_dimension_numbers<[1], [0], [0], [1], [0, 0, 1, 1], [], []>} : vector<32x32xf32>, vector<32x256xf32>, vector<32x256xf32> -> vector<32x256xf32>
    %53 = arith.addf %44, %52 : vector<32x256xf32>
    %54 = vector.extract_strided_slice %43 {offsets = [0, 56], sizes = [32, 256], strides = [1, 1]} : vector<32x512xf32> to vector<32x256xf32>
    %c1 = arith.constant 1 : index
    %c0_26 = arith.constant 0 : index
    %c0_27 = arith.constant 0 : index
    %55 = vector.load %arg6[%c1, %c0_26, %c0_27] : memref<27x1x256xf32, #tpu.memory_space<vmem>>, vector<1x1x256xf32>
    %56 = vector.shape_cast %55 : vector<1x1x256xf32> to vector<1x256xf32>
    %57 = vector.broadcast %56 : vector<1x256xf32> to vector<32x256xf32>
    %58 = arith.mulf %54, %57 : vector<32x256xf32>
    %c1_28 = arith.constant 1 : index
    %c0_29 = arith.constant 0 : index
    %c0_30 = arith.constant 0 : index
    %59 = vector.load %arg4[%c1_28, %c0_29, %c0_30] : memref<27x32x32xf32, #tpu.memory_space<vmem>>, vector<1x32x32xf32>
    %60 = vector.shape_cast %59 : vector<1x32x32xf32> to vector<32x32xf32>
    %cst_31 = arith.constant dense<0.000000e+00> : vector<32x256xf32>
    %61 = tpu.matmul %60, %58, %cst_31 {dimension_numbers = #tpu.dot_dimension_numbers<[1], [0], [0], [1], [0, 0, 1, 1], [], []>} : vector<32x32xf32>, vector<32x256xf32>, vector<32x256xf32> -> vector<32x256xf32>
    %62 = arith.addf %53, %61 : vector<32x256xf32>
    %63 = vector.extract_strided_slice %43 {offsets = [0, 57], sizes = [32, 256], strides = [1, 1]} : vector<32x512xf32> to vector<32x256xf32>
    %c2 = arith.constant 2 : index
    %c0_32 = arith.constant 0 : index
    %c0_33 = arith.constant 0 : index
    %64 = vector.load %arg6[%c2, %c0_32, %c0_33] : memref<27x1x256xf32, #tpu.memory_space<vmem>>, vector<1x1x256xf32>
    %65 = vector.shape_cast %64 : vector<1x1x256xf32> to vector<1x256xf32>
    %66 = vector.broadcast %65 : vector<1x256xf32> to vector<32x256xf32>
    %67 = arith.mulf %63, %66 : vector<32x256xf32>
    %c2_34 = arith.constant 2 : index
    %c0_35 = arith.constant 0 : index
    %c0_36 = arith.constant 0 : index
    %68 = vector.load %arg4[%c2_34, %c0_35, %c0_36] : memref<27x32x32xf32, #tpu.memory_space<vmem>>, vector<1x32x32xf32>
    %69 = vector.shape_cast %68 : vector<1x32x32xf32> to vector<32x32xf32>
    %cst_37 = arith.constant dense<0.000000e+00> : vector<32x256xf32>
    %70 = tpu.matmul %69, %67, %cst_37 {dimension_numbers = #tpu.dot_dimension_numbers<[1], [0], [0], [1], [0, 0, 1, 1], [], []>} : vector<32x32xf32>, vector<32x256xf32>, vector<32x256xf32> -> vector<32x256xf32>
    %71 = arith.addf %62, %70 : vector<32x256xf32>
    %72 = vector.extract_strided_slice %43 {offsets = [0, 63], sizes = [32, 256], strides = [1, 1]} : vector<32x512xf32> to vector<32x256xf32>
    %c3 = arith.constant 3 : index
    %c0_38 = arith.constant 0 : index
    %c0_39 = arith.constant 0 : index
    %73 = vector.load %arg6[%c3, %c0_38, %c0_39] : memref<27x1x256xf32, #tpu.memory_space<vmem>>, vector<1x1x256xf32>
    %74 = vector.shape_cast %73 : vector<1x1x256xf32> to vector<1x256xf32>
    %75 = vector.broadcast %74 : vector<1x256xf32> to vector<32x256xf32>
    %76 = arith.mulf %72, %75 : vector<32x256xf32>
    %c3_40 = arith.constant 3 : index
    %c0_41 = arith.constant 0 : index
    %c0_42 = arith.constant 0 : index
    %77 = vector.load %arg4[%c3_40, %c0_41, %c0_42] : memref<27x32x32xf32, #tpu.memory_space<vmem>>, vector<1x32x32xf32>
    %78 = vector.shape_cast %77 : vector<1x32x32xf32> to vector<32x32xf32>
    %cst_43 = arith.constant dense<0.000000e+00> : vector<32x256xf32>
    %79 = tpu.matmul %78, %76, %cst_43 {dimension_numbers = #tpu.dot_dimension_numbers<[1], [0], [0], [1], [0, 0, 1, 1], [], []>} : vector<32x32xf32>, vector<32x256xf32>, vector<32x256xf32> -> vector<32x256xf32>
    %80 = arith.addf %71, %79 : vector<32x256xf32>
    %81 = vector.extract_strided_slice %43 {offsets = [0, 64], sizes = [32, 256], strides = [1, 1]} : vector<32x512xf32> to vector<32x256xf32>
    %c4 = arith.constant 4 : index
    %c0_44 = arith.constant 0 : index
    %c0_45 = arith.constant 0 : index
    %82 = vector.load %arg6[%c4, %c0_44, %c0_45] : memref<27x1x256xf32, #tpu.memory_space<vmem>>, vector<1x1x256xf32>
    %83 = vector.shape_cast %82 : vector<1x1x256xf32> to vector<1x256xf32>
    %84 = vector.broadcast %83 : vector<1x256xf32> to vector<32x256xf32>
    %85 = arith.mulf %81, %84 : vector<32x256xf32>
    %c4_46 = arith.constant 4 : index
    %c0_47 = arith.constant 0 : index
    %c0_48 = arith.constant 0 : index
    %86 = vector.load %arg4[%c4_46, %c0_47, %c0_48] : memref<27x32x32xf32, #tpu.memory_space<vmem>>, vector<1x32x32xf32>
    %87 = vector.shape_cast %86 : vector<1x32x32xf32> to vector<32x32xf32>
    %cst_49 = arith.constant dense<0.000000e+00> : vector<32x256xf32>
    %88 = tpu.matmul %87, %85, %cst_49 {dimension_numbers = #tpu.dot_dimension_numbers<[1], [0], [0], [1], [0, 0, 1, 1], [], []>} : vector<32x32xf32>, vector<32x256xf32>, vector<32x256xf32> -> vector<32x256xf32>
    %89 = arith.addf %80, %88 : vector<32x256xf32>
    %90 = vector.extract_strided_slice %43 {offsets = [0, 65], sizes = [32, 256], strides = [1, 1]} : vector<32x512xf32> to vector<32x256xf32>
    %c5 = arith.constant 5 : index
    %c0_50 = arith.constant 0 : index
    %c0_51 = arith.constant 0 : index
    %91 = vector.load %arg6[%c5, %c0_50, %c0_51] : memref<27x1x256xf32, #tpu.memory_space<vmem>>, vector<1x1x256xf32>
    %92 = vector.shape_cast %91 : vector<1x1x256xf32> to vector<1x256xf32>
    %93 = vector.broadcast %92 : vector<1x256xf32> to vector<32x256xf32>
    %94 = arith.mulf %90, %93 : vector<32x256xf32>
    %c5_52 = arith.constant 5 : index
    %c0_53 = arith.constant 0 : index
    %c0_54 = arith.constant 0 : index
    %95 = vector.load %arg4[%c5_52, %c0_53, %c0_54] : memref<27x32x32xf32, #tpu.memory_space<vmem>>, vector<1x32x32xf32>
    %96 = vector.shape_cast %95 : vector<1x32x32xf32> to vector<32x32xf32>
    %cst_55 = arith.constant dense<0.000000e+00> : vector<32x256xf32>
    %97 = tpu.matmul %96, %94, %cst_55 {dimension_numbers = #tpu.dot_dimension_numbers<[1], [0], [0], [1], [0, 0, 1, 1], [], []>} : vector<32x32xf32>, vector<32x256xf32>, vector<32x256xf32> -> vector<32x256xf32>
    %98 = arith.addf %89, %97 : vector<32x256xf32>
    %99 = vector.extract_strided_slice %43 {offsets = [0, 71], sizes = [32, 256], strides = [1, 1]} : vector<32x512xf32> to vector<32x256xf32>
    %c6 = arith.constant 6 : index
    %c0_56 = arith.constant 0 : index
    %c0_57 = arith.constant 0 : index
    %100 = vector.load %arg6[%c6, %c0_56, %c0_57] : memref<27x1x256xf32, #tpu.memory_space<vmem>>, vector<1x1x256xf32>
    %101 = vector.shape_cast %100 : vector<1x1x256xf32> to vector<1x256xf32>
    %102 = vector.broadcast %101 : vector<1x256xf32> to vector<32x256xf32>
    %103 = arith.mulf %99, %102 : vector<32x256xf32>
    %c6_58 = arith.constant 6 : index
    %c0_59 = arith.constant 0 : index
    %c0_60 = arith.constant 0 : index
    %104 = vector.load %arg4[%c6_58, %c0_59, %c0_60] : memref<27x32x32xf32, #tpu.memory_space<vmem>>, vector<1x32x32xf32>
    %105 = vector.shape_cast %104 : vector<1x32x32xf32> to vector<32x32xf32>
    %cst_61 = arith.constant dense<0.000000e+00> : vector<32x256xf32>
    %106 = tpu.matmul %105, %103, %cst_61 {dimension_numbers = #tpu.dot_dimension_numbers<[1], [0], [0], [1], [0, 0, 1, 1], [], []>} : vector<32x32xf32>, vector<32x256xf32>, vector<32x256xf32> -> vector<32x256xf32>
    %107 = arith.addf %98, %106 : vector<32x256xf32>
    %108 = vector.extract_strided_slice %43 {offsets = [0, 72], sizes = [32, 256], strides = [1, 1]} : vector<32x512xf32> to vector<32x256xf32>
    %c7 = arith.constant 7 : index
    %c0_62 = arith.constant 0 : index
    %c0_63 = arith.constant 0 : index
    %109 = vector.load %arg6[%c7, %c0_62, %c0_63] : memref<27x1x256xf32, #tpu.memory_space<vmem>>, vector<1x1x256xf32>
    %110 = vector.shape_cast %109 : vector<1x1x256xf32> to vector<1x256xf32>
    %111 = vector.broadcast %110 : vector<1x256xf32> to vector<32x256xf32>
    %112 = arith.mulf %108, %111 : vector<32x256xf32>
    %c7_64 = arith.constant 7 : index
    %c0_65 = arith.constant 0 : index
    %c0_66 = arith.constant 0 : index
    %113 = vector.load %arg4[%c7_64, %c0_65, %c0_66] : memref<27x32x32xf32, #tpu.memory_space<vmem>>, vector<1x32x32xf32>
    %114 = vector.shape_cast %113 : vector<1x32x32xf32> to vector<32x32xf32>
    %cst_67 = arith.constant dense<0.000000e+00> : vector<32x256xf32>
    %115 = tpu.matmul %114, %112, %cst_67 {dimension_numbers = #tpu.dot_dimension_numbers<[1], [0], [0], [1], [0, 0, 1, 1], [], []>} : vector<32x32xf32>, vector<32x256xf32>, vector<32x256xf32> -> vector<32x256xf32>
    %116 = arith.addf %107, %115 : vector<32x256xf32>
    %117 = vector.extract_strided_slice %43 {offsets = [0, 73], sizes = [32, 256], strides = [1, 1]} : vector<32x512xf32> to vector<32x256xf32>
    %c8 = arith.constant 8 : index
    %c0_68 = arith.constant 0 : index
    %c0_69 = arith.constant 0 : index
    %118 = vector.load %arg6[%c8, %c0_68, %c0_69] : memref<27x1x256xf32, #tpu.memory_space<vmem>>, vector<1x1x256xf32>
    %119 = vector.shape_cast %118 : vector<1x1x256xf32> to vector<1x256xf32>
    %120 = vector.broadcast %119 : vector<1x256xf32> to vector<32x256xf32>
    %121 = arith.mulf %117, %120 : vector<32x256xf32>
    %c8_70 = arith.constant 8 : index
    %c0_71 = arith.constant 0 : index
    %c0_72 = arith.constant 0 : index
    %122 = vector.load %arg4[%c8_70, %c0_71, %c0_72] : memref<27x32x32xf32, #tpu.memory_space<vmem>>, vector<1x32x32xf32>
    %123 = vector.shape_cast %122 : vector<1x32x32xf32> to vector<32x32xf32>
    %cst_73 = arith.constant dense<0.000000e+00> : vector<32x256xf32>
    %124 = tpu.matmul %123, %121, %cst_73 {dimension_numbers = #tpu.dot_dimension_numbers<[1], [0], [0], [1], [0, 0, 1, 1], [], []>} : vector<32x32xf32>, vector<32x256xf32>, vector<32x256xf32> -> vector<32x256xf32>
    %125 = arith.addf %116, %124 : vector<32x256xf32>
    %126 = vector.extract_strided_slice %43 {offsets = [0, 119], sizes = [32, 256], strides = [1, 1]} : vector<32x512xf32> to vector<32x256xf32>
    %c9 = arith.constant 9 : index
    %c0_74 = arith.constant 0 : index
    %c0_75 = arith.constant 0 : index
    %127 = vector.load %arg6[%c9, %c0_74, %c0_75] : memref<27x1x256xf32, #tpu.memory_space<vmem>>, vector<1x1x256xf32>
    %128 = vector.shape_cast %127 : vector<1x1x256xf32> to vector<1x256xf32>
    %129 = vector.broadcast %128 : vector<1x256xf32> to vector<32x256xf32>
    %130 = arith.mulf %126, %129 : vector<32x256xf32>
    %c9_76 = arith.constant 9 : index
    %c0_77 = arith.constant 0 : index
    %c0_78 = arith.constant 0 : index
    %131 = vector.load %arg4[%c9_76, %c0_77, %c0_78] : memref<27x32x32xf32, #tpu.memory_space<vmem>>, vector<1x32x32xf32>
    %132 = vector.shape_cast %131 : vector<1x32x32xf32> to vector<32x32xf32>
    %cst_79 = arith.constant dense<0.000000e+00> : vector<32x256xf32>
    %133 = tpu.matmul %132, %130, %cst_79 {dimension_numbers = #tpu.dot_dimension_numbers<[1], [0], [0], [1], [0, 0, 1, 1], [], []>} : vector<32x32xf32>, vector<32x256xf32>, vector<32x256xf32> -> vector<32x256xf32>
    %134 = arith.addf %125, %133 : vector<32x256xf32>
    %135 = vector.extract_strided_slice %43 {offsets = [0, 120], sizes = [32, 256], strides = [1, 1]} : vector<32x512xf32> to vector<32x256xf32>
    %c10 = arith.constant 10 : index
    %c0_80 = arith.constant 0 : index
    %c0_81 = arith.constant 0 : index
    %136 = vector.load %arg6[%c10, %c0_80, %c0_81] : memref<27x1x256xf32, #tpu.memory_space<vmem>>, vector<1x1x256xf32>
    %137 = vector.shape_cast %136 : vector<1x1x256xf32> to vector<1x256xf32>
    %138 = vector.broadcast %137 : vector<1x256xf32> to vector<32x256xf32>
    %139 = arith.mulf %135, %138 : vector<32x256xf32>
    %c10_82 = arith.constant 10 : index
    %c0_83 = arith.constant 0 : index
    %c0_84 = arith.constant 0 : index
    %140 = vector.load %arg4[%c10_82, %c0_83, %c0_84] : memref<27x32x32xf32, #tpu.memory_space<vmem>>, vector<1x32x32xf32>
    %141 = vector.shape_cast %140 : vector<1x32x32xf32> to vector<32x32xf32>
    %cst_85 = arith.constant dense<0.000000e+00> : vector<32x256xf32>
    %142 = tpu.matmul %141, %139, %cst_85 {dimension_numbers = #tpu.dot_dimension_numbers<[1], [0], [0], [1], [0, 0, 1, 1], [], []>} : vector<32x32xf32>, vector<32x256xf32>, vector<32x256xf32> -> vector<32x256xf32>
    %143 = arith.addf %134, %142 : vector<32x256xf32>
    %144 = vector.extract_strided_slice %43 {offsets = [0, 121], sizes = [32, 256], strides = [1, 1]} : vector<32x512xf32> to vector<32x256xf32>
    %c11 = arith.constant 11 : index
    %c0_86 = arith.constant 0 : index
    %c0_87 = arith.constant 0 : index
    %145 = vector.load %arg6[%c11, %c0_86, %c0_87] : memref<27x1x256xf32, #tpu.memory_space<vmem>>, vector<1x1x256xf32>
    %146 = vector.shape_cast %145 : vector<1x1x256xf32> to vector<1x256xf32>
    %147 = vector.broadcast %146 : vector<1x256xf32> to vector<32x256xf32>
    %148 = arith.mulf %144, %147 : vector<32x256xf32>
    %c11_88 = arith.constant 11 : index
    %c0_89 = arith.constant 0 : index
    %c0_90 = arith.constant 0 : index
    %149 = vector.load %arg4[%c11_88, %c0_89, %c0_90] : memref<27x32x32xf32, #tpu.memory_space<vmem>>, vector<1x32x32xf32>
    %150 = vector.shape_cast %149 : vector<1x32x32xf32> to vector<32x32xf32>
    %cst_91 = arith.constant dense<0.000000e+00> : vector<32x256xf32>
    %151 = tpu.matmul %150, %148, %cst_91 {dimension_numbers = #tpu.dot_dimension_numbers<[1], [0], [0], [1], [0, 0, 1, 1], [], []>} : vector<32x32xf32>, vector<32x256xf32>, vector<32x256xf32> -> vector<32x256xf32>
    %152 = arith.addf %143, %151 : vector<32x256xf32>
    %153 = vector.extract_strided_slice %43 {offsets = [0, 127], sizes = [32, 256], strides = [1, 1]} : vector<32x512xf32> to vector<32x256xf32>
    %c12 = arith.constant 12 : index
    %c0_92 = arith.constant 0 : index
    %c0_93 = arith.constant 0 : index
    %154 = vector.load %arg6[%c12, %c0_92, %c0_93] : memref<27x1x256xf32, #tpu.memory_space<vmem>>, vector<1x1x256xf32>
    %155 = vector.shape_cast %154 : vector<1x1x256xf32> to vector<1x256xf32>
    %156 = vector.broadcast %155 : vector<1x256xf32> to vector<32x256xf32>
    %157 = arith.mulf %153, %156 : vector<32x256xf32>
    %c12_94 = arith.constant 12 : index
    %c0_95 = arith.constant 0 : index
    %c0_96 = arith.constant 0 : index
    %158 = vector.load %arg4[%c12_94, %c0_95, %c0_96] : memref<27x32x32xf32, #tpu.memory_space<vmem>>, vector<1x32x32xf32>
    %159 = vector.shape_cast %158 : vector<1x32x32xf32> to vector<32x32xf32>
    %cst_97 = arith.constant dense<0.000000e+00> : vector<32x256xf32>
    %160 = tpu.matmul %159, %157, %cst_97 {dimension_numbers = #tpu.dot_dimension_numbers<[1], [0], [0], [1], [0, 0, 1, 1], [], []>} : vector<32x32xf32>, vector<32x256xf32>, vector<32x256xf32> -> vector<32x256xf32>
    %161 = arith.addf %152, %160 : vector<32x256xf32>
    %162 = vector.extract_strided_slice %43 {offsets = [0, 128], sizes = [32, 256], strides = [1, 1]} : vector<32x512xf32> to vector<32x256xf32>
    %c13 = arith.constant 13 : index
    %c0_98 = arith.constant 0 : index
    %c0_99 = arith.constant 0 : index
    %163 = vector.load %arg6[%c13, %c0_98, %c0_99] : memref<27x1x256xf32, #tpu.memory_space<vmem>>, vector<1x1x256xf32>
    %164 = vector.shape_cast %163 : vector<1x1x256xf32> to vector<1x256xf32>
    %165 = vector.broadcast %164 : vector<1x256xf32> to vector<32x256xf32>
    %166 = arith.mulf %162, %165 : vector<32x256xf32>
    %c13_100 = arith.constant 13 : index
    %c0_101 = arith.constant 0 : index
    %c0_102 = arith.constant 0 : index
    %167 = vector.load %arg4[%c13_100, %c0_101, %c0_102] : memref<27x32x32xf32, #tpu.memory_space<vmem>>, vector<1x32x32xf32>
    %168 = vector.shape_cast %167 : vector<1x32x32xf32> to vector<32x32xf32>
    %cst_103 = arith.constant dense<0.000000e+00> : vector<32x256xf32>
    %169 = tpu.matmul %168, %166, %cst_103 {dimension_numbers = #tpu.dot_dimension_numbers<[1], [0], [0], [1], [0, 0, 1, 1], [], []>} : vector<32x32xf32>, vector<32x256xf32>, vector<32x256xf32> -> vector<32x256xf32>
    %170 = arith.addf %161, %169 : vector<32x256xf32>
    %171 = vector.extract_strided_slice %43 {offsets = [0, 129], sizes = [32, 256], strides = [1, 1]} : vector<32x512xf32> to vector<32x256xf32>
    %c14 = arith.constant 14 : index
    %c0_104 = arith.constant 0 : index
    %c0_105 = arith.constant 0 : index
    %172 = vector.load %arg6[%c14, %c0_104, %c0_105] : memref<27x1x256xf32, #tpu.memory_space<vmem>>, vector<1x1x256xf32>
    %173 = vector.shape_cast %172 : vector<1x1x256xf32> to vector<1x256xf32>
    %174 = vector.broadcast %173 : vector<1x256xf32> to vector<32x256xf32>
    %175 = arith.mulf %171, %174 : vector<32x256xf32>
    %c14_106 = arith.constant 14 : index
    %c0_107 = arith.constant 0 : index
    %c0_108 = arith.constant 0 : index
    %176 = vector.load %arg4[%c14_106, %c0_107, %c0_108] : memref<27x32x32xf32, #tpu.memory_space<vmem>>, vector<1x32x32xf32>
    %177 = vector.shape_cast %176 : vector<1x32x32xf32> to vector<32x32xf32>
    %cst_109 = arith.constant dense<0.000000e+00> : vector<32x256xf32>
    %178 = tpu.matmul %177, %175, %cst_109 {dimension_numbers = #tpu.dot_dimension_numbers<[1], [0], [0], [1], [0, 0, 1, 1], [], []>} : vector<32x32xf32>, vector<32x256xf32>, vector<32x256xf32> -> vector<32x256xf32>
    %179 = arith.addf %170, %178 : vector<32x256xf32>
    %180 = vector.extract_strided_slice %43 {offsets = [0, 135], sizes = [32, 256], strides = [1, 1]} : vector<32x512xf32> to vector<32x256xf32>
    %c15 = arith.constant 15 : index
    %c0_110 = arith.constant 0 : index
    %c0_111 = arith.constant 0 : index
    %181 = vector.load %arg6[%c15, %c0_110, %c0_111] : memref<27x1x256xf32, #tpu.memory_space<vmem>>, vector<1x1x256xf32>
    %182 = vector.shape_cast %181 : vector<1x1x256xf32> to vector<1x256xf32>
    %183 = vector.broadcast %182 : vector<1x256xf32> to vector<32x256xf32>
    %184 = arith.mulf %180, %183 : vector<32x256xf32>
    %c15_112 = arith.constant 15 : index
    %c0_113 = arith.constant 0 : index
    %c0_114 = arith.constant 0 : index
    %185 = vector.load %arg4[%c15_112, %c0_113, %c0_114] : memref<27x32x32xf32, #tpu.memory_space<vmem>>, vector<1x32x32xf32>
    %186 = vector.shape_cast %185 : vector<1x32x32xf32> to vector<32x32xf32>
    %cst_115 = arith.constant dense<0.000000e+00> : vector<32x256xf32>
    %187 = tpu.matmul %186, %184, %cst_115 {dimension_numbers = #tpu.dot_dimension_numbers<[1], [0], [0], [1], [0, 0, 1, 1], [], []>} : vector<32x32xf32>, vector<32x256xf32>, vector<32x256xf32> -> vector<32x256xf32>
    %188 = arith.addf %179, %187 : vector<32x256xf32>
    %189 = vector.extract_strided_slice %43 {offsets = [0, 136], sizes = [32, 256], strides = [1, 1]} : vector<32x512xf32> to vector<32x256xf32>
    %c16 = arith.constant 16 : index
    %c0_116 = arith.constant 0 : index
    %c0_117 = arith.constant 0 : index
    %190 = vector.load %arg6[%c16, %c0_116, %c0_117] : memref<27x1x256xf32, #tpu.memory_space<vmem>>, vector<1x1x256xf32>
    %191 = vector.shape_cast %190 : vector<1x1x256xf32> to vector<1x256xf32>
    %192 = vector.broadcast %191 : vector<1x256xf32> to vector<32x256xf32>
    %193 = arith.mulf %189, %192 : vector<32x256xf32>
    %c16_118 = arith.constant 16 : index
    %c0_119 = arith.constant 0 : index
    %c0_120 = arith.constant 0 : index
    %194 = vector.load %arg4[%c16_118, %c0_119, %c0_120] : memref<27x32x32xf32, #tpu.memory_space<vmem>>, vector<1x32x32xf32>
    %195 = vector.shape_cast %194 : vector<1x32x32xf32> to vector<32x32xf32>
    %cst_121 = arith.constant dense<0.000000e+00> : vector<32x256xf32>
    %196 = tpu.matmul %195, %193, %cst_121 {dimension_numbers = #tpu.dot_dimension_numbers<[1], [0], [0], [1], [0, 0, 1, 1], [], []>} : vector<32x32xf32>, vector<32x256xf32>, vector<32x256xf32> -> vector<32x256xf32>
    %197 = arith.addf %188, %196 : vector<32x256xf32>
    %198 = vector.extract_strided_slice %43 {offsets = [0, 137], sizes = [32, 256], strides = [1, 1]} : vector<32x512xf32> to vector<32x256xf32>
    %c17 = arith.constant 17 : index
    %c0_122 = arith.constant 0 : index
    %c0_123 = arith.constant 0 : index
    %199 = vector.load %arg6[%c17, %c0_122, %c0_123] : memref<27x1x256xf32, #tpu.memory_space<vmem>>, vector<1x1x256xf32>
    %200 = vector.shape_cast %199 : vector<1x1x256xf32> to vector<1x256xf32>
    %201 = vector.broadcast %200 : vector<1x256xf32> to vector<32x256xf32>
    %202 = arith.mulf %198, %201 : vector<32x256xf32>
    %c17_124 = arith.constant 17 : index
    %c0_125 = arith.constant 0 : index
    %c0_126 = arith.constant 0 : index
    %203 = vector.load %arg4[%c17_124, %c0_125, %c0_126] : memref<27x32x32xf32, #tpu.memory_space<vmem>>, vector<1x32x32xf32>
    %204 = vector.shape_cast %203 : vector<1x32x32xf32> to vector<32x32xf32>
    %cst_127 = arith.constant dense<0.000000e+00> : vector<32x256xf32>
    %205 = tpu.matmul %204, %202, %cst_127 {dimension_numbers = #tpu.dot_dimension_numbers<[1], [0], [0], [1], [0, 0, 1, 1], [], []>} : vector<32x32xf32>, vector<32x256xf32>, vector<32x256xf32> -> vector<32x256xf32>
    %206 = arith.addf %197, %205 : vector<32x256xf32>
    %207 = vector.extract_strided_slice %43 {offsets = [0, 183], sizes = [32, 256], strides = [1, 1]} : vector<32x512xf32> to vector<32x256xf32>
    %c18 = arith.constant 18 : index
    %c0_128 = arith.constant 0 : index
    %c0_129 = arith.constant 0 : index
    %208 = vector.load %arg6[%c18, %c0_128, %c0_129] : memref<27x1x256xf32, #tpu.memory_space<vmem>>, vector<1x1x256xf32>
    %209 = vector.shape_cast %208 : vector<1x1x256xf32> to vector<1x256xf32>
    %210 = vector.broadcast %209 : vector<1x256xf32> to vector<32x256xf32>
    %211 = arith.mulf %207, %210 : vector<32x256xf32>
    %c18_130 = arith.constant 18 : index
    %c0_131 = arith.constant 0 : index
    %c0_132 = arith.constant 0 : index
    %212 = vector.load %arg4[%c18_130, %c0_131, %c0_132] : memref<27x32x32xf32, #tpu.memory_space<vmem>>, vector<1x32x32xf32>
    %213 = vector.shape_cast %212 : vector<1x32x32xf32> to vector<32x32xf32>
    %cst_133 = arith.constant dense<0.000000e+00> : vector<32x256xf32>
    %214 = tpu.matmul %213, %211, %cst_133 {dimension_numbers = #tpu.dot_dimension_numbers<[1], [0], [0], [1], [0, 0, 1, 1], [], []>} : vector<32x32xf32>, vector<32x256xf32>, vector<32x256xf32> -> vector<32x256xf32>
    %215 = arith.addf %206, %214 : vector<32x256xf32>
    %216 = vector.extract_strided_slice %43 {offsets = [0, 184], sizes = [32, 256], strides = [1, 1]} : vector<32x512xf32> to vector<32x256xf32>
    %c19 = arith.constant 19 : index
    %c0_134 = arith.constant 0 : index
    %c0_135 = arith.constant 0 : index
    %217 = vector.load %arg6[%c19, %c0_134, %c0_135] : memref<27x1x256xf32, #tpu.memory_space<vmem>>, vector<1x1x256xf32>
    %218 = vector.shape_cast %217 : vector<1x1x256xf32> to vector<1x256xf32>
    %219 = vector.broadcast %218 : vector<1x256xf32> to vector<32x256xf32>
    %220 = arith.mulf %216, %219 : vector<32x256xf32>
    %c19_136 = arith.constant 19 : index
    %c0_137 = arith.constant 0 : index
    %c0_138 = arith.constant 0 : index
    %221 = vector.load %arg4[%c19_136, %c0_137, %c0_138] : memref<27x32x32xf32, #tpu.memory_space<vmem>>, vector<1x32x32xf32>
    %222 = vector.shape_cast %221 : vector<1x32x32xf32> to vector<32x32xf32>
    %cst_139 = arith.constant dense<0.000000e+00> : vector<32x256xf32>
    %223 = tpu.matmul %222, %220, %cst_139 {dimension_numbers = #tpu.dot_dimension_numbers<[1], [0], [0], [1], [0, 0, 1, 1], [], []>} : vector<32x32xf32>, vector<32x256xf32>, vector<32x256xf32> -> vector<32x256xf32>
    %224 = arith.addf %215, %223 : vector<32x256xf32>
    %225 = vector.extract_strided_slice %43 {offsets = [0, 185], sizes = [32, 256], strides = [1, 1]} : vector<32x512xf32> to vector<32x256xf32>
    %c20 = arith.constant 20 : index
    %c0_140 = arith.constant 0 : index
    %c0_141 = arith.constant 0 : index
    %226 = vector.load %arg6[%c20, %c0_140, %c0_141] : memref<27x1x256xf32, #tpu.memory_space<vmem>>, vector<1x1x256xf32>
    %227 = vector.shape_cast %226 : vector<1x1x256xf32> to vector<1x256xf32>
    %228 = vector.broadcast %227 : vector<1x256xf32> to vector<32x256xf32>
    %229 = arith.mulf %225, %228 : vector<32x256xf32>
    %c20_142 = arith.constant 20 : index
    %c0_143 = arith.constant 0 : index
    %c0_144 = arith.constant 0 : index
    %230 = vector.load %arg4[%c20_142, %c0_143, %c0_144] : memref<27x32x32xf32, #tpu.memory_space<vmem>>, vector<1x32x32xf32>
    %231 = vector.shape_cast %230 : vector<1x32x32xf32> to vector<32x32xf32>
    %cst_145 = arith.constant dense<0.000000e+00> : vector<32x256xf32>
    %232 = tpu.matmul %231, %229, %cst_145 {dimension_numbers = #tpu.dot_dimension_numbers<[1], [0], [0], [1], [0, 0, 1, 1], [], []>} : vector<32x32xf32>, vector<32x256xf32>, vector<32x256xf32> -> vector<32x256xf32>
    %233 = arith.addf %224, %232 : vector<32x256xf32>
    %234 = vector.extract_strided_slice %43 {offsets = [0, 191], sizes = [32, 256], strides = [1, 1]} : vector<32x512xf32> to vector<32x256xf32>
    %c21 = arith.constant 21 : index
    %c0_146 = arith.constant 0 : index
    %c0_147 = arith.constant 0 : index
    %235 = vector.load %arg6[%c21, %c0_146, %c0_147] : memref<27x1x256xf32, #tpu.memory_space<vmem>>, vector<1x1x256xf32>
    %236 = vector.shape_cast %235 : vector<1x1x256xf32> to vector<1x256xf32>
    %237 = vector.broadcast %236 : vector<1x256xf32> to vector<32x256xf32>
    %238 = arith.mulf %234, %237 : vector<32x256xf32>
    %c21_148 = arith.constant 21 : index
    %c0_149 = arith.constant 0 : index
    %c0_150 = arith.constant 0 : index
    %239 = vector.load %arg4[%c21_148, %c0_149, %c0_150] : memref<27x32x32xf32, #tpu.memory_space<vmem>>, vector<1x32x32xf32>
    %240 = vector.shape_cast %239 : vector<1x32x32xf32> to vector<32x32xf32>
    %cst_151 = arith.constant dense<0.000000e+00> : vector<32x256xf32>
    %241 = tpu.matmul %240, %238, %cst_151 {dimension_numbers = #tpu.dot_dimension_numbers<[1], [0], [0], [1], [0, 0, 1, 1], [], []>} : vector<32x32xf32>, vector<32x256xf32>, vector<32x256xf32> -> vector<32x256xf32>
    %242 = arith.addf %233, %241 : vector<32x256xf32>
    %243 = vector.extract_strided_slice %43 {offsets = [0, 192], sizes = [32, 256], strides = [1, 1]} : vector<32x512xf32> to vector<32x256xf32>
    %c22 = arith.constant 22 : index
    %c0_152 = arith.constant 0 : index
    %c0_153 = arith.constant 0 : index
    %244 = vector.load %arg6[%c22, %c0_152, %c0_153] : memref<27x1x256xf32, #tpu.memory_space<vmem>>, vector<1x1x256xf32>
    %245 = vector.shape_cast %244 : vector<1x1x256xf32> to vector<1x256xf32>
    %246 = vector.broadcast %245 : vector<1x256xf32> to vector<32x256xf32>
    %247 = arith.mulf %243, %246 : vector<32x256xf32>
    %c22_154 = arith.constant 22 : index
    %c0_155 = arith.constant 0 : index
    %c0_156 = arith.constant 0 : index
    %248 = vector.load %arg4[%c22_154, %c0_155, %c0_156] : memref<27x32x32xf32, #tpu.memory_space<vmem>>, vector<1x32x32xf32>
    %249 = vector.shape_cast %248 : vector<1x32x32xf32> to vector<32x32xf32>
    %cst_157 = arith.constant dense<0.000000e+00> : vector<32x256xf32>
    %250 = tpu.matmul %249, %247, %cst_157 {dimension_numbers = #tpu.dot_dimension_numbers<[1], [0], [0], [1], [0, 0, 1, 1], [], []>} : vector<32x32xf32>, vector<32x256xf32>, vector<32x256xf32> -> vector<32x256xf32>
    %251 = arith.addf %242, %250 : vector<32x256xf32>
    %252 = vector.extract_strided_slice %43 {offsets = [0, 193], sizes = [32, 256], strides = [1, 1]} : vector<32x512xf32> to vector<32x256xf32>
    %c23 = arith.constant 23 : index
    %c0_158 = arith.constant 0 : index
    %c0_159 = arith.constant 0 : index
    %253 = vector.load %arg6[%c23, %c0_158, %c0_159] : memref<27x1x256xf32, #tpu.memory_space<vmem>>, vector<1x1x256xf32>
    %254 = vector.shape_cast %253 : vector<1x1x256xf32> to vector<1x256xf32>
    %255 = vector.broadcast %254 : vector<1x256xf32> to vector<32x256xf32>
    %256 = arith.mulf %252, %255 : vector<32x256xf32>
    %c23_160 = arith.constant 23 : index
    %c0_161 = arith.constant 0 : index
    %c0_162 = arith.constant 0 : index
    %257 = vector.load %arg4[%c23_160, %c0_161, %c0_162] : memref<27x32x32xf32, #tpu.memory_space<vmem>>, vector<1x32x32xf32>
    %258 = vector.shape_cast %257 : vector<1x32x32xf32> to vector<32x32xf32>
    %cst_163 = arith.constant dense<0.000000e+00> : vector<32x256xf32>
    %259 = tpu.matmul %258, %256, %cst_163 {dimension_numbers = #tpu.dot_dimension_numbers<[1], [0], [0], [1], [0, 0, 1, 1], [], []>} : vector<32x32xf32>, vector<32x256xf32>, vector<32x256xf32> -> vector<32x256xf32>
    %260 = arith.addf %251, %259 : vector<32x256xf32>
    %261 = vector.extract_strided_slice %43 {offsets = [0, 199], sizes = [32, 256], strides = [1, 1]} : vector<32x512xf32> to vector<32x256xf32>
    %c24 = arith.constant 24 : index
    %c0_164 = arith.constant 0 : index
    %c0_165 = arith.constant 0 : index
    %262 = vector.load %arg6[%c24, %c0_164, %c0_165] : memref<27x1x256xf32, #tpu.memory_space<vmem>>, vector<1x1x256xf32>
    %263 = vector.shape_cast %262 : vector<1x1x256xf32> to vector<1x256xf32>
    %264 = vector.broadcast %263 : vector<1x256xf32> to vector<32x256xf32>
    %265 = arith.mulf %261, %264 : vector<32x256xf32>
    %c24_166 = arith.constant 24 : index
    %c0_167 = arith.constant 0 : index
    %c0_168 = arith.constant 0 : index
    %266 = vector.load %arg4[%c24_166, %c0_167, %c0_168] : memref<27x32x32xf32, #tpu.memory_space<vmem>>, vector<1x32x32xf32>
    %267 = vector.shape_cast %266 : vector<1x32x32xf32> to vector<32x32xf32>
    %cst_169 = arith.constant dense<0.000000e+00> : vector<32x256xf32>
    %268 = tpu.matmul %267, %265, %cst_169 {dimension_numbers = #tpu.dot_dimension_numbers<[1], [0], [0], [1], [0, 0, 1, 1], [], []>} : vector<32x32xf32>, vector<32x256xf32>, vector<32x256xf32> -> vector<32x256xf32>
    %269 = arith.addf %260, %268 : vector<32x256xf32>
    %270 = vector.extract_strided_slice %43 {offsets = [0, 200], sizes = [32, 256], strides = [1, 1]} : vector<32x512xf32> to vector<32x256xf32>
    %c25 = arith.constant 25 : index
    %c0_170 = arith.constant 0 : index
    %c0_171 = arith.constant 0 : index
    %271 = vector.load %arg6[%c25, %c0_170, %c0_171] : memref<27x1x256xf32, #tpu.memory_space<vmem>>, vector<1x1x256xf32>
    %272 = vector.shape_cast %271 : vector<1x1x256xf32> to vector<1x256xf32>
    %273 = vector.broadcast %272 : vector<1x256xf32> to vector<32x256xf32>
    %274 = arith.mulf %270, %273 : vector<32x256xf32>
    %c25_172 = arith.constant 25 : index
    %c0_173 = arith.constant 0 : index
    %c0_174 = arith.constant 0 : index
    %275 = vector.load %arg4[%c25_172, %c0_173, %c0_174] : memref<27x32x32xf32, #tpu.memory_space<vmem>>, vector<1x32x32xf32>
    %276 = vector.shape_cast %275 : vector<1x32x32xf32> to vector<32x32xf32>
    %cst_175 = arith.constant dense<0.000000e+00> : vector<32x256xf32>
    %277 = tpu.matmul %276, %274, %cst_175 {dimension_numbers = #tpu.dot_dimension_numbers<[1], [0], [0], [1], [0, 0, 1, 1], [], []>} : vector<32x32xf32>, vector<32x256xf32>, vector<32x256xf32> -> vector<32x256xf32>
    %278 = arith.addf %269, %277 : vector<32x256xf32>
    %279 = vector.extract_strided_slice %43 {offsets = [0, 201], sizes = [32, 256], strides = [1, 1]} : vector<32x512xf32> to vector<32x256xf32>
    %c26 = arith.constant 26 : index
    %c0_176 = arith.constant 0 : index
    %c0_177 = arith.constant 0 : index
    %280 = vector.load %arg6[%c26, %c0_176, %c0_177] : memref<27x1x256xf32, #tpu.memory_space<vmem>>, vector<1x1x256xf32>
    %281 = vector.shape_cast %280 : vector<1x1x256xf32> to vector<1x256xf32>
    %282 = vector.broadcast %281 : vector<1x256xf32> to vector<32x256xf32>
    %283 = arith.mulf %279, %282 : vector<32x256xf32>
    %c26_178 = arith.constant 26 : index
    %c0_179 = arith.constant 0 : index
    %c0_180 = arith.constant 0 : index
    %284 = vector.load %arg4[%c26_178, %c0_179, %c0_180] : memref<27x32x32xf32, #tpu.memory_space<vmem>>, vector<1x32x32xf32>
    %285 = vector.shape_cast %284 : vector<1x32x32xf32> to vector<32x32xf32>
    %cst_181 = arith.constant dense<0.000000e+00> : vector<32x256xf32>
    %286 = tpu.matmul %285, %283, %cst_181 {dimension_numbers = #tpu.dot_dimension_numbers<[1], [0], [0], [1], [0, 0, 1, 1], [], []>} : vector<32x32xf32>, vector<32x256xf32>, vector<32x256xf32> -> vector<32x256xf32>
    %287 = arith.addf %278, %286 : vector<32x256xf32>
    %c0_182 = arith.constant 0 : index
    %c0_183 = arith.constant 0 : index
    %288 = vector.load %arg5[%c0_182, %c0_183] : memref<32x1xf32, #tpu.memory_space<vmem>>, vector<32x1xf32>
    %289 = vector.broadcast %288 : vector<32x1xf32> to vector<32x256xf32>
    %290 = arith.addf %287, %289 : vector<32x256xf32>
    %291 = arith.negf %290 : vector<32x256xf32>
    %292 = math.exp %291 : vector<32x256xf32>
    %cst_184 = arith.constant 1.000000e+00 : f32
    %293 = vector.broadcast %cst_184 : f32 to vector<32x256xf32>
    %294 = arith.addf %293, %292 : vector<32x256xf32>
    %295 = arith.divf %293, %294 : vector<32x256xf32>
    %296 = arith.mulf %41, %295 : vector<32x256xf32>
    %c0_185 = arith.constant 0 : index
    %c0_186 = arith.constant 0 : index
    %c0_187 = arith.constant 0 : index
    %297 = vector.load %arg7[%c0_185, %c0_186, %c0_187] : memref<1x32x256xf32, #tpu.memory_space<vmem>>, vector<1x32x256xf32>
    %298 = vector.shape_cast %297 : vector<1x32x256xf32> to vector<32x256xf32>
    %299 = vector.shape_cast %296 : vector<32x256xf32> to vector<1x32x256xf32>
    tpu.vector_store %arg7[%c0_185, %c0_186, %c0_187], %299 {strides = array<i32>} : memref<1x32x256xf32, #tpu.memory_space<vmem>>, vector<1x32x256xf32>,
    return
  }
  func.func @transform_0(%arg0: i32) -> (i32, i32, i32) {
    %c0_i32 = arith.constant 0 : i32
    %c0_i32_0 = arith.constant 0 : i32
    %c0_i32_1 = arith.constant 0 : i32
    return %arg0, %c0_i32, %c0_i32_0 : i32, i32, i32
  }
  func.func @transform_1(%arg0: i32) -> (i32, i32) {
    %c0_i32 = arith.constant 0 : i32
    %c0_i32_0 = arith.constant 0 : i32
    %c0_i32_1 = arith.constant 0 : i32
    return %c0_i32, %c0_i32_0 : i32, i32
  }
  func.func @transform_2(%arg0: i32) -> (i32, i32) {
    %c0_i32 = arith.constant 0 : i32
    %c0_i32_0 = arith.constant 0 : i32
    %c0_i32_1 = arith.constant 0 : i32
    return %c0_i32, %c0_i32_0 : i32, i32
  }
  func.func @transform_3(%arg0: i32) -> (i32, i32, i32) {
    %c0_i32 = arith.constant 0 : i32
    %c0_i32_0 = arith.constant 0 : i32
    %c0_i32_1 = arith.constant 0 : i32
    %c0_i32_2 = arith.constant 0 : i32
    return %c0_i32, %c0_i32_0, %c0_i32_1 : i32, i32, i32
  }
  func.func @transform_4(%arg0: i32) -> (i32, i32) {
    %c0_i32 = arith.constant 0 : i32
    %c0_i32_0 = arith.constant 0 : i32
    %c0_i32_1 = arith.constant 0 : i32
    return %c0_i32, %c0_i32_0 : i32, i32
  }
  func.func @transform_5(%arg0: i32) -> (i32, i32, i32) {
    %c0_i32 = arith.constant 0 : i32
    %c0_i32_0 = arith.constant 0 : i32
    %c0_i32_1 = arith.constant 0 : i32
    %c0_i32_2 = arith.constant 0 : i32
    return %c0_i32, %c0_i32_0, %c0_i32_1 : i32, i32, i32
  }
  func.func @transform_6(%arg0: i32) -> (i32, i32, i32) {
    %c0_i32 = arith.constant 0 : i32
    %c0_i32_0 = arith.constant 0 : i32
    %c0_i32_1 = arith.constant 0 : i32
    return %arg0, %c0_i32, %c0_i32_0 : i32, i32, i32
  }
}

</mosaic_0001>

<bundles_post_ra>
// kernel: attention_forward.1
= control target key start
LH: loop header
LB: loop body
LE: loop exit
PB: predicated region body
PF: predicated region fallthrough
CT: control target
= control target key end

     0   :  { %s6861_s21 = smov 0   ;;  %s8685_s0 = inlined_call_operand.vmem [shape: f32[2,32,256], index: 0, kind: input, shape index: {}]   ;;  %s8686_s1 = inlined_call_operand.vmem [shape: f32[32,4], index: 1, kind: input, shape index: {}]   ;;  %s8687_s2 = inlined_call_operand.vmem [shape: f32[32,4], index: 2, kind: input, shape index: {}]   ;;  %s8688_s3 = inlined_call_operand.vmem [shape: f32[27,32,32], index: 3, kind: input, shape index: {}]   ;;  %s8689_s4 = inlined_call_operand.vmem [shape: f32[32,1], index: 4, kind: input, shape index: {}]   ;;  %s8690_s5 = inlined_call_operand.vmem [shape: f32[27,1,256], index: 5, kind: input, shape index: {}]   ;;  %s8691_s6 = inlined_call_operand.vmem [shape: f32[2,32,256], index: 6, kind: output, shape index: {}]  }
   0x1 LB: > { %s5506_s22 = sadd.s32 4294967295, %s6805_s21   ;;  %p5510_p0 = scmp.ge.s32.totalorder %s6805_s21, 1  ;;  %s6805_s21 = sphi %s6861_s21, %s16_s21  }
   0x2   : > { %p212_p1 = scmp.lt.s32.totalorder %s6805_s21, 3 }
   0x4   : > { %p213_p2 = pnand %p5510_p0, %p212_p1 }
   0x6   : > { %216 = sbr.rel (%p213_p2) target bundleno = 1029 (0x405), region = 44 }
   0xd   : > { %p242_p3 = scmp.lt.s32.totalorder %s5506_s22, 1  ;;  %v412_v16 = vlaneseq  ;;  %v5519_v19 = vld [vmem:[%s8690_s5 + $0x2] sm:$0x3]  ;;  %s6807_s29 = smov 56   ;;  %v410_v23 = vld [vmem:[%s8690_s5] sm:$0x3] }
   0xe   : > { %v5640_v26 = vld [vmem:[%s8690_s5 + $0x1c] sm:$0x3]  ;;  %s6808_s10 = smov 55   ;;  %v5649_v29 = vld [vmem:[%s8690_s5 + $0x1e] sm:$0x3]  ;;  %s8693_s13 = smov 1  }
   0xf   : > { %s8752_s22 = smov (!%p242_p3, %s5506_s22), 1  ;;  %v413_v17 = vshrl.u32 %v412_v16, 7  ;;  %v5532_v32 = vld [vmem:[%s8690_s5 + $0x4] sm:$0x3]  ;;  %s6810_s16 = smov 7   ;;  %vm301_vm0 = vcmask 31744  }
  0x10   : > { %s8692_s23 = sshll.u32 %s8752_s22, 6  ;;  %v5658_v35 = vld [vmem:[%s8690_s5 + $0x20] sm:$0x3]  ;;  %s6811_s19 = smov 57   ;;  %v5541_v38 = vld [vmem:[%s8690_s5 + $0x6] sm:$0x3] }
  0x11   : > { %s246_s26 = scalar_lea.vmem %s8685_s0, %s8692_s23  ;;  %v6909_v18 = vsub.s32 0, %v413_v17  ;;  %v6915_v21 = vsub.s32 1, %v413_v17  ;;  %s6812_s25 = smov 8   ;;  %v5667_v41 = vld [vmem:[%s8690_s5 + $0x22] sm:$0x3]  ;;  %vm457_vm1 = vcmask 457728  }
  0x12   : > { %v6877_v0 = vld [vmem:[%s246_s26 + $0x20] sm:$0xff]  ;;  %v6879_v1 = vld [vmem:[%s246_s26 + $0x28] sm:$0xff]  ;;  %v6887_v5 = vld [vmem:[%s246_s26 + $0x10] sm:$0xff]  ;;  %s6813_s28 = smov 63   ;;  %s6814_s8 = smov 9   ;;  %vm424_vm2 = vcmask 449536  }
  0x13   : > { %v6881_v2 = vld [vmem:[%s246_s26] sm:$0xff]  ;;  %v266_v3 = vadd.f32 %v6879_v1, %v6877_v0  ;;  %v6885_v4 = vld [vmem:[%s246_s26 + $0x8] sm:$0xff]  ;;  %v6889_v6 = vld [vmem:[%s246_s26 + $0x18] sm:$0xff]  ;;  %v283_v15 = vmax.f32 %v6877_v0, %v6879_v1  ;;  %v448_v20 = vrot.slane %v5519_v19, %v6909_v18  ;;  %v452_v22 = vrot.slane %v5519_v19, %v6915_v21  ;;  %s6815_s12 = smov 64   ;;  %s6816_s20 = smov 65  }
  0x14   : > { %v260_v7 = vadd.f32 %v6885_v4, %v6881_v2  ;;  %v277_v8 = vmax.f32 %v6881_v2, %v6885_v4  ;;  %v263_v9 = vadd.f32 %v6889_v6, %v6887_v5  ;;  %v6897_v10 = vld [vmem:[%s246_s26 + $0x30] sm:$0xff]  ;;  %v6899_v11 = vld [vmem:[%s246_s26 + $0x38] sm:$0xff]  ;;  %v280_v13 = vmax.f32 %v6887_v5, %v6889_v6  ;;  %v5550_v44 = vld [vmem:[%s8690_s5 + $0x8] sm:$0x3]  ;;  %s6817_s7 = smov 71   ;;  %s6818_s17 = smov 72  }
  0x15   : > { %267 = vadd.xlane.f32.xlu1 %v266_v3  ;;  %v269_v12 = vadd.f32 %v6899_v11, %v6897_v10  ;;  %v286_v14 = vmax.f32 %v6897_v10, %v6899_v11  ;;  %v415_v24 = vrot.slane %v410_v23, %v6909_v18  ;;  %v419_v25 = vrot.slane %v410_v23, %v6915_v21  ;;  %v5676_v47 = vld [vmem:[%s8690_s5 + $0x24] sm:$0x3]  ;;  %v5559_v50 = vld [vmem:[%s8690_s5 + $0xa] sm:$0x3]  ;;  %v5685_v53 = vld [vmem:[%s8690_s5 + $0x26] sm:$0x3] }
  0x16   : > { %261 = vadd.xlane.f32.xlu0 %v260_v7  ;;  %v2960_v27 = vrot.slane %v5640_v26, %v6915_v21  ;;  %v2956_v28 = vrot.slane %v5640_v26, %v6909_v18  ;;  %v3141_v30 = vrot.slane %v5649_v29, %v6909_v18  ;;  %v3145_v31 = vrot.slane %v5649_v29, %v6915_v21  ;;  %v5568_v56 = vld [vmem:[%s8690_s5 + $0xc] sm:$0x3]  ;;  %v5694_v59 = vld [vmem:[%s8690_s5 + $0x28] sm:$0x3]  ;;  %v5577_v62 = vld [vmem:[%s8690_s5 + $0xe] sm:$0x3] }
  0x17   : > { %v777_v33 = vrot.slane %v5532_v32, %v6915_v21  ;;  %v773_v34 = vrot.slane %v5532_v32, %v6909_v18  ;;  %v3326_v36 = vrot.slane %v5658_v35, %v6909_v18  ;;  %v3330_v37 = vrot.slane %v5658_v35, %v6915_v21  ;;  %v5703_v7 = vld [vmem:[%s8690_s5 + $0x2a] sm:$0x3]  ;;  %s6819_s30 = smov 73   ;;  %v5595_v19 = vld [vmem:[%s8690_s5 + $0x12] sm:$0x3]  ;;  %s6820_s18 = smov 119  }
  0x18   : > { %v964_v39 = vrot.slane %v5541_v38, %v6915_v21  ;;  %v960_v40 = vrot.slane %v5541_v38, %v6909_v18  ;;  %v3511_v42 = vrot.slane %v5667_v41, %v6909_v18  ;;  %v3515_v43 = vrot.slane %v5667_v41, %v6915_v21  ;;  %v5721_v23 = vld [vmem:[%s8690_s5 + $0x2e] sm:$0x3]  ;;  %v5604_v26 = vld [vmem:[%s8690_s5 + $0x14] sm:$0x3]  ;;  %s6821_s27 = smov 120   ;;  %v289_v32 = vld [vmem:[%s8686_s1] sm:$0xff] }
  0x19   : > { %278 = vmax.xlane.f32.xlu1 %v277_v8  ;;  %v1151_v45 = vrot.slane %v5550_v44, %v6915_v21  ;;  %v1147_v46 = vrot.slane %v5550_v44, %v6909_v18  ;;  %v3696_v48 = vrot.slane %v5676_v47, %v6909_v18  ;;  %v3700_v49 = vrot.slane %v5676_v47, %v6915_v21  ;;  %s6822_s26 = smov 121   ;;  %s6823_s14 = smov 127  }
  0x1a   : > { %264 = vadd.xlane.f32.xlu0 %v263_v9  ;;  %v1333_v51 = vrot.slane %v5559_v50, %v6909_v18  ;;  %v1337_v52 = vrot.slane %v5559_v50, %v6915_v21  ;;  %v3881_v54 = vrot.slane %v5685_v53, %v6909_v18  ;;  %v3885_v55 = vrot.slane %v5685_v53, %v6915_v21 }
  0x1b   : > { %v1522_v57 = vrot.slane %v5568_v56, %v6915_v21  ;;  %v1518_v58 = vrot.slane %v5568_v56, %v6909_v18  ;;  %v4066_v60 = vrot.slane %v5694_v59, %v6909_v18  ;;  %v4070_v61 = vrot.slane %v5694_v59, %v6915_v21 }
  0x1c   : > { %v1707_v63 = vrot.slane %v5577_v62, %v6915_v21  ;;  %v1703_v3 = vrot.slane %v5577_v62, %v6909_v18  ;;  %v4251_v8 = vrot.slane %v5703_v7, %v6909_v18  ;;  %v4255_v9 = vrot.slane %v5703_v7, %v6915_v21 }
  0x1d   : > { %270 = vadd.xlane.f32.xlu1 %v269_v12  ;;  %v5586_v12 = vld [vmem:[%s8690_s5 + $0x10] sm:$0x3]  ;;  %vm8707_vm3 = vcmask 7168   ;;  %vm520_vm4 = vcmask 261120   ;;  %vm8708_vm5 = vcmask 56320   ;;  %vm782_vm6 = vcmask 465920  }
  0x1e   : > { %281 = vmax.xlane.f32.xlu0 %v280_v13  ;;  %v1892_v13 = vrot.slane %v5586_v12, %v6915_v21  ;;  %vm2315_vm7 = vcmask 64512   ;;  %vm969_vm8 = vcmask 515072   ;;  %vm2128_vm9 = vcmask 72704  }
  0x1f   : > { %vm1156_vm10 = vcmask 523264   ;;  %vm1015_vm11 = vcmask 531456   ;;  %vm828_vm12 = vcmask 580608   ;;  %vm503_vm13 = vcmask 588800  }
  0x20   : > { %vm649_vm14 = vcmask 596992   ;;  %vm2643_vm15 = vcmask 1039360  }
  0x21   : > { %287 = vmax.xlane.f32.xlu1 %v286_v14  ;;  %v1888_v14 = vrot.slane %v5586_v12, %v6909_v18 }
  0x22   : > { %284 = vmax.xlane.f32.xlu0 %v283_v15  ;;  %v5712_v15 = vld [vmem:[%s8690_s5 + $0x2c] sm:$0x3] }
  0x23   : > { %v4440_v16 = vrot.slane %v5712_v15, %v6915_v21  ;;  %v4436_v17 = vrot.slane %v5712_v15, %v6909_v18 }
  0x32   : > { %453 = vrot.lane.b32.xlu1 %v448_v20, %s6807_s29  ;;  %v2073_v20 = vrot.slane %v5595_v19, %v6909_v18 }
  0x36   : > { %455 = vrot.lane.b32.xlu1 %v452_v22, %s6807_s29  ;;  %v2077_v22 = vrot.slane %v5595_v19, %v6915_v21 }
  0x38   : > { %420 = vrot.lane.b32.xlu0 %v415_v24, %s6808_s10  ;;  %v4625_v24 = vrot.slane %v5721_v23, %v6915_v21 }
  0x3a   : > { %422 = vrot.lane.b32.xlu1 %v419_v25, %s6808_s10  ;;  %v4621_v25 = vrot.slane %v5721_v23, %v6909_v18 }
  0x3c   : > { %2963 = vrot.lane.b32.xlu0 %v2960_v27, %s8693_s13  ;;  %v2260_v27 = vrot.slane %v5604_v26, %v6909_v18 }
  0x3e   : > { %2961 = vrot.lane.b32.xlu1 %v2956_v28, %s8693_s13  ;;  %v2264_v28 = vrot.slane %v5604_v26, %v6915_v21  ;;  %v294_v26 = vld [vmem:[%s8687_s2 + $0x8] sm:$0xff] }
  0x40   : > { %3146 = vrot.lane.b32.xlu0 %v3141_v30, %s6810_s16 }
  0x42   : > { %3148 = vrot.lane.b32.xlu1 %v3145_v31, %s6810_s16 }
  0x44   : > { %780 = vrot.lane.b32.xlu0 %v777_v33, %s6811_s19 }
  0x46   : > { %778 = vrot.lane.b32.xlu1 %v773_v34, %s6811_s19 }
  0x48   : > { %3331 = vrot.lane.b32.xlu0 %v3326_v36, %s6812_s25  ;;  %v290_v36 = vld [vmem:[%s8686_s1 + $0x8] sm:$0xff] }
  0x4a   : > { %3333 = vrot.lane.b32.xlu1 %v3330_v37, %s6812_s25  ;;  %v291_v37 = vld [vmem:[%s8686_s1 + $0x10] sm:$0xff] }
  0x4c   : > { %967 = vrot.lane.b32.xlu0 %v964_v39, %s6813_s28 }
  0x4e   : > { %965 = vrot.lane.b32.xlu1 %v960_v40, %s6813_s28 }
  0x50   : > { %3516 = vrot.lane.b32.xlu0 %v3511_v42, %s6814_s8 }
  0x52   : > { %3518 = vrot.lane.b32.xlu1 %v3515_v43, %s6814_s8  ;;  %v292_v43 = vld [vmem:[%s8686_s1 + $0x18] sm:$0xff] }
  0x54   : > { %1154 = vrot.lane.b32.xlu0 %v1151_v45, %s6815_s12 }
  0x56   : > { %1152 = vrot.lane.b32.xlu1 %v1147_v46, %s6815_s12 }
  0x58   : > { %3701 = vrot.lane.b32.xlu0 %v3696_v48, %s6808_s10 }
  0x5a   : > { %3703 = vrot.lane.b32.xlu1 %v3700_v49, %s6808_s10 }
  0x5c   : > { %1338 = vrot.lane.b32.xlu0 %v1333_v51, %s6816_s20 }
  0x5e   : > { %1340 = vrot.lane.b32.xlu1 %v1337_v52, %s6816_s20 }
  0x60   : > { %3886 = vrot.lane.b32.xlu0 %v3881_v54, %s6807_s29 }
  0x62   : > { %3888 = vrot.lane.b32.xlu1 %v3885_v55, %s6807_s29 }
  0x64   : > { %1525 = vrot.lane.b32.xlu0 %v1522_v57, %s6817_s7 }
  0x66   : > { %1523 = vrot.lane.b32.xlu1 %v1518_v58, %s6817_s7 }
  0x68   : > { %4071 = vrot.lane.b32.xlu0 %v4066_v60, %s6811_s19 }
  0x6a   : > { %4073 = vrot.lane.b32.xlu1 %v4070_v61, %s6811_s19 }
  0x6c   : > { %1710 = vrot.lane.b32.xlu0 %v1707_v63, %s6818_s17 }
  0x6e   : > { %1708 = vrot.lane.b32.xlu1 %v1703_v3, %s6818_s17 }
  0x70   : > { %4256 = vrot.lane.b32.xlu0 %v4251_v8, %s6813_s28 }
  0x72   : > { %4258 = vrot.lane.b32.xlu1 %v4255_v9, %s6813_s28 }
  0x74   : > { %1895 = vrot.lane.b32.xlu0 %v1892_v13, %s6819_s30 }
  0x76   : > { %1893 = vrot.lane.b32.xlu1 %v1888_v14, %s6819_s30 }
  0x78   : > { %4443 = vrot.lane.b32.xlu0 %v4440_v16, %s6815_s12 }
  0x7a   : > { %4441 = vrot.lane.b32.xlu1 %v4436_v17, %s6815_s12 }
  0x7c   : > { %2078 = vrot.lane.b32.xlu0 %v2073_v20, %s6820_s18 }
  0x7e   : > { %2080 = vrot.lane.b32.xlu1 %v2077_v22, %s6820_s18 }
  0x80   : > { %4628 = vrot.lane.b32.xlu0 %v4625_v24, %s6816_s20 }
  0x82   : > { %4626 = vrot.lane.b32.xlu1 %v4621_v25, %s6816_s20 }
  0x84   : > { %2265 = vrot.lane.b32.xlu0 %v2260_v27, %s6821_s27  ;;  %v293_v27 = vld [vmem:[%s8687_s2] sm:$0xff] }
  0x86   : > { %2267 = vrot.lane.b32.xlu1 %v2264_v28, %s6821_s27 }
  0xa2   : > { %v268_v29 = vpop.xlane.xlu1 %267 }
  0xa3   : > { %v262_v30 = vpop.xlane.xlu0 %261  ;;  %v275_v33 = vmul.f32 0.00390625, %v268_v29 }
  0xa4   : > { %v273_v31 = vmul.f32 0.00390625, %v262_v30  ;;  %v296_v30 = vld [vmem:[%s8687_s2 + $0x18] sm:$0xff] }
  0xa5   : > { %v299_v42 = vmul.f32 %v291_v37, %v275_v33 }
  0xa6   : > { %v279_v34 = vpop.xlane.xlu1 %278  ;;  %v297_v38 = vmul.f32 %v289_v32, %v273_v31  ;;  %v295_v31 = vld [vmem:[%s8687_s2 + $0x10] sm:$0xff] }
  0xa7   : > { %v265_v35 = vpop.xlane.xlu0 %264  ;;  %v336_v47 = vmul.f32 %v289_v32, %v279_v34  ;;  %v305_v53 = vsel %vm301_vm0, %v299_v42, 0.0 }
  0xa8   : > { %v274_v39 = vmul.f32 0.00390625, %v265_v35  ;;  %v302_v46 = vsel %vm301_vm0, %v297_v38, 0.0 }
  0xa9   : > { %v340_v59 = vsel %vm301_vm0, %v336_v47, 0.0 }
  0xaa   : > { %v271_v40 = vpop.xlane.xlu1 %270  ;;  %v298_v41 = vmul.f32 %v290_v36, %v274_v39 }
  0xab   : > { %v276_v44 = vmul.f32 0.00390625, %v271_v40  ;;  %v282_v45 = vpop.xlane.xlu0 %281 }
  0xac   : > { %v303_v48 = vsel %vm301_vm0, %v298_v41, 0.0  ;;  %v337_v49 = vmul.f32 %v290_v36, %v282_v45 }
  0xad   : > { %v304_v50 = vadd.f32 %v303_v48, %v302_v46  ;;  %v300_v51 = vmul.f32 %v292_v43, %v276_v44 }
  0xae   : > { %v341_v52 = vsel %vm301_vm0, %v337_v49, 0.0  ;;  %v288_v54 = vpop.xlane.xlu1 %287  ;;  %v5730_v49 = vld [vmem:[%s8690_s5 + $0x30] sm:$0x3] }
  0xaf   : > { %v306_v55 = vadd.f32 %v305_v53, %v304_v50  ;;  %v285_v56 = vpop.xlane.xlu0 %284  ;;  %v307_v57 = vsel %vm301_vm0, %v300_v51, 0.0  ;;  %v339_v58 = vmul.f32 %v292_v43, %v288_v54  ;;  %v342_v61 = vadd.f32 %v341_v52, %v340_v59  ;;  %v5613_v53 = vld [vmem:[%s8690_s5 + $0x16] sm:$0x3] }
  0xb0   : > { %v338_v60 = vmul.f32 %v291_v37, %v285_v56  ;;  %v4806_v52 = vrot.slane %v5730_v49, %v6909_v18  ;;  %v2451_v56 = vrot.slane %v5613_v53, %v6915_v21 }
  0xb1   : > { %v308_v62 = vadd.f32 %v307_v57, %v306_v55  ;;  %v345_v3 = vsel %vm301_vm0, %v339_v58, 0.0  ;;  %v4810_v57 = vrot.slane %v5730_v49, %v6915_v21  ;;  %v5739_v58 = vld [vmem:[%s8690_s5 + $0x32] sm:$0x3] }
  0xb2   : > { %v343_v63 = vsel %vm301_vm0, %v338_v60, 0.0  ;;  %v7100_v47 = vpop.permute.xlu1 %453  ;;  %v4991_v59 = vrot.slane %v5739_v58, %v6909_v18  ;;  %v2447_v60 = vrot.slane %v5613_v53, %v6909_v18 }
  0xb3   : > { %v344_v7 = vadd.f32 %v343_v63, %v342_v61  ;;  %v309_v8 = vrot.slane %v308_v62, 4  ;;  %v7109_v51 = vpop.permute.xlu0 %420  ;;  %v5622_v61 = vld [vmem:[%s8690_s5 + $0x18] sm:$0x3] }
  0xb5   : > { %v310_v9 = vadd.f32 %v309_v8, %v308_v62  ;;  %v346_v12 = vadd.f32 %v345_v3, %v344_v7  ;;  %v2638_v3 = vrot.slane %v5622_v61, %v6915_v21  ;;  %v4995_v7 = vrot.slane %v5739_v58, %v6915_v21  ;;  %v5748_v8 = vld [vmem:[%s8690_s5 + $0x34] sm:$0x3] }
  0xb6   : > { %v7102_v48 = vpop.permute.xlu1 %455 }
  0xb7   : > { %v311_v13 = vrot.slane %v310_v9, 2  ;;  %v347_v14 = vrot.slane %v346_v12, 4  ;;  %v7117_v55 = vpop.permute.xlu0 %2963 }
  0xb9   : > { %v348_v15 = vadd.f32 %v347_v14, %v346_v12  ;;  %v312_v16 = vadd.f32 %v311_v13, %v310_v9  ;;  %v5176_v13 = vrot.slane %v5748_v8, %v6909_v18  ;;  %v2634_v14 = vrot.slane %v5622_v61, %v6909_v18 }
  0xba   : > { %v7107_v50 = vpop.permute.xlu1 %422 }
  0xbb   : > { %v349_v17 = vrot.slane %v348_v15, 2  ;;  %v313_v20 = vrot.slane %v312_v16, 1  ;;  %v7134_v63 = vpop.permute.xlu0 %3146 }
  0xbd   : > { %v350_v19 = vadd.f32 %v349_v17, %v348_v15  ;;  %v314_v24 = vadd.f32 %v313_v20, %v312_v16  ;;  %v5180_v15 = vrot.slane %v5748_v8, %v6915_v21 }
  0xbe   : > { %v7115_v54 = vpop.permute.xlu1 %2961 }
  0xbf   : > { %v351_v22 = vrot.slane %v350_v19, 1  ;;  %v315_v32 = vmax.f32 %v314_v24, 0.0  ;;  %v7145_v12 = vpop.permute.xlu0 %780 }
  0xc1   : > { %v352_v23 = vadd.f32 %v351_v22, %v350_v19  ;;  %v317_v39 = vmul.f32 %v315_v32, %v294_v26  ;;  %v316_v40 = vmul.f32 %v315_v32, %v293_v27  ;;  %v319_v43 = vmul.f32 %v315_v32, %v296_v30 }
  0xc2   : > { %v318_v44 = vmul.f32 %v315_v32, %v295_v31  ;;  %v7132_v62 = vpop.permute.xlu1 %3148 }
  0xc3   : > { %v353_v25 = vmax.f32 %v352_v23, 0.0  ;;  %v323_v41 = vsel %vm301_vm0, %v317_v39, 0.0  ;;  %v320_v42 = vsel %vm301_vm0, %v316_v40, 0.0  ;;  %v329_v45 = vsel %vm301_vm0, %v319_v43, 0.0  ;;  %v7156_v17 = vpop.permute.xlu0 %3331 }
  0xc4   : > { %v326_v46 = vsel %vm301_vm0, %v318_v44, 0.0 }
  0xc5   : > { %v355_v28 = vmul.f32 %v353_v25, %v294_v26  ;;  %v354_v29 = vmul.f32 %v353_v25, %v293_v27  ;;  %v357_v35 = vmul.f32 %v353_v25, %v296_v30  ;;  %v356_v36 = vmul.f32 %v353_v25, %v295_v31 }
  0xc6   : > { %v7143_v9 = vpop.permute.xlu1 %778 }
  0xc7   : > { %v361_v33 = vsel %vm301_vm0, %v355_v28, 0.0  ;;  %v358_v34 = vsel %vm301_vm0, %v354_v29, 0.0  ;;  %v367_v37 = vsel %vm301_vm0, %v357_v35, 0.0  ;;  %v364_v38 = vsel %vm301_vm0, %v356_v36, 0.0  ;;  %v7161_v20 = vpop.permute.xlu0 %967 }
  0xc8   : > { %362 = vadd.xlane.f32.xlu1 %v361_v33  ;;  %359 = vadd.xlane.f32.xlu0 %v358_v34  ;;  %vm2456_vm0 = vcmask 990208  }
  0xca   : > { %v7154_v16 = vpop.permute.xlu1 %3333 }
  0xcb   : > { %v7165_v23 = vpop.permute.xlu0 %3516 }
  0xcc   : > { %368 = vadd.xlane.f32.xlu1 %v367_v37  ;;  %365 = vadd.xlane.f32.xlu0 %v364_v38 }
  0xce   : > { %v7159_v19 = vpop.permute.xlu1 %965 }
  0xcf   : > { %v7169_v25 = vpop.permute.xlu0 %1154 }
  0xd0   : > { %324 = vadd.xlane.f32.xlu1 %v323_v41  ;;  %321 = vadd.xlane.f32.xlu0 %v320_v42 }
  0xd2   : > { %v7163_v22 = vpop.permute.xlu1 %3518 }
  0xd3   : > { %v7173_v27 = vpop.permute.xlu0 %3701 }
  0xd4   : > { %330 = vadd.xlane.f32.xlu1 %v329_v45  ;;  %327 = vadd.xlane.f32.xlu0 %v326_v46 }
  0xd6   : > { %v7167_v24 = vpop.permute.xlu1 %1152 }
  0xd7   : > { %v7177_v29 = vpop.permute.xlu0 %1338 }
  0xda   : > { %v7171_v26 = vpop.permute.xlu1 %3703 }
  0xdb   : > { %v7181_v31 = vpop.permute.xlu0 %3886 }
  0xde   : > { %v7175_v28 = vpop.permute.xlu1 %1340 }
  0xdf   : > { %v7185_v33 = vpop.permute.xlu0 %1525 }
  0xe2   : > { %v7179_v30 = vpop.permute.xlu1 %3888 }
  0xe3   : > { %v7189_v35 = vpop.permute.xlu0 %4071 }
  0xe5   : > { %4811 = vrot.lane.b32.xlu1 %v4806_v52, %s6817_s7 }
  0xe6   : > { %v7183_v32 = vpop.permute.xlu1 %1523 }
  0xe7   : > { %v7193_v37 = vpop.permute.xlu0 %1710 }
  0xe9   : > { %2454 = vrot.lane.b32.xlu1 %v2451_v56, %s6822_s26 }
  0xea   : > { %4813 = vrot.lane.b32.xlu0 %v4810_v57, %s6817_s7  ;;  %v7187_v34 = vpop.permute.xlu1 %4073 }
  0xeb   : > { %v7197_v39 = vpop.permute.xlu0 %4256 }
  0xec   : > { %8710 = vst [vmem:[#allocation3_spill] sm:$0xff] %v7197_v39 }
  0xed   : > { %4996 = vrot.lane.b32.xlu1 %v4991_v59, %s6818_s17 }
  0xee   : > { %2452 = vrot.lane.b32.xlu0 %v2447_v60, %s6822_s26  ;;  %v7191_v36 = vpop.permute.xlu1 %1708 }
  0xef   : > { %v7201_v41 = vpop.permute.xlu0 %1895 }
  0xf0   : > { %8712 = vst [vmem:[#allocation5_spill] sm:$0xff] %v7201_v41 }
  0xf1   : > { %2641 = vrot.lane.b32.xlu1 %v2638_v3, %s6823_s14 }
  0xf2   : > { %4998 = vrot.lane.b32.xlu0 %v4995_v7, %s6818_s17  ;;  %v7195_v38 = vpop.permute.xlu1 %4258 }
  0xf3   : > { %8709 = vst [vmem:[#allocation2_spill] sm:$0xff] %v7195_v38  ;;  %v7205_v43 = vpop.permute.xlu0 %4443 }
  0xf4   : > { %8714 = vst [vmem:[#allocation7_spill] sm:$0xff] %v7205_v43 }
  0xf5   : > { %5181 = vrot.lane.b32.xlu1 %v5176_v13, %s6819_s30 }
  0xf6   : > { %2639 = vrot.lane.b32.xlu0 %v2634_v14, %s6823_s14  ;;  %v7199_v40 = vpop.permute.xlu1 %1893 }
  0xf7   : > { %8711 = vst [vmem:[#allocation4_spill] sm:$0xff] %v7199_v40  ;;  %v7209_v45 = vpop.permute.xlu0 %2078 }
  0xf8   : > { %8716 = vst [vmem:[#allocation9_spill] sm:$0xff] %v7209_v45 }
  0xfa   : > { %5183 = vrot.lane.b32.xlu0 %v5180_v15, %s6819_s30  ;;  %v7203_v42 = vpop.permute.xlu1 %4441 }
  0xfb   : > { %8713 = vst [vmem:[#allocation6_spill] sm:$0xff] %v7203_v42  ;;  %v7213_v49 = vpop.permute.xlu0 %4628 }
  0xfc   : > { %8718 = vst [vmem:[#allocation11_spill] sm:$0xff] %v7213_v49 }
  0xfe   : > { %v7207_v44 = vpop.permute.xlu1 %2080 }
  0xff   : > { %8715 = vst [vmem:[#allocation8_spill] sm:$0xff] %v7207_v44  ;;  %v7217_v53 = vpop.permute.xlu0 %2265 }
 0x100   : > { %8720 = vst [vmem:[#allocation13_spill] sm:$0xff] %v7217_v53 }
 0x102   : > { %v7211_v46 = vpop.permute.xlu1 %4626 }
 0x103   : > { %8717 = vst [vmem:[#allocation10_spill] sm:$0xff] %v7211_v46 }
 0x106   : > { %v7215_v52 = vpop.permute.xlu1 %2267 }
 0x107   : > { %8719 = vst [vmem:[#allocation12_spill] sm:$0xff] %v7215_v52 }
 0x155   : > { %v363_v56 = vpop.xlane.xlu1 %362  ;;  %v360_v57 = vpop.xlane.xlu0 %359 }
 0x156   : > { %v371_v3 = vmax.f32 %v363_v56, 0.0  ;;  %v370_v7 = vmax.f32 %v360_v57, 0.0 }
 0x159   : > { %v369_v58 = vpop.xlane.xlu1 %368  ;;  %v366_v59 = vpop.xlane.xlu0 %365 }
 0x15a   : > { %v373_v45 = vmax.f32 %v369_v58, 0.0  ;;  %v372_v46 = vmax.f32 %v366_v59, 0.0 }
 0x15d   : > { %v325_v60 = vpop.xlane.xlu1 %324  ;;  %v322_v61 = vpop.xlane.xlu0 %321 }
 0x15e   : > { %v333_v8 = vmax.f32 %v325_v60, 0.0  ;;  %v332_v13 = vmax.f32 %v322_v61, 0.0 }
 0x160   : > { %v375_v14 = vadd.f32 %v371_v3, %v333_v8  ;;  %v374_v15 = vadd.f32 %v370_v7, %v332_v13 }
 0x161   : > { %v331_v44 = vpop.xlane.xlu1 %330  ;;  %v328_v49 = vpop.xlane.xlu0 %327 }
 0x162   : > { %v5516_v42 = vmul.f32 -1.442695, %v375_v14  ;;  %v5515_v52 = vmul.f32 -1.442695, %v374_v15  ;;  %v335_v43 = vmax.f32 %v331_v44, 0.0  ;;  %v334_v53 = vmax.f32 %v328_v49, 0.0 }
 0x164   : > { %6751 = vpow2.f32 %v5516_v42  ;;  %v377_v40 = vadd.f32 %v373_v45, %v335_v43  ;;  %v376_v41 = vadd.f32 %v372_v46, %v334_v53 }
 0x165   : > { %6753 = vpow2.f32 %v5515_v52 }
 0x166   : > { %v5518_v39 = vmul.f32 -1.442695, %v377_v40  ;;  %v5517_v38 = vmul.f32 -1.442695, %v376_v41  ;;  %v5631_v40 = vld [vmem:[%s8690_s5 + $0x1a] sm:$0x3] }
 0x167   : > { %v2825_v44 = vrot.slane %v5631_v40, %v6915_v21  ;;  %v2821_v52 = vrot.slane %v5631_v40, %v6909_v18  ;;  %v462_v21 = vmul.f32 0.0, %v7100_v47 }
 0x168   : > { %6755 = vpow2.f32 %v5518_v39 }
 0x169   : > { %6757 = vpow2.f32 %v5517_v38 }
 0x16e   : > { %v6752_v56 = vpop.eup %6751 }
 0x16f   : > { %v6754_v57 = vpop.eup %6753  ;;  %v391_v60 = vadd.f32 1.0, %v6752_v56 }
 0x170   : > { %v390_v61 = vadd.f32 1.0, %v6754_v57 }
 0x172   : > { %v6756_v58 = vpop.eup %6755  ;;  %6759 = vrcp.f32 %v390_v61 }
 0x173   : > { %v6758_v59 = vpop.eup %6757  ;;  %v393_v3 = vadd.f32 1.0, %v6756_v58  ;;  %6761 = vrcp.f32 %v391_v60 }
 0x174   : > { %v392_v7 = vadd.f32 1.0, %v6758_v59 }
 0x175   : > { %6763 = vrcp.f32 %v393_v3 }
 0x176   : > { %6765 = vrcp.f32 %v392_v7 }
 0x17c   : > { %v6760_v42 = vpop.eup %6759 }
 0x17d   : > { %v6762_v41 = vpop.eup %6761  ;;  %v7223_v43 = vmul.f32 %v6760_v42, %v6885_v4  ;;  %v7233_v49 = vmul.f32 %v6760_v42, %v6881_v2 }
 0x17e   : > { %v7227_v45 = vmul.f32 %v6762_v41, %v6889_v6  ;;  %v7230_v46 = vmul.f32 %v6762_v41, %v6887_v5 }
 0x17f   : > { %v6764_v39 = vpop.eup %6763  ;;  %v2829_v5 = vmul.f32 %v2825_v44, %v7223_v43 }
 0x180   : > { %v6766_v38 = vpop.eup %6765  ;;  %v7237_v53 = vmul.f32 %v6764_v39, %v6899_v11  ;;  %v7244_v6 = vmul.f32 %v6764_v39, %v6897_v10  ;;  %v2831_v2 = vmul.f32 %v2825_v44, %v7227_v45  ;;  %v458_v11 = vsel %vm457_vm1, %v7100_v47, %v7102_v48 }
 0x181   : > { %v7240_v4 = vmul.f32 %v6766_v38, %v6879_v1  ;;  %v7248_v8 = vmul.f32 %v6766_v38, %v6877_v0  ;;  %v464_v1 = vmul.f32 %v7102_v48, %v7223_v43  ;;  %v465_v18 = vmul.f32 %v458_v11, %v7230_v46 }
 0x182   : > { %v463_v13 = vmul.f32 %v458_v11, %v7233_v49  ;;  %v2828_v10 = vmul.f32 %v2821_v52, %v7233_v49  ;;  %v2830_v14 = vmul.f32 %v2821_v52, %v7230_v46  ;;  %v7260_v15 = vpack.c.bf16 %v2831_v2, %v2829_v5 }
 0x183   : > { %v2833_v0 = vmul.f32 %v2825_v44, %v7240_v4  ;;  %v2835_v56 = vmul.f32 %v2825_v44, %v7237_v53  ;;  %v468_v47 = vmul.f32 %v7102_v48, %v7240_v4  ;;  %v6229_v57 = vpack.i.bf16 %v465_v18, %v464_v1 }
 0x184   : > { %v6224_v60 = vpack.i.bf16 %v463_v13, %v462_v21  ;;  %v7266_v61 = vpack.c.bf16 %v2830_v14, %v2828_v10  ;;  %v469_v58 = vmul.f32 %v458_v11, %v7244_v6  ;;  %5874 = vmatprep.subr.bf16.mxu0 %v7260_v15  ;;  %v466_v3 = vmul.f32 %v7102_v48, %v7227_v45 }
 0x185   : > { %v7270_v59 = vpack.c.bf16 %v2835_v56, %v2833_v0  ;;  %v467_v7 = vmul.f32 %v458_v11, %v7248_v8  ;;  %v2832_v42 = vmul.f32 %v2821_v52, %v7248_v8  ;;  %6230 = vrot.lane.b32.xlu1 %v6229_v57, %s6818_s17  ;;  %v2834_v41 = vmul.f32 %v2821_v52, %v7244_v6 }
 0x186   : > { %6225 = vrot.lane.b32.xlu0 %v6224_v60, %s6818_s17  ;;  %v6239_v40 = vpack.i.bf16 %v469_v58, %v468_v47  ;;  %v425_v39 = vsel %vm424_vm2, %v7109_v51, %v7107_v50  ;;  %5876 = vmatpush1.bf16.msra.mxu0 %v7266_v61  ;;  %v429_v5 = vmul.f32 0.0, %v7109_v51  ;;  %v431_v52 = vmul.f32 %v7107_v50, %v7223_v43  ;;  %v5632_v58 = vld [vmem:[%s8688_s3 + $0x1a0] sm:$0xff] }
 0x187   : > { %v6234_v38 = vpack.i.bf16 %v467_v7, %v466_v3  ;;  %5878 = vmatprep.subr.bf16.mxu0 %v7270_v59  ;;  %v7284_v44 = vpack.c.bf16 %v2834_v41, %v2832_v42  ;;  %v430_v21 = vmul.f32 %v425_v39, %v7233_v49  ;;  %v432_v2 = vmul.f32 %v425_v39, %v7230_v46 }
 0x188   : > { %v470_v1 = vmul.f32 %v7102_v48, %v7237_v53  ;;  %v434_v18 = vmul.f32 %v425_v39, %v7248_v8  ;;  %v433_v51 = vmul.f32 %v7107_v50, %v7227_v45  ;;  %v2965_v13 = vsel %vm8707_vm3, %v7115_v54, %v7117_v55 }
 0x189   : > { %6240 = vrot.lane.b32.xlu1 %v6239_v40, %s6818_s17  ;;  %v6244_v11 = vpack.i.bf16 %v430_v21, %v429_v5  ;;  %v6249_v10 = vpack.i.bf16 %v432_v2, %v431_v52  ;;  %v6824_v14 = vmov 0.0   ;;  %v435_v48 = vmul.f32 %v7107_v50, %v7240_v4 }
 0x18a   : > { %6235 = vrot.lane.b32.xlu0 %v6234_v38, %s6818_s17  ;;  %5880 = vmatpush1.bf16.msra.mxu0 %v7284_v44  ;;  %v6254_v0 = vpack.i.bf16 %v434_v18, %v433_v51  ;;  %v436_v56 = vmul.f32 %v425_v39, %v7244_v6  ;;  %v2970_v47 = vmul.f32 %v2965_v13, %v7223_v43  ;;  %v2971_v57 = vmul.f32 0.0, %v7117_v55  ;;  %v5633_v18 = vld [vmem:[%s8688_s3 + $0x1a8] sm:$0xff] }
 0x18b   : > { %597 = vmatprep.mubr.f32.mxu1 %v6824_v14  ;;  %2917 = vmatprep.mubr.f32.mxu0 %v6824_v14  ;;  %v2969_v60 = vmul.f32 %v7115_v54, %v7233_v49  ;;  %v2973_v42 = vmul.f32 %v2965_v13, %v7227_v45  ;;  %v2975_v40 = vmul.f32 %v2965_v13, %v7240_v4  ;;  %vm2082_vm3 = vcmask 973824  }
 0x18c   : > { %v6259_v3 = vpack.i.bf16 %v436_v56, %v435_v48  ;;  %v6264_v7 = vpack.i.bf16 %v2971_v57, %v2970_v47  ;;  %v2972_v55 = vmul.f32 %v7115_v54, %v7230_v46  ;;  %v2974_v38 = vmul.f32 %v7115_v54, %v7248_v8 }
 0x18d   : > { %6245 = vrot.lane.b32.xlu1 %v6244_v11, %s6819_s30  ;;  %5636 = vmatmul.mubr.msk.f32.vlgmr.msra.gmra.mrb[0].mxu0 %vm520_vm4, %v5632_v58  ;;  %v6269_v41 = vpack.i.bf16 %v2969_v60, %v2973_v42  ;;  %v2977_v21 = vmul.f32 %v2965_v13, %v7237_v53  ;;  %v3150_v5 = vsel %vm8708_vm5, %v7134_v63, %v7132_v62  ;;  %v3156_v13 = vmul.f32 0.0, %v7132_v62 }
 0x18e   : > { %501 = vrot.lane.b32.xlu0 %v470_v1, %s6818_s17  ;;  %2923 = vmatprep.mubr.f32.mxu0 %v6824_v14  ;;  %v6274_v39 = vpack.i.bf16 %v2975_v40, %v2972_v55  ;;  %v2976_v2 = vmul.f32 %v7115_v54, %v7244_v6  ;;  %v437_v11 = vmul.f32 %v7107_v50, %v7237_v53  ;;  %vm2269_vm5 = vcmask 982016  }
 0x18f   : > { %v6279_v52 = vpack.i.bf16 %v2974_v38, %v2977_v21  ;;  %v3155_v1 = vmul.f32 %v3150_v5, %v7223_v43  ;;  %v7345_v51 = vsel %vm424_vm2, %v7173_v27, %v7171_v26  ;;  %v3154_v54 = vmul.f32 %v7134_v63, %v7233_v49 }
 0x190   : > { %v3710_v50 = vmul.f32 %v7345_v51, %v7223_v43  ;;  %v3158_v48 = vmul.f32 %v3150_v5, %v7227_v45  ;;  %v3160_v56 = vmul.f32 %v3150_v5, %v7240_v4  ;;  %v3157_v62 = vmul.f32 %v7134_v63, %v7230_v46 }
 0x191   : > { %6255 = vrot.lane.b32.xlu1 %v6254_v0, %s6819_s30  ;;  %5637 = vmatmul.mubr.msk.f32.gmra.mrb[2].mxu0 %vm520_vm4, %v5633_v18  ;;  %v6289_v0 = vpack.i.bf16 %v3156_v13, %v3155_v1  ;;  %v3159_v60 = vmul.f32 %v7134_v63, %v7248_v8  ;;  %v3162_v58 = vmul.f32 %v3150_v5, %v7237_v53 }
 0x192   : > { %6250 = vrot.lane.b32.xlu0 %v6249_v10, %s6819_s30  ;;  %3102 = vmatprep.mubr.f32.mxu0 %v6824_v14  ;;  %v6284_v10 = vpack.i.bf16 %v3710_v50, %v437_v11  ;;  %v6294_v47 = vpack.i.bf16 %v3154_v54, %v3158_v48  ;;  %v6299_v57 = vpack.i.bf16 %v3160_v56, %v3157_v62  ;;  %v3341_v50 = vmul.f32 0.0, %v7154_v16 }
 0x193   : > { %v6304_v40 = vpack.i.bf16 %v3159_v60, %v3162_v58  ;;  %v789_v55 = vmul.f32 %v7145_v12, %v7223_v43  ;;  %v793_v5 = vmul.f32 %v7145_v12, %v7240_v4  ;;  %v3335_v11 = vsel %vm2315_vm7, %v7156_v17, %v7154_v16 }
 0x194   : > { %v3340_v13 = vmul.f32 %v3335_v11, %v7223_v43  ;;  %v3345_v48 = vmul.f32 %v3335_v11, %v7240_v4  ;;  %v3342_v16 = vmul.f32 %v7156_v17, %v7230_v46  ;;  %v3346_v60 = vmul.f32 %v7156_v17, %v7244_v6 }
 0x195   : > { %6265 = vrot.lane.b32.xlu1 %v6264_v7, %s6823_s14  ;;  %v3161_v7 = vmul.f32 %v7134_v63, %v7244_v6 }
 0x196   : > { %6260 = vrot.lane.b32.xlu0 %v6259_v3, %s6819_s30  ;;  %v783_v3 = vsel %vm782_vm6, %v7143_v9, %v7145_v12  ;;  %v6329_v54 = vpack.i.bf16 %v3341_v50, %v3340_v13  ;;  %v6339_v62 = vpack.i.bf16 %v3345_v48, %v3342_v16  ;;  %v3531_v48 = vmul.f32 %v7165_v23, %v7244_v6 }
 0x197   : > { %v788_v42 = vmul.f32 %v783_v3, %v7233_v49  ;;  %v792_v38 = vmul.f32 %v783_v3, %v7248_v8 }
 0x199   : > { %6275 = vrot.lane.b32.xlu1 %v6274_v39, %s6823_s14  ;;  %v791_v39 = vmul.f32 %v7145_v12, %v7227_v45  ;;  %v6309_v21 = vpack.i.bf16 %v789_v55, %v788_v42 }
 0x19a   : > { %6270 = vrot.lane.b32.xlu0 %v6269_v41, %s6823_s14  ;;  %v790_v41 = vmul.f32 %v783_v3, %v7230_v46 }
 0x19c   : > { %v6314_v63 = vpack.i.bf16 %v791_v39, %v790_v41  ;;  %v980_v39 = vmul.f32 %v7161_v20, %v7240_v4 }
 0x19d   : > { %3006 = vrot.lane.b32.xlu1 %v2976_v2, %s6823_s14  ;;  %v787_v2 = vmul.f32 0.0, %v7143_v9  ;;  %v795_v9 = vmul.f32 %v7145_v12, %v7237_v53  ;;  %v3344_v12 = vmul.f32 %v7156_v17, %v7248_v8 }
 0x19e   : > { %6280 = vrot.lane.b32.xlu0 %v6279_v52, %s6823_s14  ;;  %v794_v52 = vmul.f32 %v783_v3, %v7244_v6 }
 0x19f   : > { %v6319_v1 = vpack.i.bf16 %v792_v38, %v787_v2 }
 0x1a0   : > { %v6324_v18 = vpack.i.bf16 %v794_v52, %v793_v5 }
 0x1a1   : > { %6290 = vrot.lane.b32.xlu1 %v6289_v0, %s6822_s26  ;;  %v3343_v0 = vmul.f32 %v3335_v11, %v7227_v45 }
 0x1a2   : > { %6285 = vrot.lane.b32.xlu0 %v6284_v10, %s6819_s30  ;;  %v3339_v10 = vmul.f32 %v7156_v17, %v7233_v49 }
 0x1a4   : > { %v6334_v56 = vpack.i.bf16 %v3339_v10, %v3343_v0  ;;  %v1157_v0 = vsel %vm1156_vm10, %v7167_v24, %v7169_v25 }
 0x1a5   : > { %6300 = vrot.lane.b32.xlu1 %v6299_v57, %s6822_s26  ;;  %v970_v57 = vsel %vm969_vm8, %v7159_v19, %v7161_v20  ;;  %v1162_v16 = vmul.f32 %v1157_v0, %v7233_v49 }
 0x1a6   : > { %6295 = vrot.lane.b32.xlu0 %v6294_v47, %s6822_s26  ;;  %v3347_v47 = vmul.f32 %v3335_v11, %v7237_v53  ;;  %v975_v58 = vmul.f32 %v970_v57, %v7233_v49  ;;  %v977_v42 = vmul.f32 %v970_v57, %v7230_v46  ;;  %v979_v55 = vmul.f32 %v970_v57, %v7248_v8 }
 0x1a7   : > { %v981_v38 = vmul.f32 %v970_v57, %v7244_v6  ;;  %v3526_v11 = vmul.f32 0.0, %v7163_v22  ;;  %v1166_v57 = vmul.f32 %v1157_v0, %v7248_v8 }
 0x1a8   : > { %v6344_v3 = vpack.i.bf16 %v3344_v12, %v3347_v47  ;;  %v1164_v12 = vmul.f32 %v1157_v0, %v7230_v46  ;;  %v1165_v47 = vmul.f32 %v7169_v25, %v7227_v45 }
 0x1a9   : > { %3191 = vrot.lane.b32.xlu1 %v3161_v7, %s6822_s26  ;;  %v976_v7 = vmul.f32 %v7161_v20, %v7223_v43  ;;  %v6364_v52 = vpack.i.bf16 %v981_v38, %v980_v39  ;;  %v7480_v39 = vpop.permute.xlu1 %4811  ;;  %v7482_v38 = vpop.permute.xlu0 %4813 }
 0x1aa   : > { %6305 = vrot.lane.b32.xlu0 %v6304_v40, %s6822_s26  ;;  %v978_v40 = vmul.f32 %v7161_v20, %v7227_v45 }
 0x1ab   : > { %v6349_v41 = vpack.i.bf16 %v976_v7, %v975_v58  ;;  %v6394_v58 = vpack.i.bf16 %v1165_v47, %v1164_v12  ;;  %v1161_v7 = vmul.f32 0.0, %v7167_v24  ;;  %v3712_v24 = vmul.f32 %v7173_v27, %v7230_v46 }
 0x1ac   : > { %v6354_v17 = vpack.i.bf16 %v978_v40, %v977_v42  ;;  %v1354_v12 = vmul.f32 %v7175_v28, %v7237_v53 }
 0x1ad   : > { %6315 = vrot.lane.b32.xlu1 %v6314_v63, %s6817_s7  ;;  %v3520_v63 = vsel %vm2128_vm9, %v7165_v23, %v7163_v22  ;;  %v3527_v22 = vmul.f32 %v7165_v23, %v7230_v46  ;;  %v6399_v42 = vpack.i.bf16 %v1166_v57, %v1161_v7 }
 0x1ae   : > { %6310 = vrot.lane.b32.xlu0 %v6309_v21, %s6817_s7  ;;  %v974_v21 = vmul.f32 0.0, %v7159_v19  ;;  %v3525_v2 = vmul.f32 %v3520_v63, %v7223_v43  ;;  %v982_v19 = vmul.f32 %v7161_v20, %v7237_v53  ;;  %v3528_v13 = vmul.f32 %v3520_v63, %v7227_v45 }
 0x1af   : > { %v3530_v50 = vmul.f32 %v3520_v63, %v7240_v4  ;;  %v3529_v20 = vmul.f32 %v7165_v23, %v7248_v8  ;;  %v3532_v10 = vmul.f32 %v3520_v63, %v7237_v53 }
 0x1b0   : > { %v6359_v5 = vpack.i.bf16 %v979_v55, %v974_v21  ;;  %v3713_v55 = vmul.f32 %v7345_v51, %v7227_v45  ;;  %v1169_v21 = vmul.f32 %v7169_v25, %v7237_v53 }
 0x1b1   : > { %6325 = vrot.lane.b32.xlu1 %v6324_v18, %s6817_s7  ;;  %v3524_v18 = vmul.f32 %v7165_v23, %v7233_v49  ;;  %v1167_v23 = vmul.f32 %v7169_v25, %v7240_v4 }
 0x1b2   : > { %6320 = vrot.lane.b32.xlu0 %v6319_v1, %s6817_s7  ;;  %v6369_v1 = vpack.i.bf16 %v3526_v11, %v3525_v2  ;;  %v3714_v11 = vmul.f32 %v7173_v27, %v7248_v8 }
 0x1b5   : > { %6330 = vrot.lane.b32.xlu1 %v6329_v54, %s6821_s27  ;;  %v6379_v54 = vpack.i.bf16 %v3530_v50, %v3527_v22 }
 0x1b6   : > { %826 = vrot.lane.b32.xlu0 %v795_v9, %s6817_s7  ;;  %v6374_v9 = vpack.i.bf16 %v3524_v18, %v3528_v13  ;;  %v7502_v18 = vpop.permute.xlu1 %2454  ;;  %v7504_v13 = vpop.permute.xlu0 %2452 }
 0x1b9   : > { %6340 = vrot.lane.b32.xlu1 %v6339_v62, %s6821_s27  ;;  %v1163_v62 = vmul.f32 %v7169_v25, %v7223_v43 }
 0x1ba   : > { %6335 = vrot.lane.b32.xlu0 %v6334_v56, %s6821_s27  ;;  %v6384_v56 = vpack.i.bf16 %v3529_v20, %v3532_v10  ;;  %v1346_v20 = vmul.f32 0.0, %v7177_v29  ;;  %v7515_v10 = vpop.permute.xlu1 %4996 }
 0x1bd   : > { %3376 = vrot.lane.b32.xlu1 %v3346_v60, %s6821_s27  ;;  %v6389_v60 = vpack.i.bf16 %v1163_v62, %v1162_v16 }
 0x1be   : > { %6345 = vrot.lane.b32.xlu0 %v6344_v3, %s6821_s27  ;;  %v1168_v3 = vmul.f32 %v1157_v0, %v7244_v6  ;;  %v7517_v0 = vpop.permute.xlu0 %4998  ;;  %s8733_s27 = smov 1  }
 0x1c0   : > { %v6404_v40 = vpack.i.bf16 %v1168_v3, %v1167_v23  ;;  %v3896_v23 = vmul.f32 0.0, %v7179_v30  ;;  %v7534_v3 = vpop.permute.xlu1 %2641 }
 0x1c1   : > { %6355 = vrot.lane.b32.xlu1 %v6354_v17, %s6816_s20  ;;  %v3709_v17 = vmul.f32 %v7173_v27, %v7233_v49 }
 0x1c2   : > { %6350 = vrot.lane.b32.xlu0 %v6349_v41, %s6816_s20  ;;  %v3711_v41 = vmul.f32 0.0, %v7171_v26  ;;  %v3715_v26 = vmul.f32 %v7345_v51, %v7240_v4  ;;  %v7536_v7 = vpop.permute.xlu0 %2639 }
 0x1c3   : > { %v6414_v2 = vpack.i.bf16 %v3712_v24, %v3709_v17  ;;  %v1527_v17 = vsel %vm828_vm12, %v7183_v32, %v7185_v33 }
 0x1c4   : > { %v6409_v63 = vpack.i.bf16 %v3713_v55, %v3711_v41  ;;  %v3899_v55 = vmul.f32 %v7181_v31, %v7248_v8  ;;  %v7551_v24 = vpop.permute.xlu1 %5181 }
 0x1c5   : > { %6365 = vrot.lane.b32.xlu1 %v6364_v52, %s6816_s20  ;;  %v1342_v52 = vsel %vm1015_vm11, %v7177_v29, %v7175_v28  ;;  %v3890_v29 = vsel %vm457_vm1, %v7181_v31, %v7179_v30  ;;  %v3897_v30 = vmul.f32 %v7181_v31, %v7230_v46 }
 0x1c6   : > { %6360 = vrot.lane.b32.xlu0 %v6359_v5, %s6816_s20  ;;  %v3717_v5 = vmul.f32 %v7345_v51, %v7237_v53  ;;  %v1348_v51 = vmul.f32 %v7175_v28, %v7223_v43  ;;  %v1349_v50 = vmul.f32 %v1342_v52, %v7230_v46  ;;  %v1353_v62 = vmul.f32 %v1342_v52, %v7244_v6 }
 0x1c7   : > { %v3895_v57 = vmul.f32 %v3890_v29, %v7223_v43  ;;  %v3902_v41 = vmul.f32 %v3890_v29, %v7237_v53 }
 0x1c8   : > { %v6419_v25 = vpack.i.bf16 %v3717_v5, %v3715_v26  ;;  %v1532_v5 = vmul.f32 %v1527_v17, %v7233_v49 }
 0x1c9   : > { %6370 = vrot.lane.b32.xlu1 %v6369_v1, %s6820_s18  ;;  %v1347_v1 = vmul.f32 %v1342_v52, %v7233_v49  ;;  %v6464_v26 = vpack.i.bf16 %v3899_v55, %v3902_v41 }
 0x1ca   : > { %1013 = vrot.lane.b32.xlu0 %v982_v19, %s6816_s20  ;;  %v3716_v19 = vmul.f32 %v7173_v27, %v7244_v6  ;;  %v1350_v27 = vmul.f32 %v7175_v28, %v7227_v45 }
 0x1cc   : > { %v6424_v22 = vpack.i.bf16 %v3716_v19, %v3714_v11 }
 0x1cd   : > { %6380 = vrot.lane.b32.xlu1 %v6379_v54, %s6820_s18  ;;  %v1351_v54 = vmul.f32 %v1342_v52, %v7248_v8  ;;  %v1533_v52 = vmul.f32 %v7185_v33, %v7223_v43 }
 0x1ce   : > { %6375 = vrot.lane.b32.xlu0 %v6374_v9, %s6820_s18  ;;  %v6429_v9 = vpack.i.bf16 %v1348_v51, %v1347_v1  ;;  %v1534_v1 = vmul.f32 %v1527_v17, %v7230_v46  ;;  %v1535_v51 = vmul.f32 %v7185_v33, %v7227_v45 }
 0x1cf   : > { %v6439_v16 = vpack.i.bf16 %v1351_v54, %v1346_v20  ;;  %v6469_v19 = vpack.i.bf16 %v1533_v52, %v1532_v5 }
 0x1d1   : > { %3561 = vrot.lane.b32.xlu1 %v3531_v48, %s6820_s18  ;;  %v6434_v48 = vpack.i.bf16 %v1350_v27, %v1349_v50  ;;  %v1536_v50 = vmul.f32 %v1527_v17, %v7248_v8 }
 0x1d2   : > { %6385 = vrot.lane.b32.xlu0 %v6384_v56, %s6820_s18  ;;  %v1352_v56 = vmul.f32 %v7175_v28, %v7240_v4  ;;  %v3900_v28 = vmul.f32 %v3890_v29, %v7240_v4 }
 0x1d4   : > { %v6444_v47 = vpack.i.bf16 %v1353_v62, %v1352_v56  ;;  %v6474_v56 = vpack.i.bf16 %v1535_v51, %v1534_v1 }
 0x1d5   : > { %6395 = vrot.lane.b32.xlu1 %v6394_v58, %s6815_s12  ;;  %v3898_v58 = vmul.f32 %v3890_v29, %v7227_v45  ;;  %v1538_v29 = vmul.f32 %v1527_v17, %v7244_v6 }
 0x1d6   : > { %6390 = vrot.lane.b32.xlu0 %v6389_v60, %s6815_s12  ;;  %v3894_v60 = vmul.f32 %v7181_v31, %v7233_v49 }
 0x1d9   : > { %6405 = vrot.lane.b32.xlu1 %v6404_v40, %s6815_s12  ;;  %v6454_v40 = vpack.i.bf16 %v3894_v60, %v3898_v58  ;;  %v4081_v58 = vmul.f32 0.0, %v7187_v34 }
 0x1da   : > { %6400 = vrot.lane.b32.xlu0 %v6399_v42, %s6815_s12  ;;  %v6449_v42 = vpack.i.bf16 %v3896_v23, %v3895_v57  ;;  %v1539_v23 = vmul.f32 %v7185_v33, %v7237_v53 }
 0x1dd   : > { %6410 = vrot.lane.b32.xlu1 %v6409_v63, %s6819_s30  ;;  %v6459_v63 = vpack.i.bf16 %v3900_v28, %v3897_v30 }
 0x1de   : > { %1200 = vrot.lane.b32.xlu0 %v1169_v21, %s6815_s12  ;;  %v7553_v21 = vpop.permute.xlu0 %5183 }
 0x1e1   : > { %6420 = vrot.lane.b32.xlu1 %v6419_v25, %s6819_s30 }
 0x1e2   : > { %6415 = vrot.lane.b32.xlu0 %v6414_v2, %s6819_s30  ;;  %v3901_v2 = vmul.f32 %v7181_v31, %v7244_v6  ;;  %v4075_v31 = vsel %vm782_vm6, %v7189_v35, %v7187_v34 }
 0x1e3   : > { %v4080_v60 = vmul.f32 %v4075_v31, %v7223_v43  ;;  %v4083_v5 = vmul.f32 %v4075_v31, %v7227_v45 }
 0x1e5   : > { %6430 = vrot.lane.b32.xlu1 %v6429_v9, %s6813_s28 }
 0x1e6   : > { %6425 = vrot.lane.b32.xlu0 %v6424_v22, %s6819_s30  ;;  %v1531_v22 = vmul.f32 0.0, %v7183_v32  ;;  %v1537_v32 = vmul.f32 %v7185_v33, %v7240_v4 }
 0x1e8   : > { %v6479_v62 = vpack.i.bf16 %v1536_v50, %v1531_v22 }
 0x1e9   : > { %6440 = vrot.lane.b32.xlu1 %v6439_v16, %s6813_s28 }
 0x1ea   : > { %6435 = vrot.lane.b32.xlu0 %v6434_v48, %s6813_s28 }
 0x1ed   : > { %1385 = vrot.lane.b32.xlu1 %v1354_v12, %s6813_s28 }
 0x1ee   : > { %6445 = vrot.lane.b32.xlu0 %v6444_v47, %s6813_s28 }
 0x1f1   : > { %6455 = vrot.lane.b32.xlu1 %v6454_v40, %s6818_s17 }
 0x1f2   : > { %6450 = vrot.lane.b32.xlu0 %v6449_v42, %s6818_s17 }
 0x1f5   : > { %6465 = vrot.lane.b32.xlu1 %v6464_v26, %s6818_s17  ;;  %v4079_v26 = vmul.f32 %v7189_v35, %v7233_v49 }
 0x1f6   : > { %6460 = vrot.lane.b32.xlu0 %v6459_v63, %s6818_s17  ;;  %v6484_v63 = vpack.i.bf16 %v1538_v29, %v1537_v32 }
 0x1f7   : > { %v6231_v11 = vpop.permute.xlu1 %6230 }
 0x1f8   : > { %v6226_v25 = vpop.permute.xlu0 %6225  ;;  %v6232_v9 = vunpack.i.l.bf16 %v6231_v11  ;;  %v6233_v54 = vunpack.i.h.bf16 %v6231_v11 }
 0x1f9   : > { %v6228_v27 = vunpack.i.h.bf16 %v6226_v25  ;;  %6470 = vrot.lane.b32.xlu1 %v6469_v19, %s6811_s19  ;;  %v6227_v20 = vunpack.i.l.bf16 %v6226_v25  ;;  %v4085_v19 = vmul.f32 %v4075_v31, %v7240_v4 }
 0x1fa   : > { %3931 = vrot.lane.b32.xlu0 %v3901_v2, %s6818_s17  ;;  %v6489_v2 = vpack.i.bf16 %v4081_v58, %v4080_v60 }
 0x1fb   : > { %v6241_v48 = vpop.permute.xlu1 %6240  ;;  %v505_v28 = vsel %vm503_vm13, %v6228_v27, %v6232_v9  ;;  %v504_v55 = vsel %vm503_vm13, %v6227_v20, %v6228_v27  ;;  %v506_v41 = vsel %vm503_vm13, %v6227_v20, %v6233_v54 }
 0x1fc   : > { %v6236_v16 = vpop.permute.xlu0 %6235  ;;  %v6242_v12 = vunpack.i.l.bf16 %v6241_v48  ;;  %v6243_v42 = vunpack.i.h.bf16 %v6241_v48  ;;  %v5771_v25 = vpack.c.bf16 %v506_v41, %v504_v55  ;;  %v4082_v48 = vmul.f32 %v7189_v35, %v7230_v46  ;;  %v5520_v41 = vld [vmem:[%s8688_s3 + $0x20] sm:$0xff] }
 0x1fd   : > { %v6238_v47 = vunpack.i.h.bf16 %v6236_v16  ;;  %v6237_v57 = vunpack.i.l.bf16 %v6236_v16  ;;  %6480 = vrot.lane.b32.xlu1 %v6479_v62, %s6811_s19  ;;  %v4084_v16 = vmul.f32 %v7189_v35, %v7248_v8  ;;  %v1712_v62 = vsel %vm503_vm13, %v7191_v36, %v7193_v37 }
 0x1fe   : > { %6475 = vrot.lane.b32.xlu0 %v6474_v56, %s6811_s19  ;;  %v510_v22 = vsel %vm503_vm13, %v6227_v20, %v6243_v42  ;;  %v4087_v56 = vmul.f32 %v4075_v31, %v7237_v53 }
 0x1ff   : > { %v507_v40 = vsel %vm503_vm13, %v6233_v54, %v6237_v57  ;;  %v6246_v30 = vpop.permute.xlu1 %6245  ;;  %v509_v33 = vsel %vm503_vm13, %v6238_v47, %v6242_v12  ;;  %v508_v50 = vsel %vm503_vm13, %v6227_v20, %v6238_v47  ;;  %v6494_v54 = vpack.i.bf16 %v4079_v26, %v4083_v5 }
 0x200   : > { %v502_v17 = vpop.permute.xlu0 %501  ;;  %v5769_v34 = vpack.c.bf16 %v507_v40, %v505_v28  ;;  %v6248_v1 = vunpack.i.h.bf16 %v6246_v30  ;;  %v7593_v51 = vunpack.i.l.bf16 %v6246_v30  ;;  %v5775_v12 = vpack.c.bf16 %v510_v22, %v508_v50 }
 0x201   : > { %v511_v52 = vsel %vm503_vm13, %v6243_v42, %v502_v17  ;;  %1570 = vrot.lane.b32.xlu1 %v1539_v23, %s6811_s19  ;;  %v6499_v47 = vpack.i.bf16 %v4085_v19, %v4082_v48  ;;  %v1717_v57 = vmul.f32 %v1712_v62, %v7233_v49  ;;  %v6504_v40 = vpack.i.bf16 %v4084_v16, %v4087_v56  ;;  %v5521_v16 = vld [vmem:[%s8688_s3 + $0x28] sm:$0xff] }
 0x202   : > { %v5773_v11 = vpack.c.bf16 %v511_v52, %v509_v33  ;;  %6485 = vrot.lane.b32.xlu0 %v6484_v63, %s6811_s19  ;;  %5770 = vmatprep.subr.bf16.mxu1 %v5769_v34  ;;  %v650_v31 = vsel %vm649_vm14, %v7593_v51, %v6248_v1  ;;  %v1718_v17 = vmul.f32 %v7193_v37, %v7223_v43  ;;  %v1716_v63 = vmul.f32 0.0, %v7191_v36  ;;  %v8721_v34 = vld [vmem:[#allocation2_spill] sm:$0xff]  ;;  %v8722_v52 = vld [vmem:[#allocation3_spill] sm:$0xff] }
 0x203   : > { %5772 = vmatpush1.bf16.msra.mxu1 %v5771_v25  ;;  %v7597_v9 = vpop.permute.xlu1 %6255  ;;  %v7626_v26 = vmul.f32 0.0, %v8721_v34  ;;  %v1719_v5 = vmul.f32 %v1712_v62, %v7230_v46  ;;  %v1720_v33 = vmul.f32 %v7193_v37, %v7227_v45  ;;  %v8724_v25 = vld [vmem:[#allocation4_spill] sm:$0xff]  ;;  %v1721_v48 = vmul.f32 %v1712_v62, %v7248_v8 }
 0x204   : > { %v6251_v27 = vpop.permute.xlu0 %6250  ;;  %v6257_v32 = vunpack.i.l.bf16 %v7597_v9  ;;  %5774 = vmatprep.subr.bf16.mxu1 %v5773_v11  ;;  %v8723_v11 = vld [vmem:[#allocation5_spill] sm:$0xff] }
 0x205   : > { %v6253_v20 = vunpack.i.h.bf16 %v6251_v27  ;;  %v6252_v29 = vunpack.i.l.bf16 %v6251_v27  ;;  %6495 = vrot.lane.b32.xlu1 %v6494_v54, %s6817_s7  ;;  %v7641_v36 = vsel %vm649_vm14, %v8724_v25, %v8723_v11  ;;  %v4086_v27 = vmul.f32 %v7189_v35, %v7244_v6 }
 0x206   : > { %6490 = vrot.lane.b32.xlu0 %v6489_v2, %s6817_s7  ;;  %v7636_v2 = vsel %vm969_vm8, %v8722_v52, %v8721_v34  ;;  %v6509_v54 = vpack.i.bf16 %v1718_v17, %v1717_v57  ;;  %v6514_v35 = vpack.i.bf16 %v1720_v33, %v1719_v5  ;;  %v1724_v57 = vmul.f32 %v7193_v37, %v7237_v53 }
 0x207   : > { %v652_v60 = vsel %vm649_vm14, %v7593_v51, %v6253_v20  ;;  %v651_v58 = vsel %vm649_vm14, %v6248_v1, %v6252_v29  ;;  %v653_v23 = vsel %vm649_vm14, %v6253_v20, %v6257_v32  ;;  %5776 = vmatpush1.bf16.msra.mxu1 %v5775_v12  ;;  %v6266_v28 = vpop.permute.xlu1 %6265  ;;  %v1722_v29 = vmul.f32 %v7193_v37, %v7240_v4  ;;  %v5522_v37 = vld [vmem:[%s8688_s3 + $0x30] sm:$0xff] }
 0x208   : > { %v7617_v42 = vpop.permute.xlu0 %6260  ;;  %v5777_v55 = vpack.c.bf16 %v653_v23, %v651_v58  ;;  %v5779_v30 = vpack.c.bf16 %v652_v60, %v650_v31  ;;  %v6268_v19 = vunpack.i.h.bf16 %v6266_v28  ;;  %v6267_v1 = vunpack.i.l.bf16 %v6266_v28 }
 0x209   : > { %6505 = vrot.lane.b32.xlu1 %v6504_v40, %s6817_s7  ;;  %v4264_v5 = vmul.f32 %v8722_v52, %v7233_v49  ;;  %v4268_v33 = vmul.f32 %v7636_v2, %v7227_v45 }
 0x20a   : > { %6500 = vrot.lane.b32.xlu0 %v6499_v47, %s6817_s7  ;;  %5778 = vmatprep.subr.bf16.mxu1 %v5777_v55  ;;  %v1723_v47 = vmul.f32 %v1712_v62, %v7244_v6  ;;  %v3011_v58 = vsel %vm2643_vm15, %v6267_v1, %v6268_v19  ;;  %v6519_v55 = vpack.i.bf16 %v1721_v48, %v1716_v63  ;;  %v6263_v63 = vunpack.i.h.bf16 %v7617_v42 }
 0x20b   : > { %5524 = vmatmul.mubr.msk.f32.vlgmr.msra.gmra.mrb[0].mxu1 %vm520_vm4, %v5520_v41  ;;  %v6276_v50 = vpop.permute.xlu1 %6275  ;;  %v4265_v62 = vmul.f32 %v7636_v2, %v7223_v43 }
 0x20c   : > { %5780 = vmatpush1.bf16.msra.mxu1 %v5779_v30  ;;  %v6271_v22 = vpop.permute.xlu0 %6270  ;;  %603 = vmatprep.mubr.f32.mxu1 %v6824_v14  ;;  %v6277_v56 = vunpack.i.l.bf16 %v6276_v50  ;;  %v6278_v12 = vunpack.i.h.bf16 %v6276_v50 }
 0x20d   : > { %v6273_v32 = vunpack.i.h.bf16 %v6271_v22  ;;  %v6272_v20 = vunpack.i.l.bf16 %v6271_v22  ;;  %6510 = vrot.lane.b32.xlu1 %v6509_v54, %s6807_s29  ;;  %v7679_v22 = vmul.f32 %v8722_v52, %v7230_v46 }
 0x20e   : > { %4116 = vrot.lane.b32.xlu0 %v4086_v27, %s6817_s7  ;;  %v3015_v50 = vsel %vm2643_vm15, %v6278_v12, %v6268_v19  ;;  %v6262_v27 = vunpack.i.l.bf16 %v7617_v42  ;;  %v5523_v42 = vld [vmem:[%s8688_s3 + $0x38] sm:$0xff] }
 0x20f   : > { %v3010_v31 = vsel %vm2643_vm15, %v6273_v32, %v6267_v1  ;;  %v3012_v60 = vsel %vm2643_vm15, %v6277_v56, %v6272_v20  ;;  %v3013_v23 = vsel %vm2643_vm15, %v6272_v20, %v6268_v19  ;;  %5525 = vmatmul.mubr.msk.f32.gmra.mrb[2].mxu1 %vm520_vm4, %v5521_v16  ;;  %v3007_v28 = vpop.permute.xlu1 %3006  ;;  %v6524_v1 = vpack.i.bf16 %v1723_v47, %v1722_v29 }
 0x210   : > { %v6281_v40 = vpop.permute.xlu0 %6280  ;;  %v5881_v41 = vpack.c.bf16 %v3013_v23, %v3011_v58  ;;  %v5883_v30 = vpack.c.bf16 %v3012_v60, %v3010_v31  ;;  %609 = vmatprep.mubr.f32.mxu1 %v6824_v14  ;;  %v6529_v47 = vpack.i.bf16 %v7626_v26, %v4265_v62  ;;  %v4269_v31 = vmul.f32 %v8722_v52, %v7248_v8 }
 0x211   : > { %v6283_v17 = vunpack.i.h.bf16 %v6281_v40  ;;  %v6282_v34 = vunpack.i.l.bf16 %v6281_v40  ;;  %6520 = vrot.lane.b32.xlu1 %v6519_v55, %s6807_s29  ;;  %v6534_v23 = vpack.i.bf16 %v4264_v5, %v4268_v33  ;;  %v1902_v62 = vmul.f32 %v7641_v36, %v7233_v49 }
 0x212   : > { %6515 = vrot.lane.b32.xlu0 %v6514_v35, %s6807_s29  ;;  %5882 = vmatprep.subr.bf16.mxu0 %v5881_v41  ;;  %v4270_v35 = vmul.f32 %v7636_v2, %v7240_v4 }
 0x213   : > { %v3014_v54 = vsel %vm2643_vm15, %v6283_v17, %v6278_v12  ;;  %v3016_v48 = vsel %vm2643_vm15, %v3007_v28, %v6282_v34  ;;  %v3017_v16 = vsel %vm2643_vm15, %v6282_v34, %v6268_v19  ;;  %5526 = vmatmul.mubr.msk.f32.gmra.mrb[4].mxu1 %vm520_vm4, %v5522_v37  ;;  %5884 = vmatpush1.bf16.msra.mxu0 %v5883_v30  ;;  %v6291_v56 = vpop.permute.xlu1 %6290  ;;  %v6258_v12 = vunpack.i.h.bf16 %v7597_v9 }
 0x214   : > { %v7686_v32 = vpop.permute.xlu0 %6285  ;;  %v5885_v20 = vpack.c.bf16 %v3017_v16, %v3015_v50  ;;  %v5887_v29 = vpack.c.bf16 %v3016_v48, %v3014_v54  ;;  %615 = vmatprep.mubr.f32.mxu1 %v6824_v14  ;;  %v6293_v60 = vunpack.i.h.bf16 %v6291_v56  ;;  %v6292_v58 = vunpack.i.l.bf16 %v6291_v56 }
 0x215   : > { %v6287_v19 = vunpack.i.l.bf16 %v7686_v32  ;;  %1755 = vrot.lane.b32.xlu1 %v1724_v57, %s6807_s29  ;;  %v4272_v28 = vmul.f32 %v7636_v2, %v7237_v53  ;;  %v656_v9 = vsel %vm649_vm14, %v7593_v51, %v6263_v63  ;;  %v655_v40 = vsel %vm649_vm14, %v6258_v12, %v6262_v27  ;;  %v5641_v2 = vld [vmem:[%s8688_s3 + $0x1c0] sm:$0xff] }
 0x216   : > { %6525 = vrot.lane.b32.xlu0 %v6524_v1, %s6807_s29  ;;  %5886 = vmatprep.subr.bf16.mxu0 %v5885_v20  ;;  %v6539_v57 = vpack.i.bf16 %v4270_v35, %v7679_v22  ;;  %v654_v37 = vsel %vm649_vm14, %v7593_v51, %v6258_v12  ;;  %v3196_v1 = vsel %vm2456_vm0, %v6292_v58, %v6293_v60 }
 0x217   : > { %v657_v26 = vsel %vm649_vm14, %v6263_v63, %v6287_v19  ;;  %5527 = vmatmul.mubr.msk.f32.gmra.mrb[6].mxu1 %vm520_vm4, %v5523_v42  ;;  %5888 = vmatpush1.bf16.msra.mxu0 %v5887_v29  ;;  %v6301_v55 = vpop.permute.xlu1 %6300  ;;  %v5783_v63 = vpack.c.bf16 %v656_v9, %v654_v37  ;;  %v1903_v50 = vmul.f32 %v8723_v11, %v7223_v43  ;;  %v5642_v29 = vld [vmem:[%s8688_s3 + $0x1c8] sm:$0xff] }
 0x218   : > { %v6296_v41 = vpop.permute.xlu0 %6295  ;;  %v5781_v30 = vpack.c.bf16 %v657_v26, %v655_v40  ;;  %742 = vmatprep.mubr.f32.mxu1 %v6824_v14  ;;  %v6302_v17 = vunpack.i.l.bf16 %v6301_v55  ;;  %v6303_v33 = vunpack.i.h.bf16 %v6301_v55  ;;  %v6544_v16 = vpack.i.bf16 %v4269_v31, %v4272_v28 }
 0x219   : > { %v6298_v34 = vunpack.i.h.bf16 %v6296_v41  ;;  %v6297_v5 = vunpack.i.l.bf16 %v6296_v41  ;;  %6535 = vrot.lane.b32.xlu1 %v6534_v23, %s6816_s20  ;;  %v4271_v12 = vmul.f32 %v8722_v52, %v7244_v6  ;;  %v1904_v19 = vmul.f32 %v7641_v36, %v7230_v46 }
 0x21a   : > { %6530 = vrot.lane.b32.xlu0 %v6529_v47, %s6816_s20  ;;  %5782 = vmatprep.subr.bf16.mxu1 %v5781_v30  ;;  %v438_v47 = vld [vmem:[%s8688_s3] sm:$0xff]  ;;  %v3200_v31 = vsel %vm2456_vm0, %v6303_v33, %v6293_v60  ;;  %v1906_v23 = vmul.f32 %v7641_v36, %v7248_v8  ;;  %v6549_v55 = vpack.i.bf16 %v1903_v50, %v1902_v62 }
 0x21b   : > { %v3195_v22 = vsel %vm2456_vm0, %v6298_v34, %v6292_v58  ;;  %v3197_v27 = vsel %vm2456_vm0, %v6302_v17, %v6297_v5  ;;  %v3198_v51 = vsel %vm2456_vm0, %v6297_v5, %v6293_v60  ;;  %5645 = vmatmul.mubr.msk.f32.vlgmr.msra.gmra.mrb[0].mxu0 %vm520_vm4, %v5641_v2  ;;  %5784 = vmatpush1.bf16.msra.mxu1 %v5783_v63  ;;  %v3192_v54 = vpop.permute.xlu1 %3191  ;;  %v439_v5 = vld [vmem:[%s8688_s3 + $0x8] sm:$0xff] }
 0x21c   : > { %v6306_v48 = vpop.permute.xlu0 %6305  ;;  %v5889_v56 = vpack.c.bf16 %v3198_v51, %v3196_v1  ;;  %v5891_v20 = vpack.c.bf16 %v3197_v27, %v3195_v22  ;;  %3108 = vmatprep.mubr.f32.mxu0 %v6824_v14  ;;  %v1905_v58 = vmul.f32 %v8723_v11, %v7227_v45  ;;  %v1907_v62 = vmul.f32 %v8723_v11, %v7240_v4 }
 0x21d   : > { %v6308_v35 = vunpack.i.h.bf16 %v6306_v48  ;;  %v6307_v42 = vunpack.i.l.bf16 %v6306_v48  ;;  %6545 = vrot.lane.b32.xlu1 %v6544_v16, %s6816_s20 }
 0x21e   : > { %6540 = vrot.lane.b32.xlu0 %v6539_v57, %s6816_s20  ;;  %5890 = vmatprep.subr.bf16.mxu0 %v5889_v56  ;;  %v5643_v57 = vld [vmem:[%s8688_s3 + $0x1d0] sm:$0xff]  ;;  %v6554_v22 = vpack.i.bf16 %v1905_v58, %v1904_v19  ;;  %v5644_v56 = vld [vmem:[%s8688_s3 + $0x1d8] sm:$0xff] }
 0x21f   : > { %v3199_v52 = vsel %vm2456_vm0, %v6308_v35, %v6303_v33  ;;  %v3201_v28 = vsel %vm2456_vm0, %v3192_v54, %v6307_v42  ;;  %v3202_v9 = vsel %vm2456_vm0, %v6307_v42, %v6293_v60  ;;  %5646 = vmatmul.mubr.msk.f32.gmra.mrb[2].mxu0 %vm520_vm4, %v5642_v29  ;;  %v6316_v40 = vpop.permute.xlu1 %6315  ;;  %5528 = vmatmul.mubr.msk.f32.vlgmr.msra.gmra.mrb[0].mxu1 %vm520_vm4, %v438_v47  ;;  %v1901_v60 = vmul.f32 0.0, %v8724_v25  ;;  %v8727_v35 = vld [vmem:[#allocation8_spill] sm:$0xff]  ;;  %v8728_v42 = vld [vmem:[#allocation9_spill] sm:$0xff] }
 0x220   : > { %5892 = vmatpush1.bf16.msra.mxu0 %v5891_v20  ;;  %v6311_v26 = vpop.permute.xlu0 %6310  ;;  %v5893_v41 = vpack.c.bf16 %v3202_v9, %v3200_v31  ;;  %v5895_v30 = vpack.c.bf16 %v3201_v28, %v3199_v52  ;;  %v6318_v2 = vunpack.i.h.bf16 %v6316_v40  ;;  %v6317_v37 = vunpack.i.l.bf16 %v6316_v40  ;;  %3114 = vmatprep.mubr.f32.mxu0 %v6824_v14  ;;  %v8726_v20 = vld [vmem:[#allocation6_spill] sm:$0xff]  ;;  %v440_v31 = vld [vmem:[%s8688_s3 + $0x10] sm:$0xff] }
 0x221   : > { %v6313_v17 = vunpack.i.h.bf16 %v6311_v26  ;;  %v6312_v34 = vunpack.i.l.bf16 %v6311_v26  ;;  %748 = vmatprep.mubr.f32.mxu1 %v6824_v14  ;;  %6550 = vrot.lane.b32.xlu1 %v6549_v55, %s6808_s10  ;;  %v1908_v25 = vmul.f32 %v7641_v36, %v7244_v6  ;;  %v6559_v27 = vpack.i.bf16 %v1906_v23, %v1901_v60  ;;  %v8725_v36 = vld [vmem:[#allocation7_spill] sm:$0xff] }
 0x222   : > { %4301 = vrot.lane.b32.xlu0 %v4271_v12, %s6816_s20  ;;  %5894 = vmatprep.subr.bf16.mxu0 %v5893_v41  ;;  %v832_v63 = vsel %vm828_vm12, %v6317_v37, %v6318_v2  ;;  %v4445_v29 = vsel %vm1156_vm10, %v8726_v20, %v8725_v36  ;;  %v7778_v12 = vsel %vm2082_vm3, %v8728_v42, %v8727_v35  ;;  %v4451_v41 = vmul.f32 0.0, %v8725_v36  ;;  %v5651_v36 = vld [vmem:[%s8688_s3 + $0x1e8] sm:$0xff] }
 0x223   : > { %v830_v33 = vsel %vm828_vm12, %v6312_v34, %v6313_v17  ;;  %5647 = vmatmul.mubr.msk.f32.gmra.mrb[4].mxu0 %vm520_vm4, %v5643_v57  ;;  %v6326_v1 = vpop.permute.xlu1 %6325  ;;  %5529 = vmatmul.mubr.msk.f32.gmra.mrb[2].mxu1 %vm520_vm4, %v439_v5  ;;  %v1909_v47 = vmul.f32 %v8723_v11, %v7237_v53  ;;  %v6564_v58 = vpack.i.bf16 %v1908_v25, %v1907_v62  ;;  %v441_v62 = vld [vmem:[%s8688_s3 + $0x18] sm:$0xff] }
 0x224   : > { %5896 = vmatpush1.bf16.msra.mxu0 %v5895_v30  ;;  %v6321_v50 = vpop.permute.xlu0 %6320  ;;  %v5785_v51 = vpack.c.bf16 %v832_v63, %v830_v33  ;;  %3120 = vmatprep.mubr.f32.mxu0 %v6824_v14  ;;  %v6327_v54 = vunpack.i.l.bf16 %v6326_v1  ;;  %v6328_v19 = vunpack.i.h.bf16 %v6326_v1  ;;  %v4450_v28 = vmul.f32 %v4445_v29, %v7223_v43 }
 0x225   : > { %v6323_v48 = vunpack.i.h.bf16 %v6321_v50  ;;  %v6322_v16 = vunpack.i.l.bf16 %v6321_v50  ;;  %6560 = vrot.lane.b32.xlu1 %v6559_v27, %s6808_s10  ;;  %v4449_v55 = vmul.f32 %v8726_v20, %v7233_v49  ;;  %v4453_v11 = vmul.f32 %v4445_v29, %v7227_v45  ;;  %754 = vmatprep.mubr.f32.mxu1 %v6824_v14 }
 0x226   : > { %6555 = vrot.lane.b32.xlu0 %v6554_v22, %s6808_s10  ;;  %5786 = vmatprep.subr.bf16.mxu1 %v5785_v51  ;;  %v4455_v2 = vmul.f32 %v4445_v29, %v7240_v4  ;;  %v6569_v63 = vpack.i.bf16 %v4451_v41, %v4450_v28  ;;  %v4452_v25 = vmul.f32 %v8726_v20, %v7230_v46  ;;  %v5533_v41 = vld [vmem:[%s8688_s3 + $0x40] sm:$0xff] }
 0x227   : > { %v829_v23 = vsel %vm828_vm12, %v6322_v16, %v6312_v34  ;;  %v831_v52 = vsel %vm828_vm12, %v6322_v16, %v6317_v37  ;;  %v6331_v9 = vpop.permute.xlu1 %6330  ;;  %5648 = vmatmul.mubr.msk.f32.gmra.mrb[6].mxu0 %vm520_vm4, %v5644_v56  ;;  %v834_v30 = vsel %vm828_vm12, %v6323_v48, %v6327_v54  ;;  %v5650_v37 = vld [vmem:[%s8688_s3 + $0x1e0] sm:$0xff]  ;;  %5530 = vmatmul.mubr.msk.f32.gmra.mrb[4].mxu1 %vm520_vm4, %v440_v31 }
 0x228   : > { %v827_v40 = vpop.permute.xlu0 %826  ;;  %v5787_v26 = vpack.c.bf16 %v831_v52, %v829_v23  ;;  %3287 = vmatprep.mubr.f32.mxu0 %v6824_v14  ;;  %v833_v17 = vsel %vm828_vm12, %v6322_v16, %v6323_v48  ;;  %v835_v60 = vsel %vm828_vm12, %v6322_v16, %v6328_v19  ;;  %v6333_v5 = vunpack.i.h.bf16 %v6331_v9  ;;  %760 = vmatprep.mubr.f32.mxu1 %v6824_v14 }
 0x229   : > { %v836_v57 = vsel %vm828_vm12, %v6328_v19, %v827_v40  ;;  %1940 = vrot.lane.b32.xlu1 %v1909_v47, %s6808_s10  ;;  %v6332_v33 = vunpack.i.l.bf16 %v6331_v9  ;;  %v6574_v22 = vpack.i.bf16 %v4449_v55, %v4453_v11  ;;  %v4454_v27 = vmul.f32 %v8726_v20, %v7248_v8 }
 0x22a   : > { %v5789_v34 = vpack.c.bf16 %v836_v57, %v834_v30  ;;  %6565 = vrot.lane.b32.xlu0 %v6564_v58, %s6808_s10  ;;  %5788 = vmatpush1.bf16.msra.mxu1 %v5787_v26  ;;  %v4457_v51 = vmul.f32 %v4445_v29, %v7237_v53  ;;  %v5791_v56 = vpack.c.bf16 %v835_v60, %v833_v17 }
 0x22b   : > { %v6341_v1 = vpop.permute.xlu1 %6340  ;;  %5654 = vmatmul.mubr.msk.f32.vlgmr.msra.gmra.mrb[0].mxu0 %vm520_vm4, %v5650_v37  ;;  %5531 = vmatmul.mubr.msk.f32.gmra.mrb[6].mxu1 %vm520_vm4, %v441_v62  ;;  %v6579_v29 = vpack.i.bf16 %v4455_v2, %v4452_v25  ;;  %v2088_v47 = vmul.f32 %v7778_v12, %v7233_v49  ;;  %v2089_v31 = vmul.f32 %v8727_v35, %v7223_v43  ;;  %v5652_v62 = vld [vmem:[%s8688_s3 + $0x1f0] sm:$0xff]  ;;  %v2087_v25 = vmul.f32 0.0, %v8728_v42  ;;  %v5534_v42 = vld [vmem:[%s8688_s3 + $0x48] sm:$0xff] }
 0x22c   : > { %v6336_v50 = vpop.permute.xlu0 %6335  ;;  %5790 = vmatprep.subr.bf16.mxu1 %v5789_v34  ;;  %v6342_v54 = vunpack.i.l.bf16 %v6341_v1  ;;  %3293 = vmatprep.mubr.f32.mxu0 %v6824_v14  ;;  %v6343_v19 = vunpack.i.h.bf16 %v6341_v1  ;;  %v3381_v52 = vsel %vm2269_vm5, %v6332_v33, %v6333_v5  ;;  %v6584_v26 = vpack.i.bf16 %v4454_v27, %v4457_v51 }
 0x22d   : > { %v6338_v48 = vunpack.i.h.bf16 %v6336_v50  ;;  %v6337_v16 = vunpack.i.l.bf16 %v6336_v50  ;;  %6575 = vrot.lane.b32.xlu1 %v6574_v22, %s6815_s12  ;;  %921 = vmatprep.mubr.f32.mxu1 %v6824_v14  ;;  %v4456_v2 = vmul.f32 %v8726_v20, %v7244_v6  ;;  %v2092_v37 = vmul.f32 %v7778_v12, %v7248_v8 }
 0x22e   : > { %6570 = vrot.lane.b32.xlu0 %v6569_v63, %s6815_s12  ;;  %5792 = vmatpush1.bf16.msra.mxu1 %v5791_v56  ;;  %v6589_v17 = vpack.i.bf16 %v2089_v31, %v2088_v47  ;;  %v3385_v34 = vsel %vm2269_vm5, %v6343_v19, %v6333_v5  ;;  %v2090_v60 = vmul.f32 %v7778_v12, %v7230_v46 }
 0x22f   : > { %v3380_v58 = vsel %vm2269_vm5, %v6338_v48, %v6332_v33  ;;  %v3382_v23 = vsel %vm2269_vm5, %v6342_v54, %v6337_v16  ;;  %v3383_v28 = vsel %vm2269_vm5, %v6337_v16, %v6333_v5  ;;  %v3377_v9 = vpop.permute.xlu1 %3376  ;;  %5655 = vmatmul.mubr.msk.f32.gmra.mrb[2].mxu0 %vm520_vm4, %v5651_v36  ;;  %v2091_v51 = vmul.f32 %v8727_v35, %v7227_v45  ;;  %v5653_v36 = vld [vmem:[%s8688_s3 + $0x1f8] sm:$0xff] }
 0x230   : > { %v6346_v40 = vpop.permute.xlu0 %6345  ;;  %v5897_v55 = vpack.c.bf16 %v3383_v28, %v3381_v52  ;;  %v5899_v11 = vpack.c.bf16 %v3382_v23, %v3380_v58  ;;  %3299 = vmatprep.mubr.f32.mxu0 %v6824_v14  ;;  %v2093_v47 = vmul.f32 %v8727_v35, %v7240_v4  ;;  %v2094_v28 = vmul.f32 %v7778_v12, %v7244_v6 }
 0x231   : > { %v6348_v30 = vunpack.i.h.bf16 %v6346_v40  ;;  %v6347_v57 = vunpack.i.l.bf16 %v6346_v40  ;;  %6585 = vrot.lane.b32.xlu1 %v6584_v26, %s6815_s12  ;;  %5537 = vmatmul.mubr.msk.f32.vlgmr.msra.gmra.mrb[0].mxu1 %vm520_vm4, %v5533_v41  ;;  %v6594_v23 = vpack.i.bf16 %v2091_v51, %v2090_v60  ;;  %v8730_v41 = vld [vmem:[#allocation10_spill] sm:$0xff]  ;;  %v2095_v12 = vmul.f32 %v8727_v35, %v7237_v53 }
 0x232   : > { %6580 = vrot.lane.b32.xlu0 %v6579_v29, %s6815_s12  ;;  %5898 = vmatprep.subr.bf16.mxu0 %v5897_v55  ;;  %v5535_v55 = vld [vmem:[%s8688_s3 + $0x50] sm:$0xff] }
 0x233   : > { %v3384_v20 = vsel %vm2269_vm5, %v6348_v30, %v6343_v19  ;;  %v3386_v33 = vsel %vm2269_vm5, %v3377_v9, %v6347_v57  ;;  %v3387_v63 = vsel %vm2269_vm5, %v6347_v57, %v6333_v5  ;;  %5900 = vmatpush1.bf16.msra.mxu0 %v5899_v11  ;;  %v6356_v1 = vpop.permute.xlu1 %6355  ;;  %927 = vmatprep.mubr.f32.mxu1 %v6824_v14  ;;  %v8729_v11 = vld [vmem:[#allocation11_spill] sm:$0xff] }
 0x234   : > { %v6351_v50 = vpop.permute.xlu0 %6350  ;;  %v5901_v22 = vpack.c.bf16 %v3387_v63, %v3385_v34  ;;  %v5903_v27 = vpack.c.bf16 %v3386_v33, %v3384_v20  ;;  %v6358_v54 = vunpack.i.h.bf16 %v6356_v1  ;;  %v6357_v48 = vunpack.i.l.bf16 %v6356_v1  ;;  %5656 = vmatmul.mubr.msk.f32.gmra.mrb[4].mxu0 %vm520_vm4, %v5652_v62 }
 0x235   : > { %v6353_v16 = vunpack.i.h.bf16 %v6351_v50  ;;  %v6352_v56 = vunpack.i.l.bf16 %v6351_v50  ;;  %6590 = vrot.lane.b32.xlu1 %v6589_v17, %s6814_s8  ;;  %v6599_v5 = vpack.i.bf16 %v2092_v37, %v2087_v25  ;;  %3305 = vmatprep.mubr.f32.mxu0 %v6824_v14  ;;  %v4630_v30 = vsel %vm1015_vm11, %v8730_v41, %v8729_v11  ;;  %v5659_v37 = vld [vmem:[%s8688_s3 + $0x200] sm:$0xff] }
 0x236   : > { %4486 = vrot.lane.b32.xlu0 %v4456_v2, %s6815_s12  ;;  %5902 = vmatprep.subr.bf16.mxu0 %v5901_v22  ;;  %v1019_v29 = vsel %vm1015_vm11, %v6357_v48, %v6358_v54  ;;  %v4634_v2 = vmul.f32 %v8730_v41, %v7233_v49  ;;  %v4638_v60 = vmul.f32 %v4630_v30, %v7227_v45  ;;  %v4636_v51 = vmul.f32 0.0, %v8729_v11 }
 0x237   : > { %v1017_v19 = vsel %vm1015_vm11, %v6352_v56, %v6353_v16  ;;  %5904 = vmatpush1.bf16.msra.mxu0 %v5903_v27  ;;  %v6366_v31 = vpop.permute.xlu1 %6365  ;;  %5538 = vmatmul.mubr.msk.f32.gmra.mrb[2].mxu1 %vm520_vm4, %v5534_v42  ;;  %v4635_v62 = vmul.f32 %v4630_v30, %v7223_v43  ;;  %v6604_v63 = vpack.i.bf16 %v2094_v28, %v2093_v47  ;;  %v5536_v27 = vld [vmem:[%s8688_s3 + $0x58] sm:$0xff]  ;;  %v8731_v42 = vld [vmem:[#allocation12_spill] sm:$0xff] }
 0x238   : > { %v6361_v58 = vpop.permute.xlu0 %6360  ;;  %v5793_v52 = vpack.c.bf16 %v1019_v29, %v1017_v19  ;;  %v6367_v9 = vunpack.i.l.bf16 %v6366_v31  ;;  %5657 = vmatmul.mubr.msk.f32.gmra.mrb[6].mxu0 %vm520_vm4, %v5653_v36  ;;  %933 = vmatprep.mubr.f32.mxu1 %v6824_v14  ;;  %v6368_v57 = vunpack.i.h.bf16 %v6366_v31  ;;  %v4639_v25 = vmul.f32 %v8730_v41, %v7248_v8 }
 0x239   : > { %v6363_v40 = vunpack.i.h.bf16 %v6361_v58  ;;  %v6362_v26 = vunpack.i.l.bf16 %v6361_v58  ;;  %6600 = vrot.lane.b32.xlu1 %v6599_v5, %s6814_s8  ;;  %3472 = vmatprep.mubr.f32.mxu0 %v6824_v14  ;;  %v4642_v22 = vmul.f32 %v4630_v30, %v7237_v53  ;;  %v8732_v5 = vld [vmem:[#allocation13_spill] sm:$0xff]  ;;  %v6614_v58 = vpack.i.bf16 %v4634_v2, %v4638_v60 }
 0x23a   : > { %6595 = vrot.lane.b32.xlu0 %v6594_v23, %s6814_s8  ;;  %5794 = vmatprep.subr.bf16.mxu1 %v5793_v52  ;;  %v7920_v36 = vsel %vm2269_vm5, %v8732_v5, %v8731_v42  ;;  %v6609_v23 = vpack.i.bf16 %v4636_v51, %v4635_v62  ;;  %v4640_v52 = vmul.f32 %v4630_v30, %v7240_v4 }
 0x23b   : > { %v1016_v17 = vsel %vm1015_vm11, %v6362_v26, %v6352_v56  ;;  %v1018_v34 = vsel %vm1015_vm11, %v6362_v26, %v6357_v48  ;;  %v6371_v20 = vpop.permute.xlu1 %6370  ;;  %5539 = vmatmul.mubr.msk.f32.gmra.mrb[4].mxu1 %vm520_vm4, %v5535_v55  ;;  %v1021_v1 = vsel %vm1015_vm11, %v6363_v40, %v6367_v9  ;;  %v1020_v54 = vsel %vm1015_vm11, %v6362_v26, %v6363_v40  ;;  %v5660_v56 = vld [vmem:[%s8688_s3 + $0x208] sm:$0xff] }
 0x23c   : > { %v1014_v33 = vpop.permute.xlu0 %1013  ;;  %v5795_v35 = vpack.c.bf16 %v1018_v34, %v1016_v17  ;;  %5663 = vmatmul.mubr.msk.f32.vlgmr.msra.gmra.mrb[0].mxu0 %vm520_vm4, %v5659_v37  ;;  %939 = vmatprep.mubr.f32.mxu1 %v6824_v14  ;;  %v1022_v16 = vsel %vm1015_vm11, %v6362_v26, %v6368_v57  ;;  %v6373_v19 = vunpack.i.h.bf16 %v6371_v20  ;;  %v6372_v29 = vunpack.i.l.bf16 %v6371_v20 }
 0x23d   : > { %v1023_v50 = vsel %vm1015_vm11, %v6368_v57, %v1014_v33  ;;  %2126 = vrot.lane.b32.xlu1 %v2095_v12, %s6814_s8  ;;  %3478 = vmatprep.mubr.f32.mxu0 %v6824_v14  ;;  %v5799_v26 = vpack.c.bf16 %v1022_v16, %v1020_v54  ;;  %v6624_v11 = vpack.i.bf16 %v4639_v25, %v4642_v22  ;;  %v5661_v12 = vld [vmem:[%s8688_s3 + $0x210] sm:$0xff]  ;;  %v5542_v25 = vld [vmem:[%s8688_s3 + $0x60] sm:$0xff] }
 0x23e   : > { %v5797_v48 = vpack.c.bf16 %v1023_v50, %v1021_v1  ;;  %6605 = vrot.lane.b32.xlu0 %v6604_v63, %s6814_s8  ;;  %5796 = vmatpush1.bf16.msra.mxu1 %v5795_v35  ;;  %v4637_v57 = vmul.f32 %v8730_v41, %v7230_v46  ;;  %v2275_v30 = vmul.f32 %v7920_v36, %v7233_v49 }
 0x23f   : > { %v6381_v47 = vpop.permute.xlu1 %6380  ;;  %5540 = vmatmul.mubr.msk.f32.gmra.mrb[6].mxu1 %vm520_vm4, %v5536_v27  ;;  %v3566_v17 = vsel %vm2082_vm3, %v6372_v29, %v6373_v19  ;;  %v2276_v35 = vmul.f32 %v8731_v42, %v7223_v43  ;;  %v4641_v22 = vmul.f32 %v8730_v41, %v7244_v6  ;;  %v2279_v27 = vmul.f32 %v7920_v36, %v7248_v8  ;;  %v5662_v41 = vld [vmem:[%s8688_s3 + $0x218] sm:$0xff] }
 0x240   : > { %v6376_v31 = vpop.permute.xlu0 %6375  ;;  %5798 = vmatprep.subr.bf16.mxu1 %v5797_v48  ;;  %v6382_v28 = vunpack.i.l.bf16 %v6381_v47  ;;  %5664 = vmatmul.mubr.msk.f32.gmra.mrb[2].mxu0 %vm520_vm4, %v5660_v56  ;;  %v6383_v55 = vunpack.i.h.bf16 %v6381_v47  ;;  %v6619_v33 = vpack.i.bf16 %v4640_v52, %v4637_v57  ;;  %v2277_v54 = vmul.f32 %v7920_v36, %v7230_v46 }
 0x241   : > { %v6378_v9 = vunpack.i.h.bf16 %v6376_v31  ;;  %v6377_v40 = vunpack.i.l.bf16 %v6376_v31  ;;  %1108 = vmatprep.mubr.f32.mxu1 %v6824_v14  ;;  %6615 = vrot.lane.b32.xlu1 %v6614_v58, %s6813_s28  ;;  %v2278_v48 = vmul.f32 %v8731_v42, %v7227_v45  ;;  %v7978_v57 = vsel %vm2456_vm0, %v7504_v13, %v7502_v18 }
 0x242   : > { %6610 = vrot.lane.b32.xlu0 %v6609_v23, %s6813_s28  ;;  %5800 = vmatpush1.bf16.msra.mxu1 %v5799_v26  ;;  %v3570_v51 = vsel %vm2082_vm3, %v6383_v55, %v6373_v19  ;;  %v6629_v23 = vpack.i.bf16 %v2276_v35, %v2275_v30  ;;  %v2280_v30 = vmul.f32 %v8731_v42, %v7240_v4 }
 0x243   : > { %v3565_v2 = vsel %vm2082_vm3, %v6378_v9, %v6372_v29  ;;  %v3567_v37 = vsel %vm2082_vm3, %v6382_v28, %v6377_v40  ;;  %v3568_v34 = vsel %vm2082_vm3, %v6377_v40, %v6373_v19  ;;  %v3562_v62 = vpop.permute.xlu1 %3561  ;;  %3484 = vmatprep.mubr.f32.mxu0 %v6824_v14  ;;  %v5543_v28 = vld [vmem:[%s8688_s3 + $0x68] sm:$0xff] }
 0x244   : > { %v5907_v60 = vpack.c.bf16 %v3567_v37, %v3565_v2  ;;  %v6386_v20 = vpop.permute.xlu0 %6385  ;;  %v5905_v63 = vpack.c.bf16 %v3568_v34, %v3566_v17  ;;  %5665 = vmatmul.mubr.msk.f32.gmra.mrb[4].mxu0 %vm520_vm4, %v5661_v12  ;;  %v2281_v2 = vmul.f32 %v7920_v36, %v7244_v6  ;;  %v5668_v36 = vld [vmem:[%s8688_s3 + $0x220] sm:$0xff] }
 0x245   : > { %v6388_v1 = vunpack.i.h.bf16 %v6386_v20  ;;  %v6387_v50 = vunpack.i.l.bf16 %v6386_v20  ;;  %6625 = vrot.lane.b32.xlu1 %v6624_v11, %s6813_s28  ;;  %5546 = vmatmul.mubr.msk.f32.vlgmr.msra.gmra.mrb[0].mxu1 %vm520_vm4, %v5542_v25  ;;  %v4815_v11 = vsel %vm828_vm12, %v7480_v39, %v7482_v38  ;;  %v5544_v25 = vld [vmem:[%s8688_s3 + $0x70] sm:$0xff] }
 0x246   : > { %6620 = vrot.lane.b32.xlu0 %v6619_v33, %s6813_s28  ;;  %5906 = vmatprep.subr.bf16.mxu0 %v5905_v63 }
 0x247   : > { %v3569_v16 = vsel %vm2082_vm3, %v6388_v1, %v6383_v55  ;;  %v3571_v56 = vsel %vm2082_vm3, %v3562_v62, %v6387_v50  ;;  %v3572_v29 = vsel %vm2082_vm3, %v6387_v50, %v6373_v19  ;;  %5908 = vmatpush1.bf16.msra.mxu0 %v5907_v60  ;;  %v6396_v31 = vpop.permute.xlu1 %6395  ;;  %3490 = vmatprep.mubr.f32.mxu0 %v6824_v14  ;;  %v2274_v19 = vmul.f32 0.0, %v8732_v5 }
 0x248   : > { %v5911_v47 = vpack.c.bf16 %v3571_v56, %v3569_v16  ;;  %v6391_v58 = vpop.permute.xlu0 %6390  ;;  %v5909_v52 = vpack.c.bf16 %v3572_v29, %v3570_v51  ;;  %v6398_v9 = vunpack.i.h.bf16 %v6396_v31  ;;  %v6397_v40 = vunpack.i.l.bf16 %v6396_v31  ;;  %1114 = vmatprep.mubr.f32.mxu1 %v6824_v14  ;;  %5666 = vmatmul.mubr.msk.f32.gmra.mrb[6].mxu0 %vm520_vm4, %v5662_v41 }
 0x249   : > { %v6393_v26 = vunpack.i.h.bf16 %v6391_v58  ;;  %v6392_v55 = vunpack.i.l.bf16 %v6391_v58  ;;  %6630 = vrot.lane.b32.xlu1 %v6629_v23, %s6812_s25  ;;  %5547 = vmatmul.mubr.msk.f32.gmra.mrb[2].mxu1 %vm520_vm4, %v5543_v28  ;;  %v6639_v34 = vpack.i.bf16 %v2279_v27, %v2274_v19  ;;  %v6634_v60 = vpack.i.bf16 %v2278_v48, %v2277_v54 }
 0x24a   : > { %4671 = vrot.lane.b32.xlu0 %v4641_v22, %s6813_s28  ;;  %5910 = vmatprep.subr.bf16.mxu0 %v5909_v52  ;;  %v1205_v5 = vsel %vm1156_vm10, %v6397_v40, %v6398_v9  ;;  %v4820_v1 = vmul.f32 %v4815_v11, %v7223_v43  ;;  %v4821_v50 = vmul.f32 0.0, %v7482_v38  ;;  %v4823_v22 = vmul.f32 %v4815_v11, %v7227_v45 }
 0x24b   : > { %v1203_v12 = vsel %vm1156_vm10, %v6392_v55, %v6393_v26  ;;  %5912 = vmatpush1.bf16.msra.mxu0 %v5911_v47  ;;  %v6406_v37 = vpop.permute.xlu1 %6405  ;;  %3657 = vmatprep.mubr.f32.mxu0 %v6824_v14  ;;  %v2282_v27 = vmul.f32 %v8731_v42, %v7237_v53  ;;  %v6644_v54 = vpack.i.bf16 %v2281_v2, %v2280_v30  ;;  %v6288_v38 = vunpack.i.h.bf16 %v7686_v32  ;;  %v5545_v32 = vld [vmem:[%s8688_s3 + $0x78] sm:$0xff]  ;;  %v5669_v26 = vld [vmem:[%s8688_s3 + $0x228] sm:$0xff] }
 0x24c   : > { %v6401_v17 = vpop.permute.xlu0 %6400  ;;  %v5801_v62 = vpack.c.bf16 %v1205_v5, %v1203_v12  ;;  %v6408_v20 = vunpack.i.h.bf16 %v6406_v37  ;;  %v6407_v33 = vunpack.i.l.bf16 %v6406_v37  ;;  %1120 = vmatprep.mubr.f32.mxu1 %v6824_v14  ;;  %v4819_v41 = vmul.f32 %v7480_v39, %v7233_v49 }
 0x24d   : > { %v6403_v63 = vunpack.i.h.bf16 %v6401_v17  ;;  %v6402_v35 = vunpack.i.l.bf16 %v6401_v17  ;;  %6640 = vrot.lane.b32.xlu1 %v6639_v34, %s6812_s25  ;;  %5548 = vmatmul.mubr.msk.f32.gmra.mrb[4].mxu1 %vm520_vm4, %v5544_v25  ;;  %v4827_v28 = vmul.f32 %v4815_v11, %v7237_v53  ;;  %v6649_v9 = vpack.i.bf16 %v4821_v50, %v4820_v1 }
 0x24e   : > { %6635 = vrot.lane.b32.xlu0 %v6634_v60, %s6812_s25  ;;  %5802 = vmatprep.subr.bf16.mxu1 %v5801_v62  ;;  %v4824_v12 = vmul.f32 %v7480_v39, %v7248_v8  ;;  %v6654_v17 = vpack.i.bf16 %v4819_v41, %v4823_v22  ;;  %vm8734_vm3 = vcmask 56320  }
 0x24f   : > { %v1206_v51 = vsel %vm1156_vm10, %v6402_v35, %v6403_v63  ;;  %v1202_v48 = vsel %vm1156_vm10, %v6402_v35, %v6392_v55  ;;  %v1208_v16 = vsel %vm1156_vm10, %v6402_v35, %v6408_v20  ;;  %v6411_v56 = vpop.permute.xlu1 %6410  ;;  %v1207_v47 = vsel %vm1156_vm10, %v6403_v63, %v6407_v33  ;;  %5672 = vmatmul.mubr.msk.f32.vlgmr.msra.gmra.mrb[0].mxu0 %vm520_vm4, %v5668_v36  ;;  %v5670_v36 = vld [vmem:[%s8688_s3 + $0x230] sm:$0xff]  ;;  %vm8735_vm5 = vmmov %vm8734_vm3 }
 0x250   : > { %v1201_v29 = vpop.permute.xlu0 %1200  ;;  %v1204_v31 = vsel %vm1156_vm10, %v6402_v35, %v6397_v40  ;;  %v6413_v42 = vunpack.i.h.bf16 %v6411_v56  ;;  %v6412_v58 = vunpack.i.l.bf16 %v6411_v56  ;;  %1126 = vmatprep.mubr.f32.mxu1 %v6824_v14  ;;  %3663 = vmatprep.mubr.f32.mxu0 %v6824_v14  ;;  %v4825_v55 = vmul.f32 %v4815_v11, %v7240_v4 }
 0x251   : > { %v1209_v23 = vsel %vm1156_vm10, %v6408_v20, %v1201_v29  ;;  %v5803_v52 = vpack.c.bf16 %v1204_v31, %v1202_v48  ;;  %2313 = vrot.lane.b32.xlu1 %v2282_v27, %s6812_s25  ;;  %v5807_v5 = vpack.c.bf16 %v1208_v16, %v1206_v51  ;;  %5549 = vmatmul.mubr.msk.f32.gmra.mrb[6].mxu1 %vm520_vm4, %v5545_v32  ;;  %v5551_v16 = vld [vmem:[%s8688_s3 + $0x80] sm:$0xff] }
 0x252   : > { %v5805_v40 = vpack.c.bf16 %v1209_v23, %v1207_v47  ;;  %6645 = vrot.lane.b32.xlu0 %v6644_v54, %s6812_s25  ;;  %v3751_v19 = vsel %vm649_vm14, %v6288_v38, %v6412_v58  ;;  %v3753_v30 = vsel %vm649_vm14, %v6413_v42, %v6412_v58  ;;  %1294 = vmatprep.mubr.f32.mxu1 %v6824_v14  ;;  %v2461_v47 = vmul.f32 0.0, %v7504_v13  ;;  %v5671_v23 = vld [vmem:[%s8688_s3 + $0x238] sm:$0xff] }
 0x253   : > { %5804 = vmatpush1.bf16.msra.mxu1 %v5803_v52  ;;  %v6421_v2 = vpop.permute.xlu1 %6420  ;;  %v5913_v34 = vpack.c.bf16 %v3753_v30, %v3751_v19  ;;  %5673 = vmatmul.mubr.msk.f32.gmra.mrb[2].mxu0 %vm520_vm4, %v5669_v26  ;;  %v2462_v33 = vmul.f32 %v7978_v57, %v7233_v49  ;;  %v4822_v63 = vmul.f32 %v7480_v39, %v7230_v46 }
 0x254   : > { %v6416_v37 = vpop.permute.xlu0 %6415  ;;  %5806 = vmatprep.subr.bf16.mxu1 %v5805_v40  ;;  %v6423_v60 = vunpack.i.h.bf16 %v6421_v2  ;;  %v6422_v62 = vunpack.i.l.bf16 %v6421_v2  ;;  %v2463_v35 = vmul.f32 %v7502_v18, %v7223_v43  ;;  %v6664_v54 = vpack.i.bf16 %v4824_v12, %v4827_v28  ;;  %3669 = vmatprep.mubr.f32.mxu0 %v6824_v14 }
 0x255   : > { %v6418_v20 = vunpack.i.h.bf16 %v6416_v37  ;;  %v6417_v11 = vunpack.i.l.bf16 %v6416_v37  ;;  %6655 = vrot.lane.b32.xlu1 %v6654_v17, %s6811_s19  ;;  %5914 = vmatprep.subr.bf16.mxu0 %v5913_v34  ;;  %v6659_v48 = vpack.i.bf16 %v4825_v55, %v4822_v63  ;;  %v2466_v31 = vmul.f32 %v7978_v57, %v7248_v8  ;;  %v5552_v37 = vld [vmem:[%s8688_s3 + $0x88] sm:$0xff] }
 0x256   : > { %6650 = vrot.lane.b32.xlu0 %v6649_v9, %s6811_s19  ;;  %v3755_v50 = vsel %vm649_vm14, %v6422_v62, %v6412_v58  ;;  %v3757_v41 = vsel %vm649_vm14, %v6423_v60, %v6412_v58  ;;  %v2465_v58 = vmul.f32 %v7502_v18, %v7227_v45  ;;  %v6669_v55 = vpack.i.bf16 %v2463_v35, %v2462_v33 }
 0x257   : > { %v3752_v25 = vsel %vm649_vm14, %v6418_v20, %v6413_v42  ;;  %v3750_v1 = vsel %vm649_vm14, %v6417_v11, %v6288_v38  ;;  %5808 = vmatpush1.bf16.msra.mxu1 %v5807_v5  ;;  %v6431_v27 = vpop.permute.xlu1 %6430  ;;  %v2464_v38 = vmul.f32 %v7978_v57, %v7230_v46  ;;  %5674 = vmatmul.mubr.msk.f32.gmra.mrb[4].mxu0 %vm520_vm4, %v5670_v36 }
 0x258   : > { %v5915_v22 = vpack.c.bf16 %v3752_v25, %v3750_v1  ;;  %v6426_v51 = vpop.permute.xlu0 %6425  ;;  %v5917_v42 = vpack.c.bf16 %v3757_v41, %v3755_v50  ;;  %v6433_v52 = vunpack.i.h.bf16 %v6431_v27  ;;  %v6432_v32 = vunpack.i.l.bf16 %v6431_v27  ;;  %3675 = vmatprep.mubr.f32.mxu0 %v6824_v14  ;;  %v5677_v1 = vld [vmem:[%s8688_s3 + $0x240] sm:$0xff] }
 0x259   : > { %v6428_v56 = vunpack.i.h.bf16 %v6426_v51  ;;  %v6427_v29 = vunpack.i.l.bf16 %v6426_v51  ;;  %6665 = vrot.lane.b32.xlu1 %v6664_v54, %s6811_s19  ;;  %v4826_v19 = vmul.f32 %v7480_v39, %v7244_v6  ;;  %v8075_v30 = vsel %vm503_vm13, %v7515_v10, %v7517_v0 }
 0x25a   : > { %6660 = vrot.lane.b32.xlu0 %v6659_v48, %s6811_s19  ;;  %5916 = vmatpush1.bf16.msra.mxu0 %v5915_v22  ;;  %v2468_v39 = vmul.f32 %v7978_v57, %v7244_v6  ;;  %v6679_v17 = vpack.i.bf16 %v2466_v31, %v2461_v47  ;;  %v1388_v11 = vsel %vm969_vm8, %v6432_v32, %v6433_v52 }
 0x25b   : > { %v3756_v28 = vsel %vm649_vm14, %v6428_v56, %v6423_v60  ;;  %v3754_v13 = vsel %vm649_vm14, %v6427_v29, %v6422_v62  ;;  %5555 = vmatmul.mubr.msk.f32.vlgmr.msra.gmra.mrb[0].mxu1 %vm520_vm4, %v5551_v16  ;;  %5918 = vmatprep.subr.bf16.mxu0 %v5917_v42  ;;  %v6441_v40 = vpop.permute.xlu1 %6440  ;;  %v6674_v60 = vpack.i.bf16 %v2465_v58, %v2464_v38  ;;  %v5553_v16 = vld [vmem:[%s8688_s3 + $0x90] sm:$0xff]  ;;  %v5006_v38 = vmul.f32 0.0, %v7517_v0 }
 0x25c   : > { %v5919_v9 = vpack.c.bf16 %v3756_v28, %v3754_v13  ;;  %v6436_v26 = vpop.permute.xlu0 %6435  ;;  %v6442_v12 = vunpack.i.l.bf16 %v6441_v40  ;;  %1300 = vmatprep.mubr.f32.mxu1 %v6824_v14  ;;  %5675 = vmatmul.mubr.msk.f32.gmra.mrb[6].mxu0 %vm520_vm4, %v5671_v23  ;;  %v6443_v34 = vunpack.i.h.bf16 %v6441_v40  ;;  %v2467_v25 = vmul.f32 %v7502_v18, %v7240_v4  ;;  %v5678_v28 = vld [vmem:[%s8688_s3 + $0x248] sm:$0xff] }
 0x25d   : > { %v6438_v5 = vunpack.i.h.bf16 %v6436_v26  ;;  %v6437_v2 = vunpack.i.l.bf16 %v6436_v26  ;;  %6670 = vrot.lane.b32.xlu1 %v6669_v55, %s6810_s16  ;;  %3842 = vmatprep.mubr.f32.mxu0 %v6824_v14  ;;  %v5005_v50 = vmul.f32 %v8075_v30, %v7223_v43  ;;  %v5008_v22 = vmul.f32 %v8075_v30, %v7227_v45  ;;  %v5554_v26 = vld [vmem:[%s8688_s3 + $0x98] sm:$0xff] }
 0x25e   : > { %4856 = vrot.lane.b32.xlu0 %v4826_v19, %s6811_s19  ;;  %v1387_v62 = vsel %vm969_vm8, %v6442_v12, %v6432_v32  ;;  %5920 = vmatpush1.bf16.msra.mxu0 %v5919_v9  ;;  %v1391_v54 = vsel %vm969_vm8, %v6442_v12, %v6443_v34  ;;  %v2469_v48 = vmul.f32 %v7502_v18, %v7237_v53  ;;  %s8750_s19 = sshll.u32 %s8752_s22, 6 }
 0x25f   : > { %v1389_v20 = vsel %vm969_vm8, %v6442_v12, %v6437_v2  ;;  %v1390_v33 = vsel %vm969_vm8, %v6437_v2, %v6438_v5  ;;  %v1386_v35 = vpop.permute.xlu1 %1385  ;;  %5556 = vmatmul.mubr.msk.f32.gmra.mrb[2].mxu1 %vm520_vm4, %v5552_v37  ;;  %v5004_v41 = vmul.f32 %v7515_v10, %v7233_v49  ;;  %v6684_v58 = vpack.i.bf16 %v2468_v39, %v2467_v25  ;;  %s251_s28 = scalar_lea.vmem %s8691_s6, %s8750_s19 }
 0x260   : > { %v5811_v63 = vpack.c.bf16 %v1389_v20, %v1387_v62  ;;  %v6446_v36 = vpop.permute.xlu0 %6445  ;;  %v5809_v57 = vpack.c.bf16 %v1390_v33, %v1388_v11  ;;  %1306 = vmatprep.mubr.f32.mxu1 %v6824_v14  ;;  %v5012_v13 = vmul.f32 %v8075_v30, %v7237_v53  ;;  %v8127_v9 = vsel %vm2643_vm15, %v7536_v7, %v7534_v3 }
 0x261   : > { %v6448_v27 = vunpack.i.h.bf16 %v6446_v36  ;;  %v6447_v51 = vunpack.i.l.bf16 %v6446_v36  ;;  %6680 = vrot.lane.b32.xlu1 %v6679_v17, %s6810_s16  ;;  %5681 = vmatmul.mubr.msk.f32.vlgmr.msra.gmra.mrb[0].mxu0 %vm520_vm4, %v5677_v1  ;;  %v5009_v40 = vmul.f32 %v7515_v10, %v7248_v8  ;;  %v6689_v55 = vpack.i.bf16 %v5006_v38, %v5005_v50  ;;  %v5560_v36 = vld [vmem:[%s8688_s3 + $0xa0] sm:$0xff] }
 0x262   : > { %6675 = vrot.lane.b32.xlu0 %v6674_v60, %s6810_s16  ;;  %5810 = vmatprep.subr.bf16.mxu1 %v5809_v57  ;;  %v5010_v2 = vmul.f32 %v8075_v30, %v7240_v4  ;;  %v6694_v17 = vpack.i.bf16 %v5004_v41, %v5008_v22  ;;  %v2649_v60 = vmul.f32 %v8127_v9, %v7233_v49  ;;  %v5679_v30 = vld [vmem:[%s8688_s3 + $0x250] sm:$0xff]  ;;  %v2648_v38 = vmul.f32 0.0, %v7536_v7 }
 0x263   : > { %v1393_v56 = vsel %vm969_vm8, %v6442_v12, %v6448_v27  ;;  %v1392_v29 = vsel %vm969_vm8, %v6443_v34, %v6447_v51  ;;  %v1394_v47 = vsel %vm969_vm8, %v6448_v27, %v1386_v35  ;;  %5812 = vmatpush1.bf16.msra.mxu1 %v5811_v63  ;;  %v6456_v18 = vpop.permute.xlu1 %6455  ;;  %3848 = vmatprep.mubr.f32.mxu0 %v6824_v14 }
 0x264   : > { %v5815_v31 = vpack.c.bf16 %v1393_v56, %v1391_v54  ;;  %v6451_v42 = vpop.permute.xlu0 %6450  ;;  %v5813_v23 = vpack.c.bf16 %v1394_v47, %v1392_v29  ;;  %v6457_v52 = vunpack.i.l.bf16 %v6456_v18  ;;  %5557 = vmatmul.mubr.msk.f32.gmra.mrb[4].mxu1 %vm520_vm4, %v5553_v16  ;;  %v6458_v19 = vunpack.i.h.bf16 %v6456_v18  ;;  %v5680_v16 = vld [vmem:[%s8688_s3 + $0x258] sm:$0xff]  ;;  %v5561_v47 = vld [vmem:[%s8688_s3 + $0xa8] sm:$0xff] }
 0x265   : > { %v6453_v32 = vunpack.i.h.bf16 %v6451_v42  ;;  %v6452_v0 = vunpack.i.l.bf16 %v6451_v42  ;;  %2500 = vrot.lane.b32.xlu1 %v2469_v48, %s6810_s16  ;;  %1312 = vmatprep.mubr.f32.mxu1 %v6824_v14  ;;  %v6704_v33 = vpack.i.bf16 %v5009_v40, %v5012_v13  ;;  %v5007_v63 = vmul.f32 %v7515_v10, %v7230_v46 }
 0x266   : > { %6685 = vrot.lane.b32.xlu0 %v6684_v58, %s6810_s16  ;;  %5814 = vmatprep.subr.bf16.mxu1 %v5813_v23  ;;  %v2650_v35 = vmul.f32 %v7534_v3, %v7223_v43  ;;  %v2653_v56 = vmul.f32 %v8127_v9, %v7248_v8  ;;  %v5011_v7 = vmul.f32 %v7515_v10, %v7244_v6 }
 0x267   : > { %v3936_v12 = vsel %vm503_vm13, %v6452_v0, %v6453_v32  ;;  %v3938_v5 = vsel %vm503_vm13, %v6457_v52, %v6453_v32  ;;  %5816 = vmatpush1.bf16.msra.mxu1 %v5815_v31  ;;  %v6466_v37 = vpop.permute.xlu1 %6465  ;;  %5682 = vmatmul.mubr.msk.f32.gmra.mrb[2].mxu0 %vm520_vm4, %v5678_v28  ;;  %v3935_v57 = vsel %vm503_vm13, %v6458_v19, %v6452_v0 }
 0x268   : > { %v6461_v39 = vpop.permute.xlu0 %6460  ;;  %v5921_v34 = vpack.c.bf16 %v3938_v5, %v3936_v12  ;;  %v6467_v62 = vunpack.i.l.bf16 %v6466_v37  ;;  %5558 = vmatmul.mubr.msk.f32.gmra.mrb[6].mxu1 %vm520_vm4, %v5554_v26  ;;  %3854 = vmatprep.mubr.f32.mxu0 %v6824_v14  ;;  %v6468_v22 = vunpack.i.h.bf16 %v6466_v37  ;;  %v6699_v48 = vpack.i.bf16 %v5010_v2, %v5007_v63  ;;  %v5562_v5 = vld [vmem:[%s8688_s3 + $0xb0] sm:$0xff] }
 0x269   : > { %v6463_v20 = vunpack.i.h.bf16 %v6461_v39  ;;  %v6462_v11 = vunpack.i.l.bf16 %v6461_v39  ;;  %6695 = vrot.lane.b32.xlu1 %v6694_v17, %s6807_s29  ;;  %1479 = vmatprep.mubr.f32.mxu1 %v6824_v14  ;;  %v2651_v31 = vmul.f32 %v8127_v9, %v7230_v46  ;;  %v2652_v0 = vmul.f32 %v7534_v3, %v7227_v45 }
 0x26a   : > { %6690 = vrot.lane.b32.xlu0 %v6689_v55, %s6807_s29  ;;  %5922 = vmatprep.subr.bf16.mxu0 %v5921_v34  ;;  %v3942_v50 = vsel %vm503_vm13, %v6467_v62, %v6453_v32  ;;  %v2655_v10 = vmul.f32 %v8127_v9, %v7244_v6  ;;  %v6719_v55 = vpack.i.bf16 %v2653_v56, %v2648_v38 }
 0x26b   : > { %v3937_v25 = vsel %vm503_vm13, %v6462_v11, %v6457_v52  ;;  %v3940_v1 = vsel %vm503_vm13, %v6463_v20, %v6453_v32  ;;  %v6471_v51 = vpop.permute.xlu1 %6470  ;;  %5683 = vmatmul.mubr.msk.f32.gmra.mrb[4].mxu0 %vm520_vm4, %v5679_v30  ;;  %v3939_v58 = vsel %vm503_vm13, %v6468_v22, %v6463_v20  ;;  %v6709_v32 = vpack.i.bf16 %v2650_v35, %v2649_v60  ;;  %v5686_v30 = vld [vmem:[%s8688_s3 + $0x260] sm:$0xff] }
 0x26c   : > { %v5923_v27 = vpack.c.bf16 %v3937_v25, %v3935_v57  ;;  %v3932_v54 = vpop.permute.xlu0 %3931  ;;  %v5925_v41 = vpack.c.bf16 %v3942_v50, %v3940_v1  ;;  %5564 = vmatmul.mubr.msk.f32.vlgmr.msra.gmra.mrb[0].mxu1 %vm520_vm4, %v5560_v36  ;;  %3860 = vmatprep.mubr.f32.mxu0 %v6824_v14  ;;  %v6473_v18 = vunpack.i.h.bf16 %v6471_v51  ;;  %v6472_v42 = vunpack.i.l.bf16 %v6471_v51  ;;  %v5563_v50 = vld [vmem:[%s8688_s3 + $0xb8] sm:$0xff] }
 0x26d   : > { %v3941_v29 = vsel %vm503_vm13, %v3932_v54, %v6467_v62  ;;  %6705 = vrot.lane.b32.xlu1 %v6704_v33, %s6807_s29  ;;  %1485 = vmatprep.mubr.f32.mxu1 %v6824_v14  ;;  %v5185_v19 = vsel %vm649_vm14, %v7551_v24, %v7553_v21  ;;  %v6714_v62 = vpack.i.bf16 %v2652_v0, %v2651_v31  ;;  %v5191_v54 = vmul.f32 0.0, %v7553_v21  ;;  %v5687_v31 = vld [vmem:[%s8688_s3 + $0x268] sm:$0xff] }
 0x26e   : > { %6700 = vrot.lane.b32.xlu0 %v6699_v48, %s6807_s29  ;;  %5924 = vmatpush1.bf16.msra.mxu0 %v5923_v27  ;;  %v5927_v28 = vpack.c.bf16 %v3941_v29, %v3939_v58  ;;  %v1573_v9 = vsel %vm782_vm6, %v6472_v42, %v6473_v18  ;;  %v2654_v11 = vmul.f32 %v7534_v3, %v7240_v4 }
 0x26f   : > { %5926 = vmatprep.subr.bf16.mxu0 %v5925_v41  ;;  %v6481_v23 = vpop.permute.xlu1 %6480  ;;  %5684 = vmatmul.mubr.msk.f32.gmra.mrb[6].mxu0 %vm520_vm4, %v5680_v16  ;;  %v5190_v33 = vmul.f32 %v5185_v19, %v7223_v43  ;;  %v5193_v63 = vmul.f32 %v5185_v19, %v7227_v45  ;;  %v2656_v25 = vmul.f32 %v7534_v3, %v7237_v53 }
 0x270   : > { %v6476_v52 = vpop.permute.xlu0 %6475  ;;  %v6482_v13 = vunpack.i.l.bf16 %v6481_v23  ;;  %5565 = vmatmul.mubr.msk.f32.gmra.mrb[2].mxu1 %vm520_vm4, %v5561_v47  ;;  %4027 = vmatprep.mubr.f32.mxu0 %v6824_v14  ;;  %v6483_v12 = vunpack.i.h.bf16 %v6481_v23  ;;  %v5189_v1 = vmul.f32 %v7551_v24, %v7233_v49  ;;  %v6724_v16 = vpack.i.bf16 %v2655_v10, %v2654_v11 }
 0x271   : > { %v6478_v40 = vunpack.i.h.bf16 %v6476_v52  ;;  %v6477_v26 = vunpack.i.l.bf16 %v6476_v52  ;;  %6710 = vrot.lane.b32.xlu1 %v6709_v32, %s8733_s27  ;;  %1491 = vmatprep.mubr.f32.mxu1 %v6824_v14  ;;  %v5197_v21 = vmul.f32 %v5185_v19, %v7237_v53  ;;  %v5194_v18 = vmul.f32 %v7551_v24, %v7248_v8 }
 0x272   : > { %5041 = vrot.lane.b32.xlu0 %v5011_v7, %s6807_s29  ;;  %v1572_v2 = vsel %vm782_vm6, %v6482_v13, %v6472_v42  ;;  %5928 = vmatpush1.bf16.msra.mxu0 %v5927_v28  ;;  %v1576_v57 = vsel %vm782_vm6, %v6482_v13, %v6483_v12  ;;  %v5195_v42 = vmul.f32 %v5185_v19, %v7240_v4  ;;  %v5688_v19 = vld [vmem:[%s8688_s3 + $0x270] sm:$0xff] }
 0x273   : > { %v1574_v37 = vsel %vm782_vm6, %v6482_v13, %v6477_v26  ;;  %v1575_v39 = vsel %vm782_vm6, %v6477_v26, %v6478_v40  ;;  %v1571_v34 = vpop.permute.xlu1 %1570  ;;  %v6729_v52 = vpack.i.bf16 %v5191_v54, %v5190_v33  ;;  %v6734_v28 = vpack.i.bf16 %v5189_v1, %v5193_v63  ;;  %v5570_v63 = vld [vmem:[%s8688_s3 + $0xc8] sm:$0xff] }
 0x274   : > { %v5819_v17 = vpack.c.bf16 %v1574_v37, %v1572_v2  ;;  %v6486_v60 = vpop.permute.xlu0 %6485  ;;  %v5817_v20 = vpack.c.bf16 %v1575_v39, %v1573_v9  ;;  %5566 = vmatmul.mubr.msk.f32.gmra.mrb[4].mxu1 %vm520_vm4, %v5562_v5  ;;  %v5192_v5 = vmul.f32 %v7551_v24, %v7230_v46 }
 0x275   : > { %v6488_v35 = vunpack.i.h.bf16 %v6486_v60  ;;  %v6487_v36 = vunpack.i.l.bf16 %v6486_v60  ;;  %6720 = vrot.lane.b32.xlu1 %v6719_v55, %s8733_s27  ;;  %5690 = vmatmul.mubr.msk.f32.vlgmr.msra.gmra.mrb[0].mxu0 %vm520_vm4, %v5686_v30  ;;  %v5569_v55 = vld [vmem:[%s8688_s3 + $0xc0] sm:$0xff]  ;;  %v5689_v30 = vld [vmem:[%s8688_s3 + $0x278] sm:$0xff] }
 0x276   : > { %6715 = vrot.lane.b32.xlu0 %v6714_v62, %s8733_s27  ;;  %5818 = vmatprep.subr.bf16.mxu1 %v5817_v20  ;;  %v6739_v20 = vpack.i.bf16 %v5195_v42, %v5192_v5  ;;  %v5355_v5 = vld [vmem:[%s8689_s4] sm:$0xff] }
 0x277   : > { %v1578_v22 = vsel %vm782_vm6, %v6482_v13, %v6488_v35  ;;  %v1577_v27 = vsel %vm782_vm6, %v6483_v12, %v6487_v36  ;;  %v1579_v51 = vsel %vm782_vm6, %v6488_v35, %v1571_v34  ;;  %5820 = vmatpush1.bf16.msra.mxu1 %v5819_v17  ;;  %v6496_v3 = vpop.permute.xlu1 %6495  ;;  %1497 = vmatprep.mubr.f32.mxu1 %v6824_v14 }
 0x278   : > { %v5823_v48 = vpack.c.bf16 %v1578_v22, %v1576_v57  ;;  %v6491_v41 = vpop.permute.xlu0 %6490  ;;  %v5821_v38 = vpack.c.bf16 %v1579_v51, %v1577_v27  ;;  %v6497_v56 = vunpack.i.l.bf16 %v6496_v3  ;;  %5567 = vmatmul.mubr.msk.f32.gmra.mrb[6].mxu1 %vm520_vm4, %v5563_v50  ;;  %4033 = vmatprep.mubr.f32.mxu0 %v6824_v14  ;;  %v6498_v7 = vunpack.i.h.bf16 %v6496_v3  ;;  %v5571_v3 = vld [vmem:[%s8688_s3 + $0xd0] sm:$0xff] }
 0x279   : > { %v6493_v29 = vunpack.i.h.bf16 %v6491_v41  ;;  %v6492_v47 = vunpack.i.l.bf16 %v6491_v41  ;;  %2687 = vrot.lane.b32.xlu1 %v2656_v25, %s8733_s27  ;;  %1664 = vmatprep.mubr.f32.mxu1 %v6824_v14  ;;  %v6744_v12 = vpack.i.bf16 %v5194_v18, %v5197_v21  ;;  %v5196_v50 = vmul.f32 %v7551_v24, %v7244_v6 }
 0x27a   : > { %6725 = vrot.lane.b32.xlu0 %v6724_v16, %s8733_s27  ;;  %5822 = vmatprep.subr.bf16.mxu1 %v5821_v38 }
 0x27b   : > { %v4121_v58 = vsel %vm828_vm12, %v6492_v47, %v6493_v29  ;;  %v4123_v23 = vsel %vm828_vm12, %v6497_v56, %v6493_v29  ;;  %5824 = vmatpush1.bf16.msra.mxu1 %v5823_v48  ;;  %v6506_v32 = vpop.permute.xlu1 %6505  ;;  %5691 = vmatmul.mubr.msk.f32.gmra.mrb[2].mxu0 %vm520_vm4, %v5687_v31  ;;  %v4120_v2 = vsel %vm828_vm12, %v6498_v7, %v6492_v47 }
 0x27c   : > { %v6501_v0 = vpop.permute.xlu0 %6500  ;;  %v5929_v13 = vpack.c.bf16 %v4123_v23, %v4121_v58  ;;  %v6507_v40 = vunpack.i.l.bf16 %v6506_v32  ;;  %4039 = vmatprep.mubr.f32.mxu0 %v6824_v14  ;;  %v6508_v17 = vunpack.i.h.bf16 %v6506_v32  ;;  %v5572_v58 = vld [vmem:[%s8688_s3 + $0xd8] sm:$0xff] }
 0x27d   : > { %v6503_v26 = vunpack.i.h.bf16 %v6501_v0  ;;  %v6502_v10 = vunpack.i.l.bf16 %v6501_v0  ;;  %6735 = vrot.lane.b32.xlu1 %v6734_v28, %s6808_s10 }
 0x27e   : > { %6730 = vrot.lane.b32.xlu0 %v6729_v52, %s6808_s10  ;;  %5930 = vmatprep.subr.bf16.mxu0 %v5929_v13  ;;  %v4127_v39 = vsel %vm828_vm12, %v6507_v40, %v6493_v29 }
 0x27f   : > { %v4122_v37 = vsel %vm828_vm12, %v6502_v10, %v6497_v56  ;;  %v4125_v9 = vsel %vm828_vm12, %v6503_v26, %v6493_v29  ;;  %v6511_v60 = vpop.permute.xlu1 %6510  ;;  %5573 = vmatmul.mubr.msk.f32.vlgmr.msra.gmra.mrb[0].mxu1 %vm520_vm4, %v5569_v55  ;;  %5692 = vmatmul.mubr.msk.f32.gmra.mrb[4].mxu0 %vm520_vm4, %v5688_v19  ;;  %v4124_v57 = vsel %vm828_vm12, %v6508_v17, %v6503_v26  ;;  %v5695_v56 = vld [vmem:[%s8688_s3 + $0x280] sm:$0xff]  ;;  %v5696_v26 = vld [vmem:[%s8688_s3 + $0x288] sm:$0xff] }
 0x280   : > { %v5931_v34 = vpack.c.bf16 %v4122_v37, %v4120_v2  ;;  %v4117_v62 = vpop.permute.xlu0 %4116  ;;  %v5933_v11 = vpack.c.bf16 %v4127_v39, %v4125_v9  ;;  %4045 = vmatprep.mubr.f32.mxu0 %v6824_v14  ;;  %1670 = vmatprep.mubr.f32.mxu1 %v6824_v14  ;;  %v6513_v35 = vunpack.i.h.bf16 %v6511_v60  ;;  %v6512_v36 = vunpack.i.l.bf16 %v6511_v60  ;;  %v5578_v9 = vld [vmem:[%s8688_s3 + $0xe0] sm:$0xff]  ;;  %v5697_v60 = vld [vmem:[%s8688_s3 + $0x290] sm:$0xff] }
 0x281   : > { %v4126_v33 = vsel %vm828_vm12, %v4117_v62, %v6507_v40  ;;  %6745 = vrot.lane.b32.xlu1 %v6744_v12, %s6808_s10  ;;  %v6825_v62 = vmov 0  }
 0x282   : > { %6740 = vrot.lane.b32.xlu0 %v6739_v20, %s6808_s10  ;;  %5932 = vmatpush1.bf16.msra.mxu0 %v5931_v34  ;;  %v5935_v22 = vpack.c.bf16 %v4126_v33, %v4124_v57  ;;  %v1758_v16 = vsel %vm457_vm1, %v6512_v36, %v6513_v35  ;;  %v5357_v35 = vld [vmem:[%s8689_s4 + $0x10] sm:$0xff] }
 0x283   : > { %5934 = vmatprep.subr.bf16.mxu0 %v5933_v11  ;;  %v6521_v25 = vpop.permute.xlu1 %6520  ;;  %5693 = vmatmul.mubr.msk.f32.gmra.mrb[6].mxu0 %vm520_vm4, %v5689_v30 }
 0x284   : > { %v6516_v1 = vpop.permute.xlu0 %6515  ;;  %v6522_v27 = vunpack.i.l.bf16 %v6521_v25  ;;  %5574 = vmatmul.mubr.msk.f32.gmra.mrb[2].mxu1 %vm520_vm4, %v5570_v63  ;;  %4212 = vmatprep.mubr.f32.mxu0 %v6824_v14  ;;  %v6523_v48 = vunpack.i.h.bf16 %v6521_v25  ;;  %v5356_v63 = vld [vmem:[%s8689_s4 + $0x8] sm:$0xff] }
 0x285   : > { %v6518_v51 = vunpack.i.h.bf16 %v6516_v1  ;;  %v6517_v54 = vunpack.i.l.bf16 %v6516_v1  ;;  %1676 = vmatprep.mubr.f32.mxu1 %v6824_v14  ;;  %6749 = vset.pattern.permute.xlu1 %v6825_v62 }
 0x286   : > { %5226 = vrot.lane.b32.xlu0 %v5196_v50, %s6808_s10  ;;  %v1757_v24 = vsel %vm457_vm1, %v6522_v27, %v6512_v36  ;;  %5936 = vmatpush1.bf16.msra.mxu0 %v5935_v22  ;;  %v1761_v7 = vsel %vm457_vm1, %v6522_v27, %v6523_v48  ;;  %v5579_v50 = vld [vmem:[%s8688_s3 + $0xe8] sm:$0xff] }
 0x287   : > { %v1759_v41 = vsel %vm457_vm1, %v6522_v27, %v6517_v54  ;;  %v1760_v38 = vsel %vm457_vm1, %v6517_v54, %v6518_v51  ;;  %v1756_v47 = vpop.permute.xlu1 %1755  ;;  %5361 = vperm.xlu1 %6749, %v5355_v5   ;;  %6750 = vset.pattern.permute.xlu0 %v6825_v62  ;;  %v5705_v5 = vld [vmem:[%s8688_s3 + $0x2a8] sm:$0xff] }
 0x288   : > { %v5827_v29 = vpack.c.bf16 %v1759_v41, %v1757_v24  ;;  %v6526_v31 = vpop.permute.xlu0 %6525  ;;  %v5825_v21 = vpack.c.bf16 %v1760_v38, %v1758_v16  ;;  %5575 = vmatmul.mubr.msk.f32.gmra.mrb[4].mxu1 %vm520_vm4, %v5571_v3  ;;  %v5358_v24 = vld [vmem:[%s8689_s4 + $0x18] sm:$0xff] }
 0x289   : > { %v6528_v18 = vunpack.i.h.bf16 %v6526_v31  ;;  %v6527_v42 = vunpack.i.l.bf16 %v6526_v31  ;;  %5699 = vmatmul.mubr.msk.f32.vlgmr.msra.gmra.mrb[0].mxu0 %vm520_vm4, %v5695_v56  ;;  %1682 = vmatprep.mubr.f32.mxu1 %v6824_v14  ;;  %v5580_v56 = vld [vmem:[%s8688_s3 + $0xf0] sm:$0xff] }
 0x28a   : > { %5826 = vmatprep.subr.bf16.mxu1 %v5825_v21  ;;  %4218 = vmatprep.mubr.f32.mxu0 %v6824_v14 }
 0x28b   : > { %v1763_v23 = vsel %vm457_vm1, %v6522_v27, %v6528_v18  ;;  %5828 = vmatpush1.bf16.msra.mxu1 %v5827_v29  ;;  %v1762_v52 = vsel %vm457_vm1, %v6523_v48, %v6527_v42  ;;  %v1764_v32 = vsel %vm457_vm1, %v6528_v18, %v1756_v47  ;;  %v6536_v28 = vpop.permute.xlu1 %6535  ;;  %v5698_v48 = vld [vmem:[%s8688_s3 + $0x298] sm:$0xff]  ;;  %5366 = vperm.xlu0 %6750, %v5356_v63  }
 0x28c   : > { %v5831_v0 = vpack.c.bf16 %v1763_v23, %v1761_v7  ;;  %v6531_v13 = vpop.permute.xlu0 %6530  ;;  %v5829_v40 = vpack.c.bf16 %v1764_v32, %v1762_v52  ;;  %v6537_v10 = vunpack.i.l.bf16 %v6536_v28  ;;  %5576 = vmatmul.mubr.msk.f32.gmra.mrb[6].mxu1 %vm520_vm4, %v5572_v58  ;;  %v6538_v12 = vunpack.i.h.bf16 %v6536_v28  ;;  %5371 = vperm.xlu1 %6749, %v5357_v35   ;;  %v5704_v58 = vld [vmem:[%s8688_s3 + $0x2a0] sm:$0xff]  ;;  %v5581_v28 = vld [vmem:[%s8688_s3 + $0xf8] sm:$0xff] }
 0x28d   : > { %v6533_v55 = vunpack.i.h.bf16 %v6531_v13  ;;  %v6532_v19 = vunpack.i.l.bf16 %v6531_v13  ;;  %1849 = vmatprep.mubr.f32.mxu1 %v6824_v14  ;;  %5700 = vmatmul.mubr.msk.f32.gmra.mrb[2].mxu0 %vm520_vm4, %v5696_v26 }
 0x28e   : > { %5830 = vmatprep.subr.bf16.mxu1 %v5829_v40  ;;  %4224 = vmatprep.mubr.f32.mxu0 %v6824_v14 }
 0x28f   : > { %5832 = vmatpush1.bf16.msra.mxu1 %v5831_v0  ;;  %v4306_v2 = vsel %vm1015_vm11, %v6532_v19, %v6533_v55  ;;  %v4308_v37 = vsel %vm1015_vm11, %v6537_v10, %v6533_v55  ;;  %v6546_v39 = vpop.permute.xlu1 %6545  ;;  %v4305_v33 = vsel %vm1015_vm11, %v6538_v12, %v6532_v19 }
 0x290   : > { %v6541_v17 = vpop.permute.xlu0 %6540  ;;  %v5937_v34 = vpack.c.bf16 %v4308_v37, %v4306_v2  ;;  %v6547_v20 = vunpack.i.l.bf16 %v6546_v39  ;;  %v6548_v36 = vunpack.i.h.bf16 %v6546_v39  ;;  %5376 = vperm.xlu1 %6749, %v5358_v24  }
 0x291   : > { %v6543_v11 = vunpack.i.h.bf16 %v6541_v17  ;;  %v6542_v30 = vunpack.i.l.bf16 %v6541_v17  ;;  %5701 = vmatmul.mubr.msk.f32.gmra.mrb[4].mxu0 %vm520_vm4, %v5697_v60 }
 0x292   : > { %5938 = vmatprep.subr.bf16.mxu0 %v5937_v34  ;;  %5582 = vmatmul.mubr.msk.f32.vlgmr.msra.gmra.mrb[0].mxu1 %vm520_vm4, %v5578_v9  ;;  %v4312_v1 = vsel %vm1015_vm11, %v6547_v20, %v6533_v55 }
 0x293   : > { %v4307_v57 = vsel %vm1015_vm11, %v6542_v30, %v6537_v10  ;;  %v4310_v25 = vsel %vm1015_vm11, %v6543_v11, %v6533_v55  ;;  %v6551_v27 = vpop.permute.xlu1 %6550  ;;  %4230 = vmatprep.mubr.f32.mxu0 %v6824_v14  ;;  %1855 = vmatprep.mubr.f32.mxu1 %v6824_v14  ;;  %v4309_v38 = vsel %vm1015_vm11, %v6548_v36, %v6543_v11  ;;  %v5587_v36 = vld [vmem:[%s8688_s3 + $0x100] sm:$0xff] }
 0x294   : > { %v5939_v22 = vpack.c.bf16 %v4307_v57, %v4305_v33  ;;  %v4302_v51 = vpop.permute.xlu0 %4301  ;;  %v5941_v54 = vpack.c.bf16 %v4312_v1, %v4310_v25  ;;  %v6553_v41 = vunpack.i.h.bf16 %v6551_v27  ;;  %v6552_v16 = vunpack.i.l.bf16 %v6551_v27  ;;  %v5706_v33 = vld [vmem:[%s8688_s3 + $0x2b0] sm:$0xff] }
 0x295   : > { %v4311_v3 = vsel %vm1015_vm11, %v4302_v51, %v6547_v20  ;;  %5702 = vmatmul.mubr.msk.f32.gmra.mrb[6].mxu0 %vm520_vm4, %v5698_v48  ;;  %vm8741_vm11 = vmmov %vm8734_vm3 }
 0x296   : > { %5940 = vmatpush1.bf16.msra.mxu0 %v5939_v22  ;;  %5583 = vmatmul.mubr.msk.f32.gmra.mrb[2].mxu1 %vm520_vm4, %v5579_v50  ;;  %v5943_v29 = vpack.c.bf16 %v4311_v3, %v4309_v38  ;;  %v1943_v32 = vsel %vm424_vm2, %v6552_v16, %v6553_v41 }
 0x297   : > { %5942 = vmatprep.subr.bf16.mxu0 %v5941_v54  ;;  %v6561_v47 = vpop.permute.xlu1 %6560  ;;  %4397 = vmatprep.mubr.f32.mxu0 %v6824_v14  ;;  %v5707_v54 = vld [vmem:[%s8688_s3 + $0x2b8] sm:$0xff] }
 0x298   : > { %v6556_v31 = vpop.permute.xlu0 %6555  ;;  %1861 = vmatprep.mubr.f32.mxu1 %v6824_v14  ;;  %v6562_v21 = vunpack.i.l.bf16 %v6561_v47  ;;  %v6563_v7 = vunpack.i.h.bf16 %v6561_v47 }
 0x299   : > { %v6558_v18 = vunpack.i.h.bf16 %v6556_v31  ;;  %v6557_v42 = vunpack.i.l.bf16 %v6556_v31 }
 0x29a   : > { %5944 = vmatpush1.bf16.msra.mxu0 %v5943_v29  ;;  %5584 = vmatmul.mubr.msk.f32.gmra.mrb[4].mxu1 %vm520_vm4, %v5580_v56  ;;  %v1942_v23 = vsel %vm424_vm2, %v6562_v21, %v6552_v16  ;;  %v1946_v12 = vsel %vm424_vm2, %v6562_v21, %v6563_v7  ;;  %v5588_v16 = vld [vmem:[%s8688_s3 + $0x108] sm:$0xff] }
 0x29b   : > { %v1944_v52 = vsel %vm424_vm2, %v6562_v21, %v6557_v42  ;;  %v1945_v0 = vsel %vm424_vm2, %v6557_v42, %v6558_v18  ;;  %1867 = vmatprep.mubr.f32.mxu1 %v6824_v14  ;;  %v1941_v40 = vpop.permute.xlu1 %1940 }
 0x29c   : > { %v5835_v13 = vpack.c.bf16 %v1944_v52, %v1942_v23  ;;  %v6566_v26 = vpop.permute.xlu0 %6565  ;;  %v5833_v10 = vpack.c.bf16 %v1945_v0, %v1943_v32 }
 0x29d   : > { %v6568_v55 = vunpack.i.h.bf16 %v6566_v26  ;;  %v6567_v19 = vunpack.i.l.bf16 %v6566_v26  ;;  %5708 = vmatmul.mubr.msk.f32.vlgmr.msra.gmra.mrb[0].mxu0 %vm520_vm4, %v5704_v58 }
 0x29e   : > { %5834 = vmatprep.subr.bf16.mxu1 %v5833_v10  ;;  %5585 = vmatmul.mubr.msk.f32.gmra.mrb[6].mxu1 %vm520_vm4, %v5581_v28 }
 0x29f   : > { %v1948_v2 = vsel %vm424_vm2, %v6562_v21, %v6568_v55  ;;  %5836 = vmatpush1.bf16.msra.mxu1 %v5835_v13  ;;  %v1947_v37 = vsel %vm424_vm2, %v6563_v7, %v6567_v19  ;;  %v1949_v9 = vsel %vm424_vm2, %v6568_v55, %v1941_v40  ;;  %4403 = vmatprep.mubr.f32.mxu0 %v6824_v14  ;;  %v6576_v17 = vpop.permute.xlu1 %6575  ;;  %v5589_v7 = vld [vmem:[%s8688_s3 + $0x110] sm:$0xff]  ;;  %v5713_v40 = vld [vmem:[%s8688_s3 + $0x2c0] sm:$0xff] }
 0x2a0   : > { %v5839_v39 = vpack.c.bf16 %v1948_v2, %v1946_v12  ;;  %v6571_v34 = vpop.permute.xlu0 %6570  ;;  %v5837_v60 = vpack.c.bf16 %v1949_v9, %v1947_v37  ;;  %2034 = vmatprep.mubr.f32.mxu1 %v6824_v14  ;;  %v6577_v62 = vunpack.i.l.bf16 %v6576_v17  ;;  %v6578_v30 = vunpack.i.h.bf16 %v6576_v17  ;;  %v5590_v12 = vld [vmem:[%s8688_s3 + $0x118] sm:$0xff] }
 0x2a1   : > { %v6573_v20 = vunpack.i.h.bf16 %v6571_v34  ;;  %v6572_v11 = vunpack.i.l.bf16 %v6571_v34  ;;  %5709 = vmatmul.mubr.msk.f32.gmra.mrb[2].mxu0 %vm520_vm4, %v5705_v5 }
 0x2a2   : > { %5838 = vmatprep.subr.bf16.mxu1 %v5837_v60  ;;  %4409 = vmatprep.mubr.f32.mxu0 %v6824_v14  ;;  %v5714_v60 = vld [vmem:[%s8688_s3 + $0x2c8] sm:$0xff] }
 0x2a3   : > { %5840 = vmatpush1.bf16.msra.mxu1 %v5839_v39  ;;  %v4491_v63 = vsel %vm1156_vm10, %v6572_v11, %v6573_v20  ;;  %v4493_v35 = vsel %vm1156_vm10, %v6577_v62, %v6573_v20  ;;  %v6586_v57 = vpop.permute.xlu1 %6585  ;;  %v4490_v51 = vsel %vm1156_vm10, %v6578_v30, %v6572_v11 }
 0x2a4   : > { %v6581_v25 = vpop.permute.xlu0 %6580  ;;  %v5945_v1 = vpack.c.bf16 %v4493_v35, %v4491_v63  ;;  %v6587_v50 = vunpack.i.l.bf16 %v6586_v57  ;;  %v6588_v48 = vunpack.i.h.bf16 %v6586_v57 }
 0x2a5   : > { %v6583_v22 = vunpack.i.h.bf16 %v6581_v25  ;;  %v6582_v27 = vunpack.i.l.bf16 %v6581_v25  ;;  %5710 = vmatmul.mubr.msk.f32.gmra.mrb[4].mxu0 %vm520_vm4, %v5706_v33 }
 0x2a6   : > { %5946 = vmatprep.subr.bf16.mxu0 %v5945_v1  ;;  %5591 = vmatmul.mubr.msk.f32.vlgmr.msra.gmra.mrb[0].mxu1 %vm520_vm4, %v5587_v36  ;;  %v4497_v41 = vsel %vm1156_vm10, %v6587_v50, %v6573_v20 }
 0x2a7   : > { %v4492_v3 = vsel %vm1156_vm10, %v6582_v27, %v6577_v62  ;;  %v4495_v24 = vsel %vm1156_vm10, %v6583_v22, %v6573_v20  ;;  %2040 = vmatprep.mubr.f32.mxu1 %v6824_v14  ;;  %v6591_v56 = vpop.permute.xlu1 %6590  ;;  %4415 = vmatprep.mubr.f32.mxu0 %v6824_v14  ;;  %v4494_v42 = vsel %vm1156_vm10, %v6588_v48, %v6583_v22 }
 0x2a8   : > { %v5947_v38 = vpack.c.bf16 %v4492_v3, %v4490_v51  ;;  %v4487_v29 = vpop.permute.xlu0 %4486  ;;  %v5949_v47 = vpack.c.bf16 %v4497_v41, %v4495_v24  ;;  %v6593_v21 = vunpack.i.h.bf16 %v6591_v56  ;;  %v6592_v18 = vunpack.i.l.bf16 %v6591_v56  ;;  %v5596_v51 = vld [vmem:[%s8688_s3 + $0x120] sm:$0xff]  ;;  %v5716_v56 = vld [vmem:[%s8688_s3 + $0x2d8] sm:$0xff] }
 0x2a9   : > { %v4496_v31 = vsel %vm1156_vm10, %v4487_v29, %v6587_v50  ;;  %5711 = vmatmul.mubr.msk.f32.gmra.mrb[6].mxu0 %vm520_vm4, %v5707_v54  ;;  %v5715_v50 = vld [vmem:[%s8688_s3 + $0x2d0] sm:$0xff]  ;;  %vm8740_vm10 = vmmov %vm8734_vm3 }
 0x2aa   : > { %5948 = vmatpush1.bf16.msra.mxu0 %v5947_v38  ;;  %5592 = vmatmul.mubr.msk.f32.gmra.mrb[2].mxu1 %vm520_vm4, %v5588_v16  ;;  %v5951_v58 = vpack.c.bf16 %v4496_v31, %v4494_v42  ;;  %v2130_v55 = vsel %vm2128_vm9, %v6592_v18, %v6593_v21 }
 0x2ab   : > { %5950 = vmatprep.subr.bf16.mxu0 %v5949_v47  ;;  %2046 = vmatprep.mubr.f32.mxu1 %v6824_v14  ;;  %v6601_v23 = vpop.permute.xlu1 %6600 }
 0x2ac   : > { %v6596_v52 = vpop.permute.xlu0 %6595  ;;  %4582 = vmatprep.mubr.f32.mxu0 %v6824_v14  ;;  %v6602_v32 = vunpack.i.l.bf16 %v6601_v23  ;;  %v6603_v13 = vunpack.i.h.bf16 %v6601_v23 }
 0x2ad   : > { %v6598_v0 = vunpack.i.h.bf16 %v6596_v52  ;;  %v6597_v28 = vunpack.i.l.bf16 %v6596_v52 }
 0x2ae   : > { %5952 = vmatpush1.bf16.msra.mxu0 %v5951_v58  ;;  %5593 = vmatmul.mubr.msk.f32.gmra.mrb[4].mxu1 %vm520_vm4, %v5589_v7  ;;  %v2129_v26 = vsel %vm2128_vm9, %v6602_v32, %v6592_v18  ;;  %v2133_v34 = vsel %vm2128_vm9, %v6602_v32, %v6603_v13  ;;  %v5597_v18 = vld [vmem:[%s8688_s3 + $0x128] sm:$0xff] }
 0x2af   : > { %v2131_v10 = vsel %vm2128_vm9, %v6602_v32, %v6597_v28  ;;  %v2132_v19 = vsel %vm2128_vm9, %v6597_v28, %v6598_v0  ;;  %2052 = vmatprep.mubr.f32.mxu1 %v6824_v14  ;;  %v2127_v2 = vpop.permute.xlu1 %2126 }
 0x2b0   : > { %v5843_v5 = vpack.c.bf16 %v2131_v10, %v2129_v26  ;;  %v6606_v37 = vpop.permute.xlu0 %6605  ;;  %v5841_v9 = vpack.c.bf16 %v2132_v19, %v2130_v55 }
 0x2b1   : > { %v6608_v39 = vunpack.i.h.bf16 %v6606_v37  ;;  %v6607_v17 = vunpack.i.l.bf16 %v6606_v37  ;;  %5717 = vmatmul.mubr.msk.f32.vlgmr.msra.gmra.mrb[0].mxu0 %vm520_vm4, %v5713_v40 }
 0x2b2   : > { %5842 = vmatprep.subr.bf16.mxu1 %v5841_v9  ;;  %5594 = vmatmul.mubr.msk.f32.gmra.mrb[6].mxu1 %vm520_vm4, %v5590_v12 }
 0x2b3   : > { %v2135_v62 = vsel %vm2128_vm9, %v6602_v32, %v6608_v39  ;;  %5844 = vmatpush1.bf16.msra.mxu1 %v5843_v5  ;;  %v2134_v20 = vsel %vm2128_vm9, %v6603_v13, %v6607_v17  ;;  %v2136_v11 = vsel %vm2128_vm9, %v6608_v39, %v2127_v2  ;;  %4588 = vmatprep.mubr.f32.mxu0 %v6824_v14  ;;  %v6616_v33 = vpop.permute.xlu1 %6615  ;;  %v5598_v13 = vld [vmem:[%s8688_s3 + $0x130] sm:$0xff]  ;;  %v5722_v2 = vld [vmem:[%s8688_s3 + $0x2e0] sm:$0xff]  ;;  %vm8739_vm9 = vmmov %vm8734_vm3 }
 0x2b4   : > { %v5847_v30 = vpack.c.bf16 %v2135_v62, %v2133_v34  ;;  %v6611_v63 = vpop.permute.xlu0 %6610  ;;  %v5845_v35 = vpack.c.bf16 %v2136_v11, %v2134_v20  ;;  %2221 = vmatprep.mubr.f32.mxu1 %v6824_v14  ;;  %v6617_v36 = vunpack.i.l.bf16 %v6616_v33  ;;  %v6618_v1 = vunpack.i.h.bf16 %v6616_v33  ;;  %v5599_v34 = vld [vmem:[%s8688_s3 + $0x138] sm:$0xff] }
 0x2b5   : > { %v6613_v57 = vunpack.i.h.bf16 %v6611_v63  ;;  %v6612_v25 = vunpack.i.l.bf16 %v6611_v63  ;;  %5718 = vmatmul.mubr.msk.f32.gmra.mrb[2].mxu0 %vm520_vm4, %v5714_v60 }
 0x2b6   : > { %5846 = vmatprep.subr.bf16.mxu1 %v5845_v35  ;;  %4594 = vmatprep.mubr.f32.mxu0 %v6824_v14  ;;  %v5723_v35 = vld [vmem:[%s8688_s3 + $0x2e8] sm:$0xff] }
 0x2b7   : > { %5848 = vmatpush1.bf16.msra.mxu1 %v5847_v30  ;;  %v4676_v22 = vsel %vm969_vm8, %v6612_v25, %v6613_v57  ;;  %v4678_v27 = vsel %vm969_vm8, %v6617_v36, %v6613_v57  ;;  %v6626_v54 = vpop.permute.xlu1 %6625  ;;  %v4675_v38 = vsel %vm969_vm8, %v6618_v1, %v6612_v25 }
 0x2b8   : > { %v6621_v48 = vpop.permute.xlu0 %6620  ;;  %v5953_v3 = vpack.c.bf16 %v4678_v27, %v4676_v22  ;;  %v6627_v24 = vunpack.i.l.bf16 %v6626_v54  ;;  %v6628_v29 = vunpack.i.h.bf16 %v6626_v54 }
 0x2b9   : > { %v6623_v41 = vunpack.i.h.bf16 %v6621_v48  ;;  %v6622_v16 = vunpack.i.l.bf16 %v6621_v48  ;;  %5719 = vmatmul.mubr.msk.f32.gmra.mrb[4].mxu0 %vm520_vm4, %v5715_v50 }
 0x2ba   : > { %5954 = vmatprep.subr.bf16.mxu0 %v5953_v3  ;;  %5600 = vmatmul.mubr.msk.f32.vlgmr.msra.gmra.mrb[0].mxu1 %vm520_vm4, %v5596_v51  ;;  %v4682_v21 = vsel %vm969_vm8, %v6627_v24, %v6613_v57 }
 0x2bb   : > { %v4677_v47 = vsel %vm969_vm8, %v6622_v16, %v6617_v36  ;;  %v4680_v31 = vsel %vm969_vm8, %v6623_v41, %v6613_v57  ;;  %2227 = vmatprep.mubr.f32.mxu1 %v6824_v14  ;;  %v6631_v7 = vpop.permute.xlu1 %6630  ;;  %4600 = vmatprep.mubr.f32.mxu0 %v6824_v14  ;;  %v4679_v28 = vsel %vm969_vm8, %v6628_v29, %v6623_v41 }
 0x2bc   : > { %v5955_v42 = vpack.c.bf16 %v4677_v47, %v4675_v38  ;;  %v4672_v58 = vpop.permute.xlu0 %4671  ;;  %v5957_v23 = vpack.c.bf16 %v4682_v21, %v4680_v31  ;;  %v6633_v32 = vunpack.i.h.bf16 %v6631_v7  ;;  %v6632_v0 = vunpack.i.l.bf16 %v6631_v7  ;;  %v5605_v38 = vld [vmem:[%s8688_s3 + $0x140] sm:$0xff]  ;;  %v5725_v7 = vld [vmem:[%s8688_s3 + $0x2f8] sm:$0xff] }
 0x2bd   : > { %v4681_v52 = vsel %vm969_vm8, %v4672_v58, %v6627_v24  ;;  %5720 = vmatmul.mubr.msk.f32.gmra.mrb[6].mxu0 %vm520_vm4, %v5716_v56  ;;  %v5724_v24 = vld [vmem:[%s8688_s3 + $0x2f0] sm:$0xff]  ;;  %vm8738_vm8 = vmmov %vm8734_vm3 }
 0x2be   : > { %5956 = vmatpush1.bf16.msra.mxu0 %v5955_v42  ;;  %5601 = vmatmul.mubr.msk.f32.gmra.mrb[2].mxu1 %vm520_vm4, %v5597_v18  ;;  %v5959_v40 = vpack.c.bf16 %v4681_v52, %v4679_v28  ;;  %v2317_v39 = vsel %vm2315_vm7, %v6632_v0, %v6633_v32 }
 0x2bf   : > { %5958 = vmatprep.subr.bf16.mxu0 %v5957_v23  ;;  %2233 = vmatprep.mubr.f32.mxu1 %v6824_v14  ;;  %v6641_v26 = vpop.permute.xlu1 %6640 }
 0x2c0   : > { %v6636_v10 = vpop.permute.xlu0 %6635  ;;  %4767 = vmatprep.mubr.f32.mxu0 %v6824_v14  ;;  %v6642_v55 = vunpack.i.l.bf16 %v6641_v26  ;;  %v6643_v5 = vunpack.i.h.bf16 %v6641_v26 }
 0x2c1   : > { %v6638_v19 = vunpack.i.h.bf16 %v6636_v10  ;;  %v6637_v12 = vunpack.i.l.bf16 %v6636_v10 }
 0x2c2   : > { %5960 = vmatpush1.bf16.msra.mxu0 %v5959_v40  ;;  %5602 = vmatmul.mubr.msk.f32.gmra.mrb[4].mxu1 %vm520_vm4, %v5598_v13  ;;  %v2316_v37 = vsel %vm2315_vm7, %v6642_v55, %v6632_v0  ;;  %v2320_v63 = vsel %vm2315_vm7, %v6642_v55, %v6643_v5  ;;  %v5606_v0 = vld [vmem:[%s8688_s3 + $0x148] sm:$0xff] }
 0x2c3   : > { %v2318_v9 = vsel %vm2315_vm7, %v6642_v55, %v6637_v12  ;;  %v2319_v17 = vsel %vm2315_vm7, %v6637_v12, %v6638_v19  ;;  %2239 = vmatprep.mubr.f32.mxu1 %v6824_v14  ;;  %v2314_v62 = vpop.permute.xlu1 %2313 }
 0x2c4   : > { %v5851_v60 = vpack.c.bf16 %v2318_v9, %v2316_v37  ;;  %v6646_v20 = vpop.permute.xlu0 %6645  ;;  %v5849_v11 = vpack.c.bf16 %v2319_v17, %v2317_v39 }
 0x2c5   : > { %v6648_v30 = vunpack.i.h.bf16 %v6646_v20  ;;  %v6647_v33 = vunpack.i.l.bf16 %v6646_v20  ;;  %5726 = vmatmul.mubr.msk.f32.vlgmr.msra.gmra.mrb[0].mxu0 %vm520_vm4, %v5722_v2 }
 0x2c6   : > { %5850 = vmatprep.subr.bf16.mxu1 %v5849_v11  ;;  %5603 = vmatmul.mubr.msk.f32.gmra.mrb[6].mxu1 %vm520_vm4, %v5599_v34 }
 0x2c7   : > { %v2322_v36 = vsel %vm2315_vm7, %v6642_v55, %v6648_v30  ;;  %5852 = vmatpush1.bf16.msra.mxu1 %v5851_v60  ;;  %v2321_v57 = vsel %vm2315_vm7, %v6643_v5, %v6647_v33  ;;  %v2323_v25 = vsel %vm2315_vm7, %v6648_v30, %v2314_v62  ;;  %4773 = vmatprep.mubr.f32.mxu0 %v6824_v14  ;;  %v6656_v50 = vpop.permute.xlu1 %6655  ;;  %v5607_v5 = vld [vmem:[%s8688_s3 + $0x150] sm:$0xff]  ;;  %v5731_v62 = vld [vmem:[%s8688_s3 + $0x300] sm:$0xff]  ;;  %vm8737_vm7 = vmmov %vm8734_vm3 }
 0x2c8   : > { %v5855_v1 = vpack.c.bf16 %v2322_v36, %v2320_v63  ;;  %v6651_v22 = vpop.permute.xlu0 %6650  ;;  %v5853_v27 = vpack.c.bf16 %v2323_v25, %v2321_v57  ;;  %2408 = vmatprep.mubr.f32.mxu1 %v6824_v14  ;;  %v6657_v51 = vunpack.i.l.bf16 %v6656_v50  ;;  %v6658_v3 = vunpack.i.h.bf16 %v6656_v50  ;;  %v5608_v63 = vld [vmem:[%s8688_s3 + $0x158] sm:$0xff] }
 0x2c9   : > { %v6653_v54 = vunpack.i.h.bf16 %v6651_v22  ;;  %v6652_v48 = vunpack.i.l.bf16 %v6651_v22  ;;  %5727 = vmatmul.mubr.msk.f32.gmra.mrb[2].mxu0 %vm520_vm4, %v5723_v35 }
 0x2ca   : > { %5854 = vmatprep.subr.bf16.mxu1 %v5853_v27  ;;  %4779 = vmatprep.mubr.f32.mxu0 %v6824_v14  ;;  %v5732_v27 = vld [vmem:[%s8688_s3 + $0x308] sm:$0xff] }
 0x2cb   : > { %5856 = vmatpush1.bf16.msra.mxu1 %v5855_v1  ;;  %v4861_v41 = vsel %vm782_vm6, %v6652_v48, %v6653_v54  ;;  %v4863_v16 = vsel %vm782_vm6, %v6657_v51, %v6653_v54  ;;  %v6666_v56 = vpop.permute.xlu1 %6665  ;;  %v4860_v42 = vsel %vm782_vm6, %v6658_v3, %v6652_v48 }
 0x2cc   : > { %v6661_v29 = vpop.permute.xlu0 %6660  ;;  %v5961_v47 = vpack.c.bf16 %v4863_v16, %v4861_v41  ;;  %v6667_v31 = vunpack.i.l.bf16 %v6666_v56  ;;  %v6668_v58 = vunpack.i.h.bf16 %v6666_v56 }
 0x2cd   : > { %v6663_v21 = vunpack.i.h.bf16 %v6661_v29  ;;  %v6662_v18 = vunpack.i.l.bf16 %v6661_v29  ;;  %5728 = vmatmul.mubr.msk.f32.gmra.mrb[4].mxu0 %vm520_vm4, %v5724_v24 }
 0x2ce   : > { %5962 = vmatprep.subr.bf16.mxu0 %v5961_v47  ;;  %5609 = vmatmul.mubr.msk.f32.vlgmr.msra.gmra.mrb[0].mxu1 %vm520_vm4, %v5605_v38  ;;  %v4867_v32 = vsel %vm782_vm6, %v6667_v31, %v6653_v54 }
 0x2cf   : > { %v4862_v23 = vsel %vm782_vm6, %v6662_v18, %v6657_v51  ;;  %v4865_v52 = vsel %vm782_vm6, %v6663_v21, %v6653_v54  ;;  %2414 = vmatprep.mubr.f32.mxu1 %v6824_v14  ;;  %v6671_v13 = vpop.permute.xlu1 %6670  ;;  %4785 = vmatprep.mubr.f32.mxu0 %v6824_v14  ;;  %v4864_v12 = vsel %vm782_vm6, %v6668_v58, %v6663_v21 }
 0x2d0   : > { %v5963_v28 = vpack.c.bf16 %v4862_v23, %v4860_v42  ;;  %v4857_v40 = vpop.permute.xlu0 %4856  ;;  %v5965_v26 = vpack.c.bf16 %v4867_v32, %v4865_v52  ;;  %v6673_v55 = vunpack.i.h.bf16 %v6671_v13  ;;  %v6672_v19 = vunpack.i.l.bf16 %v6671_v13  ;;  %v5614_v42 = vld [vmem:[%s8688_s3 + $0x160] sm:$0xff]  ;;  %v5734_v13 = vld [vmem:[%s8688_s3 + $0x318] sm:$0xff] }
 0x2d1   : > { %v4866_v10 = vsel %vm782_vm6, %v4857_v40, %v6667_v31  ;;  %5729 = vmatmul.mubr.msk.f32.gmra.mrb[6].mxu0 %vm520_vm4, %v5725_v7  ;;  %vm8736_vm6 = vmmov %vm8734_vm3  ;;  %v5733_v31 = vld [vmem:[%s8688_s3 + $0x310] sm:$0xff] }
 0x2d2   : > { %5964 = vmatpush1.bf16.msra.mxu0 %v5963_v28  ;;  %5610 = vmatmul.mubr.msk.f32.gmra.mrb[2].mxu1 %vm520_vm4, %v5606_v0  ;;  %v5967_v2 = vpack.c.bf16 %v4866_v10, %v4864_v12  ;;  %v2504_v30 = vsel %vm8736_vm6, %v6672_v19, %v6673_v55 }
 0x2d3   : > { %5966 = vmatprep.subr.bf16.mxu0 %v5965_v26  ;;  %2420 = vmatprep.mubr.f32.mxu1 %v6824_v14  ;;  %v6681_v37 = vpop.permute.xlu1 %6680 }
 0x2d4   : > { %v6676_v9 = vpop.permute.xlu0 %6675  ;;  %4952 = vmatprep.mubr.f32.mxu0 %v6824_v14  ;;  %v6682_v39 = vunpack.i.l.bf16 %v6681_v37  ;;  %v6683_v60 = vunpack.i.h.bf16 %v6681_v37 }
 0x2d5   : > { %v6678_v17 = vunpack.i.h.bf16 %v6676_v9  ;;  %v6677_v34 = vunpack.i.l.bf16 %v6676_v9 }
 0x2d6   : > { %5968 = vmatpush1.bf16.msra.mxu0 %v5967_v2  ;;  %5611 = vmatmul.mubr.msk.f32.gmra.mrb[4].mxu1 %vm520_vm4, %v5607_v5  ;;  %v2503_v20 = vsel %vm8734_vm3, %v6682_v39, %v6672_v19  ;;  %v2507_v22 = vsel %vm8738_vm8, %v6682_v39, %v6683_v60  ;;  %v5615_v19 = vld [vmem:[%s8688_s3 + $0x168] sm:$0xff] }
 0x2d7   : > { %v2505_v11 = vsel %vm8735_vm5, %v6682_v39, %v6677_v34  ;;  %v2506_v33 = vsel %vm8737_vm7, %v6677_v34, %v6678_v17  ;;  %2426 = vmatprep.mubr.f32.mxu1 %v6824_v14  ;;  %v2501_v36 = vpop.permute.xlu1 %2500 }
 0x2d8   : > { %v5859_v35 = vpack.c.bf16 %v2505_v11, %v2503_v20  ;;  %v6686_v57 = vpop.permute.xlu0 %6685  ;;  %v5857_v25 = vpack.c.bf16 %v2506_v33, %v2504_v30 }
 0x2d9   : > { %v6688_v1 = vunpack.i.h.bf16 %v6686_v57  ;;  %v6687_v50 = vunpack.i.l.bf16 %v6686_v57  ;;  %5735 = vmatmul.mubr.msk.f32.vlgmr.msra.gmra.mrb[0].mxu0 %vm520_vm4, %v5731_v62 }
 0x2da   : > { %5858 = vmatprep.subr.bf16.mxu1 %v5857_v25  ;;  %5612 = vmatmul.mubr.msk.f32.gmra.mrb[6].mxu1 %vm520_vm4, %v5608_v63 }
 0x2db   : > { %v2509_v51 = vsel %vm8739_vm9, %v6682_v39, %v6688_v1  ;;  %5860 = vmatpush1.bf16.msra.mxu1 %v5859_v35  ;;  %v2508_v54 = vsel %vm8740_vm10, %v6683_v60, %v6687_v50  ;;  %v2510_v48 = vsel %vm8741_vm11, %v6688_v1, %v2501_v36  ;;  %4958 = vmatprep.mubr.f32.mxu0 %v6824_v14  ;;  %v6696_v24 = vpop.permute.xlu1 %6695  ;;  %v5616_v60 = vld [vmem:[%s8688_s3 + $0x170] sm:$0xff]  ;;  %v5740_v36 = vld [vmem:[%s8688_s3 + $0x320] sm:$0xff] }
 0x2dc   : > { %v5863_v3 = vpack.c.bf16 %v2509_v51, %v2507_v22  ;;  %v6691_v41 = vpop.permute.xlu0 %6690  ;;  %v5861_v16 = vpack.c.bf16 %v2510_v48, %v2508_v54  ;;  %2595 = vmatprep.mubr.f32.mxu1 %v6824_v14  ;;  %v6697_v38 = vunpack.i.l.bf16 %v6696_v24  ;;  %v6698_v47 = vunpack.i.h.bf16 %v6696_v24  ;;  %v5617_v22 = vld [vmem:[%s8688_s3 + $0x178] sm:$0xff] }
 0x2dd   : > { %v6693_v56 = vunpack.i.h.bf16 %v6691_v41  ;;  %v6692_v29 = vunpack.i.l.bf16 %v6691_v41  ;;  %5736 = vmatmul.mubr.msk.f32.gmra.mrb[2].mxu0 %vm520_vm4, %v5732_v27 }
 0x2de   : > { %5862 = vmatprep.subr.bf16.mxu1 %v5861_v16  ;;  %4964 = vmatprep.mubr.f32.mxu0 %v6824_v14  ;;  %v5741_v16 = vld [vmem:[%s8688_s3 + $0x328] sm:$0xff] }
 0x2df   : > { %5864 = vmatpush1.bf16.msra.mxu1 %v5863_v3  ;;  %v5046_v21 = vsel %vm457_vm1, %v6692_v29, %v6693_v56  ;;  %v5048_v18 = vsel %vm457_vm1, %v6697_v38, %v6693_v56  ;;  %v6706_v7 = vpop.permute.xlu1 %6705  ;;  %v5045_v28 = vsel %vm457_vm1, %v6698_v47, %v6692_v29 }
 0x2e0   : > { %v6701_v58 = vpop.permute.xlu0 %6700  ;;  %v5969_v23 = vpack.c.bf16 %v5048_v18, %v5046_v21  ;;  %v6707_v52 = vunpack.i.l.bf16 %v6706_v7  ;;  %v6708_v40 = vunpack.i.h.bf16 %v6706_v7 }
 0x2e1   : > { %v6703_v32 = vunpack.i.h.bf16 %v6701_v58  ;;  %v6702_v0 = vunpack.i.l.bf16 %v6701_v58  ;;  %5737 = vmatmul.mubr.msk.f32.gmra.mrb[4].mxu0 %vm520_vm4, %v5733_v31 }
 0x2e2   : > { %5970 = vmatprep.subr.bf16.mxu0 %v5969_v23  ;;  %5618 = vmatmul.mubr.msk.f32.vlgmr.msra.gmra.mrb[0].mxu1 %vm520_vm4, %v5614_v42  ;;  %v5052_v55 = vsel %vm457_vm1, %v6707_v52, %v6693_v56  ;;  %v5742_v23 = vld [vmem:[%s8688_s3 + $0x330] sm:$0xff] }
 0x2e3   : > { %v5047_v26 = vsel %vm457_vm1, %v6702_v0, %v6697_v38  ;;  %v5050_v10 = vsel %vm457_vm1, %v6703_v32, %v6693_v56  ;;  %2601 = vmatprep.mubr.f32.mxu1 %v6824_v14  ;;  %v6711_v5 = vpop.permute.xlu1 %6710  ;;  %4970 = vmatprep.mubr.f32.mxu0 %v6824_v14  ;;  %v5049_v34 = vsel %vm457_vm1, %v6708_v40, %v6703_v32  ;;  %v5623_v32 = vld [vmem:[%s8688_s3 + $0x180] sm:$0xff] }
 0x2e4   : > { %v5971_v12 = vpack.c.bf16 %v5047_v26, %v5045_v28  ;;  %v5042_v2 = vpop.permute.xlu0 %5041  ;;  %v5973_v37 = vpack.c.bf16 %v5052_v55, %v5050_v10  ;;  %v6713_v39 = vunpack.i.h.bf16 %v6711_v5  ;;  %v6712_v17 = vunpack.i.l.bf16 %v6711_v5 }
 0x2e5   : > { %v5051_v9 = vsel %vm457_vm1, %v5042_v2, %v6707_v52  ;;  %5738 = vmatmul.mubr.msk.f32.gmra.mrb[6].mxu0 %vm520_vm4, %v5734_v13  ;;  %vm8742_vm1 = vcmask 7168  }
 0x2e6   : > { %5972 = vmatpush1.bf16.msra.mxu0 %v5971_v12  ;;  %5619 = vmatmul.mubr.msk.f32.gmra.mrb[2].mxu1 %vm520_vm4, %v5615_v19  ;;  %v5975_v62 = vpack.c.bf16 %v5051_v9, %v5049_v34  ;;  %vm8743_vm12 = vmmov %vm8742_vm1  ;;  %v5743_v12 = vld [vmem:[%s8688_s3 + $0x338] sm:$0xff] }
 0x2e7   : > { %5974 = vmatprep.subr.bf16.mxu0 %v5973_v37  ;;  %2607 = vmatprep.mubr.f32.mxu1 %v6824_v14  ;;  %v6721_v20 = vpop.permute.xlu1 %6720  ;;  %vm8744_vm13 = vmmov %vm8742_vm1 }
 0x2e8   : > { %v6716_v11 = vpop.permute.xlu0 %6715  ;;  %5137 = vmatprep.mubr.f32.mxu0 %v6824_v14  ;;  %v6722_v30 = vunpack.i.l.bf16 %v6721_v20  ;;  %v6723_v35 = vunpack.i.h.bf16 %v6721_v20  ;;  %v2691_v1 = vsel %vm8744_vm13, %v6712_v17, %v6713_v39  ;;  %vm8745_vm14 = vmmov %vm8742_vm1 }
 0x2e9   : > { %v6718_v33 = vunpack.i.h.bf16 %v6716_v11  ;;  %v6717_v63 = vunpack.i.l.bf16 %v6716_v11  ;;  %vm8746_vm15 = vmmov %vm8742_vm1  ;;  %v5749_v11 = vld [vmem:[%s8688_s3 + $0x340] sm:$0xff] }
 0x2ea   : > { %5976 = vmatpush1.bf16.msra.mxu0 %v5975_v62  ;;  %5620 = vmatmul.mubr.msk.f32.gmra.mrb[4].mxu1 %vm520_vm4, %v5616_v60  ;;  %v2690_v57 = vsel %vm8742_vm1, %v6722_v30, %v6712_v17  ;;  %v2694_v41 = vsel %vm8746_vm15, %v6722_v30, %v6723_v35  ;;  %vm8747_vm0 = vmmov %vm8742_vm1 }
 0x2eb   : > { %v2692_v25 = vsel %vm8743_vm12, %v6722_v30, %v6717_v63  ;;  %v2693_v50 = vsel %vm8745_vm14, %v6717_v63, %v6718_v33  ;;  %2613 = vmatprep.mubr.f32.mxu1 %v6824_v14  ;;  %v2688_v51 = vpop.permute.xlu1 %2687  ;;  %vm8748_vm3 = vmmov %vm8747_vm0  ;;  %v5634_v33 = vld [vmem:[%s8688_s3 + $0x1b0] sm:$0xff] }
 0x2ec   : > { %v5867_v27 = vpack.c.bf16 %v2692_v25, %v2690_v57  ;;  %v6726_v54 = vpop.permute.xlu0 %6725  ;;  %v5865_v48 = vpack.c.bf16 %v2693_v50, %v2691_v1  ;;  %vm8749_vm5 = vmmov %vm8747_vm0  ;;  %v5751_v63 = vld [vmem:[%s8688_s3 + $0x350] sm:$0xff] }
 0x2ed   : > { %v6728_v3 = vunpack.i.h.bf16 %v6726_v54  ;;  %v6727_v24 = vunpack.i.l.bf16 %v6726_v54  ;;  %5744 = vmatmul.mubr.msk.f32.vlgmr.msra.gmra.mrb[0].mxu0 %vm520_vm4, %v5740_v36  ;;  %v5752_v36 = vld [vmem:[%s8688_s3 + $0x358] sm:$0xff] }
 0x2ee   : > { %5866 = vmatprep.subr.bf16.mxu1 %v5865_v48  ;;  %5621 = vmatmul.mubr.msk.f32.gmra.mrb[6].mxu1 %vm520_vm4, %v5617_v22 }
 0x2ef   : > { %v2696_v38 = vsel %vm8747_vm0, %v6722_v30, %v6728_v3  ;;  %5868 = vmatpush1.bf16.msra.mxu1 %v5867_v27  ;;  %v2695_v56 = vsel %vm8748_vm3, %v6723_v35, %v6727_v24  ;;  %v2697_v29 = vsel %vm8749_vm5, %v6728_v3, %v2688_v51  ;;  %5143 = vmatprep.mubr.f32.mxu0 %v6824_v14  ;;  %v6736_v31 = vpop.permute.xlu1 %6735  ;;  %v5750_v30 = vld [vmem:[%s8688_s3 + $0x348] sm:$0xff]  ;;  %v5635_v35 = vld [vmem:[%s8688_s3 + $0x1b8] sm:$0xff] }
 0x2f0   : > { %v5871_v47 = vpack.c.bf16 %v2696_v38, %v2694_v41  ;;  %v6731_v21 = vpop.permute.xlu0 %6730  ;;  %v5869_v18 = vpack.c.bf16 %v2697_v29, %v2695_v56  ;;  %2782 = vmatprep.mubr.f32.mxu1 %v6824_v14  ;;  %v6737_v42 = vunpack.i.l.bf16 %v6736_v31  ;;  %v6738_v52 = vunpack.i.h.bf16 %v6736_v31 }
 0x2f1   : > { %v6733_v7 = vunpack.i.h.bf16 %v6731_v21  ;;  %v6732_v58 = vunpack.i.l.bf16 %v6731_v21  ;;  %5745 = vmatmul.mubr.msk.f32.gmra.mrb[2].mxu0 %vm520_vm4, %v5741_v16 }
 0x2f2   : > { %5870 = vmatprep.subr.bf16.mxu1 %v5869_v18  ;;  %5149 = vmatprep.mubr.f32.mxu0 %v6824_v14 }
 0x2f3   : > { %5872 = vmatpush1.bf16.msra.mxu1 %v5871_v47  ;;  %v5231_v0 = vsel %vm424_vm2, %v6732_v58, %v6733_v7  ;;  %v5233_v28 = vsel %vm424_vm2, %v6737_v42, %v6733_v7  ;;  %v6746_v13 = vpop.permute.xlu1 %6745  ;;  %v5230_v5 = vsel %vm424_vm2, %v6738_v52, %v6732_v58 }
 0x2f4   : > { %v6741_v40 = vpop.permute.xlu0 %6740  ;;  %5985 = vmatprep.subr.bf16.mxu1 %v7260_v15  ;;  %v5977_v26 = vpack.c.bf16 %v5233_v28, %v5231_v0  ;;  %v6747_v10 = vunpack.i.l.bf16 %v6746_v13  ;;  %v6748_v2 = vunpack.i.h.bf16 %v6746_v13  ;;  %v5624_v15 = vld [vmem:[%s8688_s3 + $0x188] sm:$0xff] }
 0x2f5   : > { %v6743_v55 = vunpack.i.h.bf16 %v6741_v40  ;;  %v6742_v19 = vunpack.i.l.bf16 %v6741_v40  ;;  %5746 = vmatmul.mubr.msk.f32.gmra.mrb[4].mxu0 %vm520_vm4, %v5742_v23 }
 0x2f6   : > { %5627 = vmatmul.mubr.msk.f32.vlgmr.msra.gmra.mrb[0].mxu1 %vm520_vm4, %v5623_v32  ;;  %5978 = vmatprep.subr.bf16.mxu0 %v5977_v26  ;;  %v5237_v34 = vsel %vm424_vm2, %v6747_v10, %v6733_v7 }
 0x2f7   : > { %v5232_v37 = vsel %vm424_vm2, %v6742_v19, %v6737_v42  ;;  %5987 = vmatpush1.bf16.msra.mxu1 %v7266_v61  ;;  %2788 = vmatprep.mubr.f32.mxu1 %v6824_v14  ;;  %v5235_v9 = vsel %vm424_vm2, %v6743_v55, %v6733_v7  ;;  %v5234_v61 = vsel %vm424_vm2, %v6748_v2, %v6743_v55 }
 0x2f8   : > { %v5979_v39 = vpack.c.bf16 %v5232_v37, %v5230_v5  ;;  %v5227_v17 = vpop.permute.xlu0 %5226  ;;  %5986 = vmatprep.subr.bf16.mxu1 %v7270_v59  ;;  %5155 = vmatprep.mubr.f32.mxu0 %v6824_v14  ;;  %v5981_v62 = vpack.c.bf16 %v5237_v34, %v5235_v9  ;;  %v5625_v59 = vld [vmem:[%s8688_s3 + $0x190] sm:$0xff] }
 0x2f9   : > { %v5236_v60 = vsel %vm424_vm2, %v5227_v17, %v6747_v10  ;;  %5747 = vmatmul.mubr.msk.f32.gmra.mrb[6].mxu0 %vm520_vm4, %v5743_v12 }
 0x2fa   : > { %5628 = vmatmul.mubr.msk.f32.gmra.mrb[2].mxu1 %vm520_vm4, %v5624_v15  ;;  %5980 = vmatpush1.bf16.msra.mxu0 %v5979_v39  ;;  %v5983_v20 = vpack.c.bf16 %v5236_v60, %v5234_v61 }
 0x2fb   : > { %5988 = vmatpush1.bf16.msra.mxu1 %v7284_v44  ;;  %5982 = vmatprep.subr.bf16.mxu0 %v5981_v62  ;;  %v5626_v44 = vld [vmem:[%s8688_s3 + $0x198] sm:$0xff] }
 0x2fc   : > { %2794 = vmatprep.mubr.f32.mxu1 %v6824_v14  ;;  %5322 = vmatprep.mubr.f32.mxu0 %v6824_v14 }
 0x2fe   : > { %5629 = vmatmul.mubr.msk.f32.gmra.mrb[4].mxu1 %vm520_vm4, %v5625_v59  ;;  %5984 = vmatpush1.bf16.msra.mxu0 %v5983_v20 }
 0x2ff   : > { %2800 = vmatprep.mubr.f32.mxu1 %v6824_v14 }
 0x301   : > { %5753 = vmatmul.mubr.msk.f32.vlgmr.msra.gmra.mrb[0].mxu0 %vm520_vm4, %v5749_v11 }
 0x302   : > { %5630 = vmatmul.mubr.msk.f32.gmra.mrb[6].mxu1 %vm520_vm4, %v5626_v44  ;;  %5328 = vmatprep.mubr.f32.mxu0 %v6824_v14 }
 0x303   : > { %2929 = vmatprep.mubr.f32.mxu1 %v6824_v14 }
 0x305   : > { %5754 = vmatmul.mubr.msk.f32.gmra.mrb[2].mxu0 %vm520_vm4, %v5750_v30 }
 0x306   : > { %5638 = vmatmul.mubr.msk.f32.vlgmr.msra.gmra.mrb[4].mxu1 %vm520_vm4, %v5634_v33  ;;  %5334 = vmatprep.mubr.f32.mxu0 %v6824_v14  ;;  %v5362_v48 = vpop.permute.xlu1 %5361 }
 0x307   : > { %2935 = vmatprep.mubr.f32.mxu1 %v6824_v14 }
 0x309   : > { %5755 = vmatmul.mubr.msk.f32.gmra.mrb[4].mxu0 %vm520_vm4, %v5751_v63 }
 0x30a   : > { %5639 = vmatmul.mubr.msk.f32.gmra.mrb[6].mxu1 %vm520_vm4, %v5635_v35  ;;  %5340 = vmatprep.mubr.f32.mxu0 %v6824_v14  ;;  %v5367_v16 = vpop.permute.xlu0 %5366 }
 0x30b   : > { %v5372_v58 = vpop.permute.xlu1 %5371 }
 0x30d   : > { %5756 = vmatmul.mubr.msk.f32.gmra.mrb[6].mxu0 %vm520_vm4, %v5752_v36 }
 0x30f   : > { %v5377_v15 = vpop.permute.xlu1 %5376 }
 0x3c9   : > { %v2784_v57 = vpop.f32.mrb[0].mxu1 }
 0x3ca   : > { %v2786_v25 = vpop.f32.mrb[1].mxu1 }
 0x3cd   : > { %v2790_v1 = vpop.f32.mrb[2].mxu1 }
 0x3ce   : > { %v2792_v50 = vpop.f32.mrb[3].mxu1 }
 0x3d4   : > { %v5324_v22 = vpop.f32.mrb[0].mxu0 }
 0x3d5   : > { %v5989_v27 = vadd.f32 %v5324_v22, %v2784_v57  ;;  %v5326_v51 = vpop.f32.mrb[1].mxu0 }
 0x3d6   : > { %v5990_v54 = vadd.f32 %v5326_v51, %v2786_v25 }
 0x3d7   : > { %v5379_v3 = vadd.f32 %v5989_v27, %v5362_v48 }
 0x3d8   : > { %v5380_v24 = vadd.f32 %v5990_v54, %v5362_v48  ;;  %v5330_v41 = vpop.f32.mrb[2].mxu0 }
 0x3d9   : > { %v5757_v14 = vmul.f32 -1.442695, %v5379_v3  ;;  %v5991_v38 = vadd.f32 %v5330_v41, %v2790_v1  ;;  %v2931_v56 = vpop.f32.mrb[4].mxu1  ;;  %v5332_v29 = vpop.f32.mrb[3].mxu0 }
 0x3da   : > { %v5758_v47 = vmul.f32 -1.442695, %v5380_v24  ;;  %v5992_v31 = vadd.f32 %v5332_v29, %v2792_v50  ;;  %v2933_v21 = vpop.f32.mrb[5].mxu1 }
 0x3db   : > { %6767 = vpow2.f32 %v5757_v14  ;;  %v5381_v18 = vadd.f32 %v5991_v38, %v5367_v16 }
 0x3dc   : > { %6769 = vpow2.f32 %v5758_v47  ;;  %v5382_v42 = vadd.f32 %v5992_v31, %v5367_v16  ;;  %v5336_v7 = vpop.f32.mrb[4].mxu0 }
 0x3dd   : > { %v5759_v23 = vmul.f32 -1.442695, %v5381_v18  ;;  %v5993_v52 = vadd.f32 %v5336_v7, %v2931_v56  ;;  %v2937_v32 = vpop.f32.mrb[6].mxu1  ;;  %v5338_v0 = vpop.f32.mrb[5].mxu0 }
 0x3de   : > { %v5760_v28 = vmul.f32 -1.442695, %v5382_v42  ;;  %v5994_v13 = vadd.f32 %v5338_v0, %v2933_v21  ;;  %v2939_v40 = vpop.f32.mrb[7].mxu1 }
 0x3df   : > { %6771 = vpow2.f32 %v5759_v23  ;;  %v5383_v26 = vadd.f32 %v5993_v52, %v5372_v58 }
 0x3e0   : > { %6773 = vpow2.f32 %v5760_v28  ;;  %v5384_v10 = vadd.f32 %v5994_v13, %v5372_v58  ;;  %v5342_v55 = vpop.f32.mrb[6].mxu0 }
 0x3e1   : > { %v5761_v19 = vmul.f32 -1.442695, %v5383_v26  ;;  %v5995_v12 = vadd.f32 %v5342_v55, %v2937_v32  ;;  %v5344_v5 = vpop.f32.mrb[7].mxu0 }
 0x3e2   : > { %v5762_v2 = vmul.f32 -1.442695, %v5384_v10  ;;  %v5996_v37 = vadd.f32 %v5344_v5, %v2939_v40 }
 0x3e3   : > { %6775 = vpow2.f32 %v5761_v19  ;;  %v5385_v9 = vadd.f32 %v5995_v12, %v5377_v15 }
 0x3e4   : > { %6777 = vpow2.f32 %v5762_v2  ;;  %v5386_v39 = vadd.f32 %v5996_v37, %v5377_v15 }
 0x3e5   : > { %v6768_v17 = vpop.eup %6767  ;;  %v5763_v34 = vmul.f32 -1.442695, %v5385_v9 }
 0x3e6   : > { %v6770_v60 = vpop.eup %6769  ;;  %v5411_v62 = vadd.f32 1.0, %v6768_v17  ;;  %v5764_v61 = vmul.f32 -1.442695, %v5386_v39 }
 0x3e7   : > { %v5412_v59 = vadd.f32 1.0, %v6770_v60  ;;  %6779 = vpow2.f32 %v5763_v34 }
 0x3e8   : > { %6781 = vrcp.f32 %v5411_v62 }
 0x3e9   : > { %v6772_v20 = vpop.eup %6771  ;;  %6783 = vrcp.f32 %v5412_v59 }
 0x3ea   : > { %v6774_v11 = vpop.eup %6773  ;;  %v5413_v44 = vadd.f32 1.0, %v6772_v20  ;;  %6785 = vpow2.f32 %v5764_v61 }
 0x3eb   : > { %v5414_v30 = vadd.f32 1.0, %v6774_v11 }
 0x3ec   : > { %6787 = vrcp.f32 %v5413_v44 }
 0x3ed   : > { %v6776_v33 = vpop.eup %6775  ;;  %6789 = vrcp.f32 %v5414_v30 }
 0x3ee   : > { %v6778_v63 = vpop.eup %6777  ;;  %v5415_v35 = vadd.f32 1.0, %v6776_v33 }
 0x3ef   : > { %v5416_v36 = vadd.f32 1.0, %v6778_v63 }
 0x3f0   : > { %6791 = vrcp.f32 %v5415_v35 }
 0x3f1   : > { %v6780_v57 = vpop.eup %6779  ;;  %6793 = vrcp.f32 %v5416_v36 }
 0x3f2   : > { %v6782_v25 = vpop.eup %6781  ;;  %v5417_v1 = vadd.f32 1.0, %v6780_v57 }
 0x3f3   : > { %v6784_v50 = vpop.eup %6783  ;;  %v5435_v22 = vmul.f32 %v6782_v25, %v7233_v49 }
 0x3f4   : > { %v6786_v27 = vpop.eup %6785  ;;  %v5436_v51 = vmul.f32 %v6784_v50, %v7223_v43  ;;  %6795 = vrcp.f32 %v5417_v1 }
 0x3f5   : > { %5443 = vst [vmem:[%s251_s28] sm:$0xff] %v5435_v22  ;;  %v5418_v54 = vadd.f32 1.0, %v6786_v27 }
 0x3f6   : > { %v6788_v48 = vpop.eup %6787  ;;  %5444 = vst [vmem:[%s251_s28 + $0x8] sm:$0xff] %v5436_v51 }
 0x3f7   : > { %v6790_v3 = vpop.eup %6789  ;;  %v5437_v24 = vmul.f32 %v6788_v48, %v7230_v46  ;;  %6797 = vrcp.f32 %v5418_v54 }
 0x3f8   : > { %v5438_v41 = vmul.f32 %v6790_v3, %v7227_v45 }
 0x3f9   : > { %5445 = vst [vmem:[%s251_s28 + $0x10] sm:$0xff] %v5437_v24 }
 0x3fa   : > { %v6792_v16 = vpop.eup %6791  ;;  %5446 = vst [vmem:[%s251_s28 + $0x18] sm:$0xff] %v5438_v41 }
 0x3fb   : > { %v6794_v14 = vpop.eup %6793  ;;  %v5439_v49 = vmul.f32 %v6792_v16, %v7248_v8 }
 0x3fc   : > { %v5440_v38 = vmul.f32 %v6794_v14, %v7240_v4 }
 0x3fd   : > { %5447 = vst [vmem:[%s251_s28 + $0x20] sm:$0xff] %v5439_v49 }
 0x3fe   : > { %v6796_v43 = vpop.eup %6795  ;;  %5448 = vst [vmem:[%s251_s28 + $0x28] sm:$0xff] %v5440_v38 }
 0x3ff   : > { %v5441_v56 = vmul.f32 %v6796_v43, %v7244_v6 }
 0x401   : > { %v6798_v29 = vpop.eup %6797  ;;  %5449 = vst [vmem:[%s251_s28 + $0x30] sm:$0xff] %v5441_v56 }
 0x402   : > { %v5442_v46 = vmul.f32 %v6798_v29, %v7237_v53 }
 0x404   : > { %5450 = vst [vmem:[%s251_s28 + $0x38] sm:$0xff] %v5442_v46 }
 0x405 PF: > { %s16_s21 = sadd.s32 1, %s6805_s21  }
 0x406   : > { %p13_p4 = scmp.ge.s32.totalorder %s16_s21, 4  }
 0x408   :  { %15 = sbr.rel (!%p13_p4) target bundleno = 1 (0x1), region = 126 }

</bundles_post_ra>
